<compile_context>
chip_gen: v6e
topology: v6e:2x2x1
jax: 0.10.0
libtpu: 0.0.40
codegen_flags: <defaults>
</compile_context>

<pallas_src>
import functools

import jax
import jax.numpy as jnp
from jax import lax
from jax.experimental import pallas as pl
from jax.experimental.pallas import tpu as pltpu


_UNROLL_T = 16  # fully unroll time loops up to this length, else fori_loop


def _time_loop(T, body, init):
    if T <= _UNROLL_T:
        h = init
        for t in range(T):
            h = body(t, h)
        return h
    return lax.fori_loop(0, T, body, init, unroll=2)


def _gru_step(xih_t, h, whh_bf, bhh_b, H):
    """One GRU step. xih_t already contains x @ Wih + bih (hoisted); one packed
    recurrent matmul, then static lane slices for the r/z/n gates."""
    hh = jnp.dot(h.astype(jnp.bfloat16), whh_bf,
                 preferred_element_type=jnp.float32) + bhh_b
    r = jax.nn.sigmoid(xih_t[:, :H] + hh[:, :H])
    z = jax.nn.sigmoid(xih_t[:, H:2 * H] + hh[:, H:2 * H])
    n = jnp.tanh(xih_t[:, 2 * H:] + r * hh[:, 2 * H:])
    return (1.0 - z) * n + z * h


# --------------------------------------------------------------------------
# Fused forward kernel (single invocation, no grid)
# --------------------------------------------------------------------------
def fused_forward_kernel(treedef, n_w,
                         posts_ref, resps_ref, lenp_ref, lenr_ref, eps_ref,
                         *rest):
    w_refs = rest[:n_w]
    out_vocab_ref, pmu_ref, plv_ref, rmu_ref, rlv_ref = rest[n_w:n_w + 5]
    xp_scr, xr_scr, xd_scr = rest[n_w + 5:]

    # Tree of *refs*; each packed weight slab is loaded at point of use.
    w = jax.tree_util.tree_unflatten(treedef, list(w_refs))

    Tp, Bp, E = posts_ref.shape
    Tr = resps_ref.shape[0]
    Td = out_vocab_ref.shape[0]
    V = out_vocab_ref.shape[2]
    L = pmu_ref.shape[1]
    Hp = xp_scr.shape[2] // 3
    Hr = xr_scr.shape[2] // 3
    Hd = xd_scr.shape[2] // 3
    bf = jnp.bfloat16

    # ---- Hoisted input-to-hidden matmuls: one well-filled dot per stream ----
    def hoist_xih(x_val, T, g, scr, H):
        xf = x_val.reshape(T * Bp, E).astype(bf)
        xih = jnp.dot(xf, g["wih"][...], preferred_element_type=jnp.float32)
        xih = xih + g["bih"][...]
        scr[...] = xih.reshape(T, Bp, 3 * H)

    hoist_xih(posts_ref[...], Tp, w["post_enc"], xp_scr, Hp)
    resps = resps_ref[...]
    hoist_xih(resps, Tr, w["resp_enc"], xr_scr, Hr)
    hoist_xih(resps, Tr, w["decoder"], xd_scr, Hd)   # only steps [0, Td) used

    # ---- Encoders: length-masked recurrence (pack_padded final-state) ----
    def run_encoder(T, scr, g, lens, H):
        whh = g["whh"][...]                               # bf16 (H, 3H)
        bhh = jnp.broadcast_to(g["bhh"][...], (Bp, 3 * H))

        def body(t, h):
            hn = _gru_step(scr[t], h, whh, bhh, H)
            m = (t < lens).astype(jnp.float32)
            return m * hn + (1.0 - m) * h

        return _time_loop(T, body, jnp.zeros((Bp, H), jnp.float32))

    x = run_encoder(Tp, xp_scr, w["post_enc"], lenp_ref[...], Hp)
    y = run_encoder(Tr, xr_scr, w["resp_enc"], lenr_ref[...], Hr)
    x_bf = x.astype(bf)

    # ---- PriorNet: tanh hidden -> packed [mu | logvar] ----
    pr = w["prior"]
    ph = jnp.tanh(jnp.dot(x_bf, pr["w1"][...],
                          preferred_element_type=jnp.float32) + pr["b1"][...])
    p2 = jnp.dot(ph.astype(bf), pr["w2"][...],
                 preferred_element_type=jnp.float32) + pr["b2"][...]
    pmu_ref[...] = p2[:, :L]
    plv_ref[...] = p2[:, L:]

    # ---- RecognizeNet on cat([x, y]) expressed as two dots (no concat) ----
    rc = w["recog"]
    rh = jnp.tanh(jnp.dot(x_bf, rc["w1x"][...],
                          preferred_element_type=jnp.float32)
                  + jnp.dot(y.astype(bf), rc["w1y"][...],
                            preferred_element_type=jnp.float32)
                  + rc["b1"][...])
    r2 = jnp.dot(rh.astype(bf), rc["w2"][...],
                 preferred_element_type=jnp.float32) + rc["b2"][...]
    rmu = r2[:, :L]
    rlv = r2[:, L:]
    rmu_ref[...] = rmu
    rlv_ref[...] = rlv

    # ---- Reparameterize + decoder initial state (Linear on cat([z, x])) ----
    # TODO(synk): some PrepareState variants apply tanh here; reference family
    # uses a plain Linear, which is what we implement.
    pp = w["prep"]
    z = rmu + jnp.exp(0.5 * rlv) * eps_ref[...]
    h0 = (jnp.dot(z.astype(bf), pp["wz"][...],
                  preferred_element_type=jnp.float32)
          + jnp.dot(x_bf, pp["wx"][...], preferred_element_type=jnp.float32)
          + pp["b"][...])

    # ---- Teacher-forced decoder with fused Linear+Softmax projector ----
    de = w["decoder"]
    whh_d = de["whh"][...]
    bhh_d = jnp.broadcast_to(de["bhh"][...], (Bp, 3 * Hd))
    pj_w = w["proj"]["w"][...]                              # bf16 (Hd, V)
    pj_b = jnp.broadcast_to(w["proj"]["b"][...], (Bp, V))   # f32

    def dec_body(t, h):
        h = _gru_step(xd_scr[t], h, whh_d, bhh_d, Hd)
        logits = jnp.dot(h.astype(bf), pj_w,
                         preferred_element_type=jnp.float32) + pj_b
        m = jnp.max(logits, axis=-1, keepdims=True)
        e = jnp.exp(logits - m)
        denom = jnp.sum(e, axis=-1, keepdims=True)
        out_vocab_ref[t] = e * pl.reciprocal(denom, approx=True)
        return h

    _time_loop(Td, dec_body, h0)


# --------------------------------------------------------------------------
# Parameter init (PyTorch layout), wrapper-side precompute, forward
# --------------------------------------------------------------------------
class Config:
    num_vocab = 256
    embedding_size = 32
    affect_embedding_size = 3           # unused in this forward path
    post_encoder_output_size = 32
    response_encoder_output_size = 32
    latent_size = 16
    dims_prior = 24
    dims_recognize = 24
    decoder_output_size = 32
    pad_id = 0
    start_id = 1
    end_id = 2


def init_params(cfg, key):
    ks = iter(jax.random.split(key, 32))
    s = 0.1

    def w(shape):
        return jax.random.normal(next(ks), shape, jnp.float32) * s

    E, Hp, Hr, Hd = (cfg.embedding_size, cfg.post_encoder_output_size,
                     cfg.response_encoder_output_size, cfg.decoder_output_size)
    L, V = cfg.latent_size, cfg.num_vocab

    emb = w((V, E))
    emb = emb.at[cfg.pad_id].set(0.0)    # nn.Embedding(padding_idx=pad_id)

    def gru(in_dim, hid):
        # (in, 3H)/(H, 3H) with gate order [r | z | n] (PyTorch GRU order).
        return dict(wih=w((in_dim, 3 * hid)), whh=w((hid, 3 * hid)),
                    bih=w((1, 3 * hid)), bhh=w((1, 3 * hid)))

    return dict(
        embedding=emb,
        post_enc=gru(E, Hp),
        resp_enc=gru(E, Hr),
        prior=dict(w1=w((Hp, cfg.dims_prior)), b1=w((1, cfg.dims_prior)),
                   w2=w((cfg.dims_prior, 2 * L)), b2=w((1, 2 * L))),
        recog=dict(w1=w((Hp + Hr, cfg.dims_recognize)),
                   b1=w((1, cfg.dims_recognize)),
                   w2=w((cfg.dims_recognize, 2 * L)), b2=w((1, 2 * L))),
        prep=dict(wz=w((L, Hd)), wx=w((Hp, Hd)), b=w((1, Hd))),
        decoder=gru(E, Hd),
        proj=dict(w=w((Hd, V)), b=w((1, V))),
    )


def precompute_kernel_weights(params, cfg, dtype=jnp.bfloat16):
    """Pack GRU weights as lane-dense [r|z|n] slabs, cast matmul operands to
    bf16, split the recognize-net input matrix. One-time wrapper-side work."""
    Hp = cfg.post_encoder_output_size
    f32 = jnp.float32

    def pack_gru(g):
        return dict(wih=g["wih"].astype(dtype), whh=g["whh"].astype(dtype),
                    bih=g["bih"].astype(f32), bhh=g["bhh"].astype(f32))

    pr, rc = params["prior"], params["recog"]
    pp, pj = params["prep"], params["proj"]
    kweights = dict(
        post_enc=pack_gru(params["post_enc"]),
        resp_enc=pack_gru(params["resp_enc"]),
        decoder=pack_gru(params["decoder"]),
        prior=dict(w1=pr["w1"].astype(dtype), b1=pr["b1"].astype(f32),
                   w2=pr["w2"].astype(dtype), b2=pr["b2"].astype(f32)),
        recog=dict(w1x=rc["w1"][:Hp].astype(dtype),
                   w1y=rc["w1"][Hp:].astype(dtype),
                   b1=rc["b1"].astype(f32),
                   w2=rc["w2"].astype(dtype), b2=rc["b2"].astype(f32)),
        prep=dict(wz=pp["wz"].astype(dtype), wx=pp["wx"].astype(dtype),
                  b=pp["b"].astype(f32)),
        proj=dict(w=pj["w"].astype(dtype), b=pj["b"].astype(f32)),
    )
    flat, treedef = jax.tree_util.tree_flatten(kweights)
    return flat, treedef


def forward(params, cfg, id_posts, len_posts, id_responses, len_responses,
            sampled_latents):
    B, Tp = id_posts.shape
    _, Tr = id_responses.shape
    Td = Tr - 1
    Bp = max(8, -(-B // 8) * 8)          # pad batch to a sublane multiple

    emb = params["embedding"]
    embed_posts = jnp.take(emb, id_posts, axis=0)        # (B, Tp, E)
    embed_resps = jnp.take(emb, id_responses, axis=0)    # (B, Tr, E)
    posts_tbe = jnp.transpose(embed_posts, (1, 0, 2))    # (Tp, B, E)
    resps_tbe = jnp.transpose(embed_resps, (1, 0, 2))    # (Tr, B, E)

    def pad_batch(a, axis):
        pad = [(0, 0)] * a.ndim
        pad[axis] = (0, Bp - B)
        return jnp.pad(a, pad)

    posts_tbe = pad_batch(posts_tbe, 1)
    resps_tbe = pad_batch(resps_tbe, 1)
    lenp = pad_batch(len_posts.astype(jnp.int32), 0).reshape(Bp, 1)
    lenr = pad_batch(len_responses.astype(jnp.int32), 0).reshape(Bp, 1)
    eps = pad_batch(sampled_latents.astype(jnp.float32), 0)

    flat_w, treedef = precompute_kernel_weights(params, cfg)
    L, V = cfg.latent_size, cfg.num_vocab
    Hp, Hr, Hd = (cfg.post_encoder_output_size,
                  cfg.response_encoder_output_size, cfg.decoder_output_size)

    kernel = functools.partial(fused_forward_kernel, treedef, len(flat_w))
    out_shapes = (
        jax.ShapeDtypeStruct((Td, Bp, V), jnp.float32),   # lane-dense V=256
        jax.ShapeDtypeStruct((Bp, L), jnp.float32),       # _mu   (prior)
        jax.ShapeDtypeStruct((Bp, L), jnp.float32),       # _logvar
        jax.ShapeDtypeStruct((Bp, L), jnp.float32),       # mu    (recognize)
        jax.ShapeDtypeStruct((Bp, L), jnp.float32),       # logvar
    )
    scratch = [
        pltpu.VMEM((Tp, Bp, 3 * Hp), jnp.float32),        # hoisted post xih
        pltpu.VMEM((Tr, Bp, 3 * Hr), jnp.float32),        # hoisted resp xih
        pltpu.VMEM((Tr, Bp, 3 * Hd), jnp.float32),        # hoisted decoder xih
    ]
    out_vocab_t, _mu, _logvar, mu, logvar = pl.pallas_call(
        kernel, out_shape=out_shapes, scratch_shapes=scratch,
    )(posts_tbe, resps_tbe, lenp, lenr, eps, *flat_w)

    output_vocab = jnp.transpose(out_vocab_t, (1, 0, 2))[:B]  # (B, Tr-1, V)
    return output_vocab, _mu[:B], _logvar[:B], mu[:B], logvar[:B]


# --------------------------------------------------------------------------
# Pure-JAX f32 reference (mirrors the PyTorch use_true=True path)
# --------------------------------------------------------------------------
def forward_ref(params, cfg, id_posts, len_posts, id_responses, len_responses,
                eps):
    emb = params["embedding"]
    ep = emb[id_posts]        # (B, Tp, E)
    er = emb[id_responses]    # (B, Tr, E)

    def gru_cell(xt, h, g):
        H = g["whh"].shape[0]
        gx = xt @ g["wih"] + g["bih"][0]
        gh = h @ g["whh"] + g["bhh"][0]
        r = jax.nn.sigmoid(gx[:, :H] + gh[:, :H])
        z = jax.nn.sigmoid(gx[:, H:2 * H] + gh[:, H:2 * H])
        n = jnp.tanh(gx[:, 2 * H:] + r * gh[:, 2 * H:])
        return (1.0 - z) * n + z * h

    def encode(x_bte, lens, g):
        B, T, _ = x_bte.shape
        h = jnp.zeros((B, g["whh"].shape[0]), jnp.float32)
        for t in range(T):
            hn = gru_cell(x_bte[:, t], h, g)
            m = (t < lens).astype(jnp.float32)[:, None]
            h = m * hn + (1.0 - m) * h
        return h

    x = encode(ep, len_posts, params["post_enc"])
    y = encode(er, len_responses, params["resp_enc"])
    L = cfg.latent_size

    pr = params["prior"]
    p2 = jnp.tanh(x @ pr["w1"] + pr["b1"][0]) @ pr["w2"] + pr["b2"][0]
    _mu, _logvar = p2[:, :L], p2[:, L:]

    rc = params["recog"]
    r2 = (jnp.tanh(jnp.concatenate([x, y], 1) @ rc["w1"] + rc["b1"][0])
          @ rc["w2"] + rc["b2"][0])
    mu, logvar = r2[:, :L], r2[:, L:]

    pp = params["prep"]
    z = mu + jnp.exp(0.5 * logvar) * eps
    h = z @ pp["wz"] + x @ pp["wx"] + pp["b"][0]

    dg, pj = params["decoder"], params["proj"]
    outs = []
    for t in range(id_responses.shape[1] - 1):
        h = gru_cell(er[:, t], h, dg)
        outs.append(jax.nn.softmax(h @ pj["w"] + pj["b"][0], -1))
    return jnp.stack(outs, 1), _mu, _logvar, mu, logvar


# --------------------------------------------------------------------------
if __name__ == "__main__":
    cfg = Config()
    key = jax.random.PRNGKey(0)
    kp, ki = jax.random.split(key)
    params = init_params(cfg, kp)

    B, Tp, Tr = 2, 8, 8
    k1, k2, k3 = jax.random.split(ki, 3)
    id_posts = jax.random.randint(k1, (B, Tp), 3, cfg.num_vocab, jnp.int32)
    id_responses = jax.random.randint(k2, (B, Tr), 3, cfg.num_vocab, jnp.int32)
    len_posts = jnp.array([Tp, 5], jnp.int32)
    len_responses = jnp.array([Tr, 6], jnp.int32)
    sampled_latents = jax.random.normal(k3, (B, cfg.latent_size), jnp.float32)

    outs = forward(params, cfg, id_posts, len_posts, id_responses,
                   len_responses, sampled_latents)
    jax.block_until_ready(outs)
    out_vocab, _mu, _logvar, mu, logvar = outs

    assert out_vocab.shape == (B, Tr - 1, cfg.num_vocab)
    assert _mu.shape == (B, cfg.latent_size)
    assert logvar.shape == (B, cfg.latent_size)
    # softmax rows sum to ~1 (approx-reciprocal in kernel -> loose atol)
    assert jnp.allclose(out_vocab.sum(-1), 1.0, atol=1e-2)

    # Semantic check vs. f32 reference (bf16 MXU + approx recip -> loose tol).
    refs = forward_ref(params, cfg, id_posts, len_posts, id_responses,
                       len_responses, sampled_latents)
    for name, a, b in zip(("output_vocab", "_mu", "_logvar", "mu", "logvar"),
                          outs, refs):
        err = float(jnp.max(jnp.abs(a - b)))
        assert err < 5e-2, f"{name} max abs err {err}"

    print("KERNEL_OK")
</pallas_src>

<mosaic_0001>
module attributes {stable_mosaic.version = 11 : i64} {
  func.func @fused_forward_kernel(%arg0: memref<8x8x32xf32, #tpu.memory_space<vmem>>, %arg1: memref<8x8x32xf32, #tpu.memory_space<vmem>>, %arg2: memref<8x1xi32, #tpu.memory_space<vmem>>, %arg3: memref<8x1xi32, #tpu.memory_space<vmem>>, %arg4: memref<8x16xf32, #tpu.memory_space<vmem>>, %arg5: memref<1x96xf32, #tpu.memory_space<vmem>>, %arg6: memref<1x96xf32, #tpu.memory_space<vmem>>, %arg7: memref<32x96xbf16, #tpu.memory_space<vmem>>, %arg8: memref<32x96xbf16, #tpu.memory_space<vmem>>, %arg9: memref<1x96xf32, #tpu.memory_space<vmem>>, %arg10: memref<1x96xf32, #tpu.memory_space<vmem>>, %arg11: memref<32x96xbf16, #tpu.memory_space<vmem>>, %arg12: memref<32x96xbf16, #tpu.memory_space<vmem>>, %arg13: memref<1x32xf32, #tpu.memory_space<vmem>>, %arg14: memref<32x32xbf16, #tpu.memory_space<vmem>>, %arg15: memref<16x32xbf16, #tpu.memory_space<vmem>>, %arg16: memref<1x24xf32, #tpu.memory_space<vmem>>, %arg17: memref<1x32xf32, #tpu.memory_space<vmem>>, %arg18: memref<32x24xbf16, #tpu.memory_space<vmem>>, %arg19: memref<24x32xbf16, #tpu.memory_space<vmem>>, %arg20: memref<1x256xf32, #tpu.memory_space<vmem>>, %arg21: memref<32x256xbf16, #tpu.memory_space<vmem>>, %arg22: memref<1x24xf32, #tpu.memory_space<vmem>>, %arg23: memref<1x32xf32, #tpu.memory_space<vmem>>, %arg24: memref<32x24xbf16, #tpu.memory_space<vmem>>, %arg25: memref<32x24xbf16, #tpu.memory_space<vmem>>, %arg26: memref<24x32xbf16, #tpu.memory_space<vmem>>, %arg27: memref<1x96xf32, #tpu.memory_space<vmem>>, %arg28: memref<1x96xf32, #tpu.memory_space<vmem>>, %arg29: memref<32x96xbf16, #tpu.memory_space<vmem>>, %arg30: memref<32x96xbf16, #tpu.memory_space<vmem>>, %arg31: memref<7x8x256xf32, #tpu.memory_space<vmem>>, %arg32: memref<8x16xf32, #tpu.memory_space<vmem>>, %arg33: memref<8x16xf32, #tpu.memory_space<vmem>>, %arg34: memref<8x16xf32, #tpu.memory_space<vmem>>, %arg35: memref<8x16xf32, #tpu.memory_space<vmem>>, %arg36: memref<8x8x96xf32, #tpu.memory_space<vmem>>, %arg37: memref<8x8x96xf32, #tpu.memory_space<vmem>>, %arg38: memref<8x8x96xf32, #tpu.memory_space<vmem>>) attributes {dimension_semantics = [], scalar_prefetch = 0 : i64, scratch_operands = 3 : i64, tpu.core_type = #tpu.core_type<tc>} {
    %c0 = arith.constant 0 : index
    %c0_0 = arith.constant 0 : index
    %c0_1 = arith.constant 0 : index
    %0 = vector.load %arg0[%c0, %c0_0, %c0_1] : memref<8x8x32xf32, #tpu.memory_space<vmem>>, vector<8x8x32xf32>
    %1 = vector.shape_cast %0 : vector<8x8x32xf32> to vector<64x32xf32>
    %2 = arith.truncf %1 : vector<64x32xf32> to vector<64x32xbf16>
    %c0_2 = arith.constant 0 : index
    %c0_3 = arith.constant 0 : index
    %3 = vector.load %arg12[%c0_2, %c0_3] : memref<32x96xbf16, #tpu.memory_space<vmem>>, vector<32x96xbf16>
    %cst = arith.constant dense<0.000000e+00> : vector<64x96xf32>
    %4 = tpu.matmul %2, %3, %cst {dimension_numbers = #tpu.dot_dimension_numbers<[1], [0], [0], [1], [0, 0, 1, 1], [], []>} : vector<64x32xbf16>, vector<32x96xbf16>, vector<64x96xf32> -> vector<64x96xf32>
    %c0_4 = arith.constant 0 : index
    %c0_5 = arith.constant 0 : index
    %5 = vector.load %arg10[%c0_4, %c0_5] : memref<1x96xf32, #tpu.memory_space<vmem>>, vector<1x96xf32>
    %6 = vector.broadcast %5 : vector<1x96xf32> to vector<64x96xf32>
    %7 = arith.addf %4, %6 : vector<64x96xf32>
    %8 = vector.shape_cast %7 : vector<64x96xf32> to vector<8x8x96xf32>
    %c0_6 = arith.constant 0 : index
    %c0_7 = arith.constant 0 : index
    %c0_8 = arith.constant 0 : index
    %9 = vector.load %arg36[%c0_6, %c0_7, %c0_8] : memref<8x8x96xf32, #tpu.memory_space<vmem>>, vector<8x8x96xf32>
    tpu.vector_store %arg36[%c0_6, %c0_7, %c0_8], %8 {strides = array<i32>} : memref<8x8x96xf32, #tpu.memory_space<vmem>>, vector<8x8x96xf32>,
    %c0_9 = arith.constant 0 : index
    %c0_10 = arith.constant 0 : index
    %c0_11 = arith.constant 0 : index
    %10 = vector.load %arg1[%c0_9, %c0_10, %c0_11] : memref<8x8x32xf32, #tpu.memory_space<vmem>>, vector<8x8x32xf32>
    %11 = vector.shape_cast %10 : vector<8x8x32xf32> to vector<64x32xf32>
    %12 = arith.truncf %11 : vector<64x32xf32> to vector<64x32xbf16>
    %c0_12 = arith.constant 0 : index
    %c0_13 = arith.constant 0 : index
    %13 = vector.load %arg30[%c0_12, %c0_13] : memref<32x96xbf16, #tpu.memory_space<vmem>>, vector<32x96xbf16>
    %cst_14 = arith.constant dense<0.000000e+00> : vector<64x96xf32>
    %14 = tpu.matmul %12, %13, %cst_14 {dimension_numbers = #tpu.dot_dimension_numbers<[1], [0], [0], [1], [0, 0, 1, 1], [], []>} : vector<64x32xbf16>, vector<32x96xbf16>, vector<64x96xf32> -> vector<64x96xf32>
    %c0_15 = arith.constant 0 : index
    %c0_16 = arith.constant 0 : index
    %15 = vector.load %arg28[%c0_15, %c0_16] : memref<1x96xf32, #tpu.memory_space<vmem>>, vector<1x96xf32>
    %16 = vector.broadcast %15 : vector<1x96xf32> to vector<64x96xf32>
    %17 = arith.addf %14, %16 : vector<64x96xf32>
    %18 = vector.shape_cast %17 : vector<64x96xf32> to vector<8x8x96xf32>
    %c0_17 = arith.constant 0 : index
    %c0_18 = arith.constant 0 : index
    %c0_19 = arith.constant 0 : index
    %19 = vector.load %arg37[%c0_17, %c0_18, %c0_19] : memref<8x8x96xf32, #tpu.memory_space<vmem>>, vector<8x8x96xf32>
    tpu.vector_store %arg37[%c0_17, %c0_18, %c0_19], %18 {strides = array<i32>} : memref<8x8x96xf32, #tpu.memory_space<vmem>>, vector<8x8x96xf32>,
    %20 = vector.shape_cast %10 : vector<8x8x32xf32> to vector<64x32xf32>
    %21 = arith.truncf %20 : vector<64x32xf32> to vector<64x32xbf16>
    %c0_20 = arith.constant 0 : index
    %c0_21 = arith.constant 0 : index
    %22 = vector.load %arg8[%c0_20, %c0_21] : memref<32x96xbf16, #tpu.memory_space<vmem>>, vector<32x96xbf16>
    %cst_22 = arith.constant dense<0.000000e+00> : vector<64x96xf32>
    %23 = tpu.matmul %21, %22, %cst_22 {dimension_numbers = #tpu.dot_dimension_numbers<[1], [0], [0], [1], [0, 0, 1, 1], [], []>} : vector<64x32xbf16>, vector<32x96xbf16>, vector<64x96xf32> -> vector<64x96xf32>
    %c0_23 = arith.constant 0 : index
    %c0_24 = arith.constant 0 : index
    %24 = vector.load %arg6[%c0_23, %c0_24] : memref<1x96xf32, #tpu.memory_space<vmem>>, vector<1x96xf32>
    %25 = vector.broadcast %24 : vector<1x96xf32> to vector<64x96xf32>
    %26 = arith.addf %23, %25 : vector<64x96xf32>
    %27 = vector.shape_cast %26 : vector<64x96xf32> to vector<8x8x96xf32>
    %c0_25 = arith.constant 0 : index
    %c0_26 = arith.constant 0 : index
    %c0_27 = arith.constant 0 : index
    %28 = vector.load %arg38[%c0_25, %c0_26, %c0_27] : memref<8x8x96xf32, #tpu.memory_space<vmem>>, vector<8x8x96xf32>
    tpu.vector_store %arg38[%c0_25, %c0_26, %c0_27], %27 {strides = array<i32>} : memref<8x8x96xf32, #tpu.memory_space<vmem>>, vector<8x8x96xf32>,
    %c0_28 = arith.constant 0 : index
    %c0_29 = arith.constant 0 : index
    %29 = vector.load %arg2[%c0_28, %c0_29] : memref<8x1xi32, #tpu.memory_space<vmem>>, vector<8x1xi32>
    %c0_30 = arith.constant 0 : index
    %c0_31 = arith.constant 0 : index
    %30 = vector.load %arg11[%c0_30, %c0_31] : memref<32x96xbf16, #tpu.memory_space<vmem>>, vector<32x96xbf16>
    %c0_32 = arith.constant 0 : index
    %c0_33 = arith.constant 0 : index
    %31 = vector.load %arg9[%c0_32, %c0_33] : memref<1x96xf32, #tpu.memory_space<vmem>>, vector<1x96xf32>
    %32 = vector.shape_cast %31 : vector<1x96xf32> to vector<1x96xf32>
    %33 = vector.broadcast %32 : vector<1x96xf32> to vector<8x96xf32>
    %cst_34 = arith.constant 0.000000e+00 : f32
    %34 = vector.broadcast %cst_34 : f32 to vector<8x32xf32>
    %c0_35 = arith.constant 0 : index
    %c0_36 = arith.constant 0 : index
    %c0_37 = arith.constant 0 : index
    %35 = vector.load %arg36[%c0_35, %c0_36, %c0_37] : memref<8x8x96xf32, #tpu.memory_space<vmem>>, vector<1x8x96xf32>
    %36 = vector.shape_cast %35 : vector<1x8x96xf32> to vector<8x96xf32>
    %37 = arith.truncf %34 : vector<8x32xf32> to vector<8x32xbf16>
    %cst_38 = arith.constant dense<0.000000e+00> : vector<8x96xf32>
    %38 = tpu.matmul %37, %30, %cst_38 {dimension_numbers = #tpu.dot_dimension_numbers<[1], [0], [0], [1], [0, 0, 1, 1], [], []>} : vector<8x32xbf16>, vector<32x96xbf16>, vector<8x96xf32> -> vector<8x96xf32>
    %39 = arith.addf %38, %33 : vector<8x96xf32>
    %40 = vector.extract_strided_slice %36 {offsets = [0, 0], sizes = [8, 32], strides = [1, 1]} : vector<8x96xf32> to vector<8x32xf32>
    %41 = vector.extract_strided_slice %39 {offsets = [0, 0], sizes = [8, 32], strides = [1, 1]} : vector<8x96xf32> to vector<8x32xf32>
    %42 = arith.addf %40, %41 : vector<8x32xf32>
    %43 = arith.negf %42 : vector<8x32xf32>
    %44 = math.exp %43 : vector<8x32xf32>
    %cst_39 = arith.constant 1.000000e+00 : f32
    %45 = vector.broadcast %cst_39 : f32 to vector<8x32xf32>
    %46 = arith.addf %45, %44 : vector<8x32xf32>
    %47 = arith.divf %45, %46 : vector<8x32xf32>
    %48 = vector.extract_strided_slice %36 {offsets = [0, 32], sizes = [8, 32], strides = [1, 1]} : vector<8x96xf32> to vector<8x32xf32>
    %49 = vector.extract_strided_slice %39 {offsets = [0, 32], sizes = [8, 32], strides = [1, 1]} : vector<8x96xf32> to vector<8x32xf32>
    %50 = arith.addf %48, %49 : vector<8x32xf32>
    %51 = arith.negf %50 : vector<8x32xf32>
    %52 = math.exp %51 : vector<8x32xf32>
    %cst_40 = arith.constant 1.000000e+00 : f32
    %53 = vector.broadcast %cst_40 : f32 to vector<8x32xf32>
    %54 = arith.addf %53, %52 : vector<8x32xf32>
    %55 = arith.divf %53, %54 : vector<8x32xf32>
    %56 = vector.extract_strided_slice %36 {offsets = [0, 64], sizes = [8, 32], strides = [1, 1]} : vector<8x96xf32> to vector<8x32xf32>
    %57 = vector.extract_strided_slice %39 {offsets = [0, 64], sizes = [8, 32], strides = [1, 1]} : vector<8x96xf32> to vector<8x32xf32>
    %58 = arith.mulf %47, %57 : vector<8x32xf32>
    %59 = arith.addf %56, %58 : vector<8x32xf32>
    %60 = math.tanh %59 : vector<8x32xf32>
    %cst_41 = arith.constant 1.000000e+00 : f32
    %61 = vector.broadcast %cst_41 : f32 to vector<8x32xf32>
    %62 = arith.subf %61, %55 : vector<8x32xf32>
    %63 = arith.mulf %62, %60 : vector<8x32xf32>
    %64 = arith.mulf %55, %34 : vector<8x32xf32>
    %65 = arith.addf %63, %64 : vector<8x32xf32>
    %c0_i32 = arith.constant 0 : i32
    %66 = vector.broadcast %c0_i32 : i32 to vector<8x1xi32>
    %67 = arith.cmpi sgt, %29, %66 : vector<8x1xi32>
    %68 = arith.extui %67 : vector<8x1xi1> to vector<8x1xi32>
    %69 = arith.sitofp %68 : vector<8x1xi32> to vector<8x1xf32>
    %70 = vector.broadcast %69 : vector<8x1xf32> to vector<8x32xf32>
    %71 = arith.mulf %70, %65 : vector<8x32xf32>
    %cst_42 = arith.constant 1.000000e+00 : f32
    %72 = vector.broadcast %cst_42 : f32 to vector<8x1xf32>
    %73 = arith.subf %72, %69 : vector<8x1xf32>
    %74 = vector.broadcast %73 : vector<8x1xf32> to vector<8x32xf32>
    %75 = arith.mulf %74, %34 : vector<8x32xf32>
    %76 = arith.addf %71, %75 : vector<8x32xf32>
    %c1 = arith.constant 1 : index
    %c0_43 = arith.constant 0 : index
    %c0_44 = arith.constant 0 : index
    %77 = vector.load %arg36[%c1, %c0_43, %c0_44] : memref<8x8x96xf32, #tpu.memory_space<vmem>>, vector<1x8x96xf32>
    %78 = vector.shape_cast %77 : vector<1x8x96xf32> to vector<8x96xf32>
    %79 = arith.truncf %76 : vector<8x32xf32> to vector<8x32xbf16>
    %cst_45 = arith.constant dense<0.000000e+00> : vector<8x96xf32>
    %80 = tpu.matmul %79, %30, %cst_45 {dimension_numbers = #tpu.dot_dimension_numbers<[1], [0], [0], [1], [0, 0, 1, 1], [], []>} : vector<8x32xbf16>, vector<32x96xbf16>, vector<8x96xf32> -> vector<8x96xf32>
    %81 = arith.addf %80, %33 : vector<8x96xf32>
    %82 = vector.extract_strided_slice %78 {offsets = [0, 0], sizes = [8, 32], strides = [1, 1]} : vector<8x96xf32> to vector<8x32xf32>
    %83 = vector.extract_strided_slice %81 {offsets = [0, 0], sizes = [8, 32], strides = [1, 1]} : vector<8x96xf32> to vector<8x32xf32>
    %84 = arith.addf %82, %83 : vector<8x32xf32>
    %85 = arith.negf %84 : vector<8x32xf32>
    %86 = math.exp %85 : vector<8x32xf32>
    %cst_46 = arith.constant 1.000000e+00 : f32
    %87 = vector.broadcast %cst_46 : f32 to vector<8x32xf32>
    %88 = arith.addf %87, %86 : vector<8x32xf32>
    %89 = arith.divf %87, %88 : vector<8x32xf32>
    %90 = vector.extract_strided_slice %78 {offsets = [0, 32], sizes = [8, 32], strides = [1, 1]} : vector<8x96xf32> to vector<8x32xf32>
    %91 = vector.extract_strided_slice %81 {offsets = [0, 32], sizes = [8, 32], strides = [1, 1]} : vector<8x96xf32> to vector<8x32xf32>
    %92 = arith.addf %90, %91 : vector<8x32xf32>
    %93 = arith.negf %92 : vector<8x32xf32>
    %94 = math.exp %93 : vector<8x32xf32>
    %cst_47 = arith.constant 1.000000e+00 : f32
    %95 = vector.broadcast %cst_47 : f32 to vector<8x32xf32>
    %96 = arith.addf %95, %94 : vector<8x32xf32>
    %97 = arith.divf %95, %96 : vector<8x32xf32>
    %98 = vector.extract_strided_slice %78 {offsets = [0, 64], sizes = [8, 32], strides = [1, 1]} : vector<8x96xf32> to vector<8x32xf32>
    %99 = vector.extract_strided_slice %81 {offsets = [0, 64], sizes = [8, 32], strides = [1, 1]} : vector<8x96xf32> to vector<8x32xf32>
    %100 = arith.mulf %89, %99 : vector<8x32xf32>
    %101 = arith.addf %98, %100 : vector<8x32xf32>
    %102 = math.tanh %101 : vector<8x32xf32>
    %cst_48 = arith.constant 1.000000e+00 : f32
    %103 = vector.broadcast %cst_48 : f32 to vector<8x32xf32>
    %104 = arith.subf %103, %97 : vector<8x32xf32>
    %105 = arith.mulf %104, %102 : vector<8x32xf32>
    %106 = arith.mulf %97, %76 : vector<8x32xf32>
    %107 = arith.addf %105, %106 : vector<8x32xf32>
    %c1_i32 = arith.constant 1 : i32
    %108 = vector.broadcast %c1_i32 : i32 to vector<8x1xi32>
    %109 = arith.cmpi sgt, %29, %108 : vector<8x1xi32>
    %110 = arith.extui %109 : vector<8x1xi1> to vector<8x1xi32>
    %111 = arith.sitofp %110 : vector<8x1xi32> to vector<8x1xf32>
    %112 = vector.broadcast %111 : vector<8x1xf32> to vector<8x32xf32>
    %113 = arith.mulf %112, %107 : vector<8x32xf32>
    %cst_49 = arith.constant 1.000000e+00 : f32
    %114 = vector.broadcast %cst_49 : f32 to vector<8x1xf32>
    %115 = arith.subf %114, %111 : vector<8x1xf32>
    %116 = vector.broadcast %115 : vector<8x1xf32> to vector<8x32xf32>
    %117 = arith.mulf %116, %76 : vector<8x32xf32>
    %118 = arith.addf %113, %117 : vector<8x32xf32>
    %c2 = arith.constant 2 : index
    %c0_50 = arith.constant 0 : index
    %c0_51 = arith.constant 0 : index
    %119 = vector.load %arg36[%c2, %c0_50, %c0_51] : memref<8x8x96xf32, #tpu.memory_space<vmem>>, vector<1x8x96xf32>
    %120 = vector.shape_cast %119 : vector<1x8x96xf32> to vector<8x96xf32>
    %121 = arith.truncf %118 : vector<8x32xf32> to vector<8x32xbf16>
    %cst_52 = arith.constant dense<0.000000e+00> : vector<8x96xf32>
    %122 = tpu.matmul %121, %30, %cst_52 {dimension_numbers = #tpu.dot_dimension_numbers<[1], [0], [0], [1], [0, 0, 1, 1], [], []>} : vector<8x32xbf16>, vector<32x96xbf16>, vector<8x96xf32> -> vector<8x96xf32>
    %123 = arith.addf %122, %33 : vector<8x96xf32>
    %124 = vector.extract_strided_slice %120 {offsets = [0, 0], sizes = [8, 32], strides = [1, 1]} : vector<8x96xf32> to vector<8x32xf32>
    %125 = vector.extract_strided_slice %123 {offsets = [0, 0], sizes = [8, 32], strides = [1, 1]} : vector<8x96xf32> to vector<8x32xf32>
    %126 = arith.addf %124, %125 : vector<8x32xf32>
    %127 = arith.negf %126 : vector<8x32xf32>
    %128 = math.exp %127 : vector<8x32xf32>
    %cst_53 = arith.constant 1.000000e+00 : f32
    %129 = vector.broadcast %cst_53 : f32 to vector<8x32xf32>
    %130 = arith.addf %129, %128 : vector<8x32xf32>
    %131 = arith.divf %129, %130 : vector<8x32xf32>
    %132 = vector.extract_strided_slice %120 {offsets = [0, 32], sizes = [8, 32], strides = [1, 1]} : vector<8x96xf32> to vector<8x32xf32>
    %133 = vector.extract_strided_slice %123 {offsets = [0, 32], sizes = [8, 32], strides = [1, 1]} : vector<8x96xf32> to vector<8x32xf32>
    %134 = arith.addf %132, %133 : vector<8x32xf32>
    %135 = arith.negf %134 : vector<8x32xf32>
    %136 = math.exp %135 : vector<8x32xf32>
    %cst_54 = arith.constant 1.000000e+00 : f32
    %137 = vector.broadcast %cst_54 : f32 to vector<8x32xf32>
    %138 = arith.addf %137, %136 : vector<8x32xf32>
    %139 = arith.divf %137, %138 : vector<8x32xf32>
    %140 = vector.extract_strided_slice %120 {offsets = [0, 64], sizes = [8, 32], strides = [1, 1]} : vector<8x96xf32> to vector<8x32xf32>
    %141 = vector.extract_strided_slice %123 {offsets = [0, 64], sizes = [8, 32], strides = [1, 1]} : vector<8x96xf32> to vector<8x32xf32>
    %142 = arith.mulf %131, %141 : vector<8x32xf32>
    %143 = arith.addf %140, %142 : vector<8x32xf32>
    %144 = math.tanh %143 : vector<8x32xf32>
    %cst_55 = arith.constant 1.000000e+00 : f32
    %145 = vector.broadcast %cst_55 : f32 to vector<8x32xf32>
    %146 = arith.subf %145, %139 : vector<8x32xf32>
    %147 = arith.mulf %146, %144 : vector<8x32xf32>
    %148 = arith.mulf %139, %118 : vector<8x32xf32>
    %149 = arith.addf %147, %148 : vector<8x32xf32>
    %c2_i32 = arith.constant 2 : i32
    %150 = vector.broadcast %c2_i32 : i32 to vector<8x1xi32>
    %151 = arith.cmpi sgt, %29, %150 : vector<8x1xi32>
    %152 = arith.extui %151 : vector<8x1xi1> to vector<8x1xi32>
    %153 = arith.sitofp %152 : vector<8x1xi32> to vector<8x1xf32>
    %154 = vector.broadcast %153 : vector<8x1xf32> to vector<8x32xf32>
    %155 = arith.mulf %154, %149 : vector<8x32xf32>
    %cst_56 = arith.constant 1.000000e+00 : f32
    %156 = vector.broadcast %cst_56 : f32 to vector<8x1xf32>
    %157 = arith.subf %156, %153 : vector<8x1xf32>
    %158 = vector.broadcast %157 : vector<8x1xf32> to vector<8x32xf32>
    %159 = arith.mulf %158, %118 : vector<8x32xf32>
    %160 = arith.addf %155, %159 : vector<8x32xf32>
    %c3 = arith.constant 3 : index
    %c0_57 = arith.constant 0 : index
    %c0_58 = arith.constant 0 : index
    %161 = vector.load %arg36[%c3, %c0_57, %c0_58] : memref<8x8x96xf32, #tpu.memory_space<vmem>>, vector<1x8x96xf32>
    %162 = vector.shape_cast %161 : vector<1x8x96xf32> to vector<8x96xf32>
    %163 = arith.truncf %160 : vector<8x32xf32> to vector<8x32xbf16>
    %cst_59 = arith.constant dense<0.000000e+00> : vector<8x96xf32>
    %164 = tpu.matmul %163, %30, %cst_59 {dimension_numbers = #tpu.dot_dimension_numbers<[1], [0], [0], [1], [0, 0, 1, 1], [], []>} : vector<8x32xbf16>, vector<32x96xbf16>, vector<8x96xf32> -> vector<8x96xf32>
    %165 = arith.addf %164, %33 : vector<8x96xf32>
    %166 = vector.extract_strided_slice %162 {offsets = [0, 0], sizes = [8, 32], strides = [1, 1]} : vector<8x96xf32> to vector<8x32xf32>
    %167 = vector.extract_strided_slice %165 {offsets = [0, 0], sizes = [8, 32], strides = [1, 1]} : vector<8x96xf32> to vector<8x32xf32>
    %168 = arith.addf %166, %167 : vector<8x32xf32>
    %169 = arith.negf %168 : vector<8x32xf32>
    %170 = math.exp %169 : vector<8x32xf32>
    %cst_60 = arith.constant 1.000000e+00 : f32
    %171 = vector.broadcast %cst_60 : f32 to vector<8x32xf32>
    %172 = arith.addf %171, %170 : vector<8x32xf32>
    %173 = arith.divf %171, %172 : vector<8x32xf32>
    %174 = vector.extract_strided_slice %162 {offsets = [0, 32], sizes = [8, 32], strides = [1, 1]} : vector<8x96xf32> to vector<8x32xf32>
    %175 = vector.extract_strided_slice %165 {offsets = [0, 32], sizes = [8, 32], strides = [1, 1]} : vector<8x96xf32> to vector<8x32xf32>
    %176 = arith.addf %174, %175 : vector<8x32xf32>
    %177 = arith.negf %176 : vector<8x32xf32>
    %178 = math.exp %177 : vector<8x32xf32>
    %cst_61 = arith.constant 1.000000e+00 : f32
    %179 = vector.broadcast %cst_61 : f32 to vector<8x32xf32>
    %180 = arith.addf %179, %178 : vector<8x32xf32>
    %181 = arith.divf %179, %180 : vector<8x32xf32>
    %182 = vector.extract_strided_slice %162 {offsets = [0, 64], sizes = [8, 32], strides = [1, 1]} : vector<8x96xf32> to vector<8x32xf32>
    %183 = vector.extract_strided_slice %165 {offsets = [0, 64], sizes = [8, 32], strides = [1, 1]} : vector<8x96xf32> to vector<8x32xf32>
    %184 = arith.mulf %173, %183 : vector<8x32xf32>
    %185 = arith.addf %182, %184 : vector<8x32xf32>
    %186 = math.tanh %185 : vector<8x32xf32>
    %cst_62 = arith.constant 1.000000e+00 : f32
    %187 = vector.broadcast %cst_62 : f32 to vector<8x32xf32>
    %188 = arith.subf %187, %181 : vector<8x32xf32>
    %189 = arith.mulf %188, %186 : vector<8x32xf32>
    %190 = arith.mulf %181, %160 : vector<8x32xf32>
    %191 = arith.addf %189, %190 : vector<8x32xf32>
    %c3_i32 = arith.constant 3 : i32
    %192 = vector.broadcast %c3_i32 : i32 to vector<8x1xi32>
    %193 = arith.cmpi sgt, %29, %192 : vector<8x1xi32>
    %194 = arith.extui %193 : vector<8x1xi1> to vector<8x1xi32>
    %195 = arith.sitofp %194 : vector<8x1xi32> to vector<8x1xf32>
    %196 = vector.broadcast %195 : vector<8x1xf32> to vector<8x32xf32>
    %197 = arith.mulf %196, %191 : vector<8x32xf32>
    %cst_63 = arith.constant 1.000000e+00 : f32
    %198 = vector.broadcast %cst_63 : f32 to vector<8x1xf32>
    %199 = arith.subf %198, %195 : vector<8x1xf32>
    %200 = vector.broadcast %199 : vector<8x1xf32> to vector<8x32xf32>
    %201 = arith.mulf %200, %160 : vector<8x32xf32>
    %202 = arith.addf %197, %201 : vector<8x32xf32>
    %c4 = arith.constant 4 : index
    %c0_64 = arith.constant 0 : index
    %c0_65 = arith.constant 0 : index
    %203 = vector.load %arg36[%c4, %c0_64, %c0_65] : memref<8x8x96xf32, #tpu.memory_space<vmem>>, vector<1x8x96xf32>
    %204 = vector.shape_cast %203 : vector<1x8x96xf32> to vector<8x96xf32>
    %205 = arith.truncf %202 : vector<8x32xf32> to vector<8x32xbf16>
    %cst_66 = arith.constant dense<0.000000e+00> : vector<8x96xf32>
    %206 = tpu.matmul %205, %30, %cst_66 {dimension_numbers = #tpu.dot_dimension_numbers<[1], [0], [0], [1], [0, 0, 1, 1], [], []>} : vector<8x32xbf16>, vector<32x96xbf16>, vector<8x96xf32> -> vector<8x96xf32>
    %207 = arith.addf %206, %33 : vector<8x96xf32>
    %208 = vector.extract_strided_slice %204 {offsets = [0, 0], sizes = [8, 32], strides = [1, 1]} : vector<8x96xf32> to vector<8x32xf32>
    %209 = vector.extract_strided_slice %207 {offsets = [0, 0], sizes = [8, 32], strides = [1, 1]} : vector<8x96xf32> to vector<8x32xf32>
    %210 = arith.addf %208, %209 : vector<8x32xf32>
    %211 = arith.negf %210 : vector<8x32xf32>
    %212 = math.exp %211 : vector<8x32xf32>
    %cst_67 = arith.constant 1.000000e+00 : f32
    %213 = vector.broadcast %cst_67 : f32 to vector<8x32xf32>
    %214 = arith.addf %213, %212 : vector<8x32xf32>
    %215 = arith.divf %213, %214 : vector<8x32xf32>
    %216 = vector.extract_strided_slice %204 {offsets = [0, 32], sizes = [8, 32], strides = [1, 1]} : vector<8x96xf32> to vector<8x32xf32>
    %217 = vector.extract_strided_slice %207 {offsets = [0, 32], sizes = [8, 32], strides = [1, 1]} : vector<8x96xf32> to vector<8x32xf32>
    %218 = arith.addf %216, %217 : vector<8x32xf32>
    %219 = arith.negf %218 : vector<8x32xf32>
    %220 = math.exp %219 : vector<8x32xf32>
    %cst_68 = arith.constant 1.000000e+00 : f32
    %221 = vector.broadcast %cst_68 : f32 to vector<8x32xf32>
    %222 = arith.addf %221, %220 : vector<8x32xf32>
    %223 = arith.divf %221, %222 : vector<8x32xf32>
    %224 = vector.extract_strided_slice %204 {offsets = [0, 64], sizes = [8, 32], strides = [1, 1]} : vector<8x96xf32> to vector<8x32xf32>
    %225 = vector.extract_strided_slice %207 {offsets = [0, 64], sizes = [8, 32], strides = [1, 1]} : vector<8x96xf32> to vector<8x32xf32>
    %226 = arith.mulf %215, %225 : vector<8x32xf32>
    %227 = arith.addf %224, %226 : vector<8x32xf32>
    %228 = math.tanh %227 : vector<8x32xf32>
    %cst_69 = arith.constant 1.000000e+00 : f32
    %229 = vector.broadcast %cst_69 : f32 to vector<8x32xf32>
    %230 = arith.subf %229, %223 : vector<8x32xf32>
    %231 = arith.mulf %230, %228 : vector<8x32xf32>
    %232 = arith.mulf %223, %202 : vector<8x32xf32>
    %233 = arith.addf %231, %232 : vector<8x32xf32>
    %c4_i32 = arith.constant 4 : i32
    %234 = vector.broadcast %c4_i32 : i32 to vector<8x1xi32>
    %235 = arith.cmpi sgt, %29, %234 : vector<8x1xi32>
    %236 = arith.extui %235 : vector<8x1xi1> to vector<8x1xi32>
    %237 = arith.sitofp %236 : vector<8x1xi32> to vector<8x1xf32>
    %238 = vector.broadcast %237 : vector<8x1xf32> to vector<8x32xf32>
    %239 = arith.mulf %238, %233 : vector<8x32xf32>
    %cst_70 = arith.constant 1.000000e+00 : f32
    %240 = vector.broadcast %cst_70 : f32 to vector<8x1xf32>
    %241 = arith.subf %240, %237 : vector<8x1xf32>
    %242 = vector.broadcast %241 : vector<8x1xf32> to vector<8x32xf32>
    %243 = arith.mulf %242, %202 : vector<8x32xf32>
    %244 = arith.addf %239, %243 : vector<8x32xf32>
    %c5 = arith.constant 5 : index
    %c0_71 = arith.constant 0 : index
    %c0_72 = arith.constant 0 : index
    %245 = vector.load %arg36[%c5, %c0_71, %c0_72] : memref<8x8x96xf32, #tpu.memory_space<vmem>>, vector<1x8x96xf32>
    %246 = vector.shape_cast %245 : vector<1x8x96xf32> to vector<8x96xf32>
    %247 = arith.truncf %244 : vector<8x32xf32> to vector<8x32xbf16>
    %cst_73 = arith.constant dense<0.000000e+00> : vector<8x96xf32>
    %248 = tpu.matmul %247, %30, %cst_73 {dimension_numbers = #tpu.dot_dimension_numbers<[1], [0], [0], [1], [0, 0, 1, 1], [], []>} : vector<8x32xbf16>, vector<32x96xbf16>, vector<8x96xf32> -> vector<8x96xf32>
    %249 = arith.addf %248, %33 : vector<8x96xf32>
    %250 = vector.extract_strided_slice %246 {offsets = [0, 0], sizes = [8, 32], strides = [1, 1]} : vector<8x96xf32> to vector<8x32xf32>
    %251 = vector.extract_strided_slice %249 {offsets = [0, 0], sizes = [8, 32], strides = [1, 1]} : vector<8x96xf32> to vector<8x32xf32>
    %252 = arith.addf %250, %251 : vector<8x32xf32>
    %253 = arith.negf %252 : vector<8x32xf32>
    %254 = math.exp %253 : vector<8x32xf32>
    %cst_74 = arith.constant 1.000000e+00 : f32
    %255 = vector.broadcast %cst_74 : f32 to vector<8x32xf32>
    %256 = arith.addf %255, %254 : vector<8x32xf32>
    %257 = arith.divf %255, %256 : vector<8x32xf32>
    %258 = vector.extract_strided_slice %246 {offsets = [0, 32], sizes = [8, 32], strides = [1, 1]} : vector<8x96xf32> to vector<8x32xf32>
    %259 = vector.extract_strided_slice %249 {offsets = [0, 32], sizes = [8, 32], strides = [1, 1]} : vector<8x96xf32> to vector<8x32xf32>
    %260 = arith.addf %258, %259 : vector<8x32xf32>
    %261 = arith.negf %260 : vector<8x32xf32>
    %262 = math.exp %261 : vector<8x32xf32>
    %cst_75 = arith.constant 1.000000e+00 : f32
    %263 = vector.broadcast %cst_75 : f32 to vector<8x32xf32>
    %264 = arith.addf %263, %262 : vector<8x32xf32>
    %265 = arith.divf %263, %264 : vector<8x32xf32>
    %266 = vector.extract_strided_slice %246 {offsets = [0, 64], sizes = [8, 32], strides = [1, 1]} : vector<8x96xf32> to vector<8x32xf32>
    %267 = vector.extract_strided_slice %249 {offsets = [0, 64], sizes = [8, 32], strides = [1, 1]} : vector<8x96xf32> to vector<8x32xf32>
    %268 = arith.mulf %257, %267 : vector<8x32xf32>
    %269 = arith.addf %266, %268 : vector<8x32xf32>
    %270 = math.tanh %269 : vector<8x32xf32>
    %cst_76 = arith.constant 1.000000e+00 : f32
    %271 = vector.broadcast %cst_76 : f32 to vector<8x32xf32>
    %272 = arith.subf %271, %265 : vector<8x32xf32>
    %273 = arith.mulf %272, %270 : vector<8x32xf32>
    %274 = arith.mulf %265, %244 : vector<8x32xf32>
    %275 = arith.addf %273, %274 : vector<8x32xf32>
    %c5_i32 = arith.constant 5 : i32
    %276 = vector.broadcast %c5_i32 : i32 to vector<8x1xi32>
    %277 = arith.cmpi sgt, %29, %276 : vector<8x1xi32>
    %278 = arith.extui %277 : vector<8x1xi1> to vector<8x1xi32>
    %279 = arith.sitofp %278 : vector<8x1xi32> to vector<8x1xf32>
    %280 = vector.broadcast %279 : vector<8x1xf32> to vector<8x32xf32>
    %281 = arith.mulf %280, %275 : vector<8x32xf32>
    %cst_77 = arith.constant 1.000000e+00 : f32
    %282 = vector.broadcast %cst_77 : f32 to vector<8x1xf32>
    %283 = arith.subf %282, %279 : vector<8x1xf32>
    %284 = vector.broadcast %283 : vector<8x1xf32> to vector<8x32xf32>
    %285 = arith.mulf %284, %244 : vector<8x32xf32>
    %286 = arith.addf %281, %285 : vector<8x32xf32>
    %c6 = arith.constant 6 : index
    %c0_78 = arith.constant 0 : index
    %c0_79 = arith.constant 0 : index
    %287 = vector.load %arg36[%c6, %c0_78, %c0_79] : memref<8x8x96xf32, #tpu.memory_space<vmem>>, vector<1x8x96xf32>
    %288 = vector.shape_cast %287 : vector<1x8x96xf32> to vector<8x96xf32>
    %289 = arith.truncf %286 : vector<8x32xf32> to vector<8x32xbf16>
    %cst_80 = arith.constant dense<0.000000e+00> : vector<8x96xf32>
    %290 = tpu.matmul %289, %30, %cst_80 {dimension_numbers = #tpu.dot_dimension_numbers<[1], [0], [0], [1], [0, 0, 1, 1], [], []>} : vector<8x32xbf16>, vector<32x96xbf16>, vector<8x96xf32> -> vector<8x96xf32>
    %291 = arith.addf %290, %33 : vector<8x96xf32>
    %292 = vector.extract_strided_slice %288 {offsets = [0, 0], sizes = [8, 32], strides = [1, 1]} : vector<8x96xf32> to vector<8x32xf32>
    %293 = vector.extract_strided_slice %291 {offsets = [0, 0], sizes = [8, 32], strides = [1, 1]} : vector<8x96xf32> to vector<8x32xf32>
    %294 = arith.addf %292, %293 : vector<8x32xf32>
    %295 = arith.negf %294 : vector<8x32xf32>
    %296 = math.exp %295 : vector<8x32xf32>
    %cst_81 = arith.constant 1.000000e+00 : f32
    %297 = vector.broadcast %cst_81 : f32 to vector<8x32xf32>
    %298 = arith.addf %297, %296 : vector<8x32xf32>
    %299 = arith.divf %297, %298 : vector<8x32xf32>
    %300 = vector.extract_strided_slice %288 {offsets = [0, 32], sizes = [8, 32], strides = [1, 1]} : vector<8x96xf32> to vector<8x32xf32>
    %301 = vector.extract_strided_slice %291 {offsets = [0, 32], sizes = [8, 32], strides = [1, 1]} : vector<8x96xf32> to vector<8x32xf32>
    %302 = arith.addf %300, %301 : vector<8x32xf32>
    %303 = arith.negf %302 : vector<8x32xf32>
    %304 = math.exp %303 : vector<8x32xf32>
    %cst_82 = arith.constant 1.000000e+00 : f32
    %305 = vector.broadcast %cst_82 : f32 to vector<8x32xf32>
    %306 = arith.addf %305, %304 : vector<8x32xf32>
    %307 = arith.divf %305, %306 : vector<8x32xf32>
    %308 = vector.extract_strided_slice %288 {offsets = [0, 64], sizes = [8, 32], strides = [1, 1]} : vector<8x96xf32> to vector<8x32xf32>
    %309 = vector.extract_strided_slice %291 {offsets = [0, 64], sizes = [8, 32], strides = [1, 1]} : vector<8x96xf32> to vector<8x32xf32>
    %310 = arith.mulf %299, %309 : vector<8x32xf32>
    %311 = arith.addf %308, %310 : vector<8x32xf32>
    %312 = math.tanh %311 : vector<8x32xf32>
    %cst_83 = arith.constant 1.000000e+00 : f32
    %313 = vector.broadcast %cst_83 : f32 to vector<8x32xf32>
    %314 = arith.subf %313, %307 : vector<8x32xf32>
    %315 = arith.mulf %314, %312 : vector<8x32xf32>
    %316 = arith.mulf %307, %286 : vector<8x32xf32>
    %317 = arith.addf %315, %316 : vector<8x32xf32>
    %c6_i32 = arith.constant 6 : i32
    %318 = vector.broadcast %c6_i32 : i32 to vector<8x1xi32>
    %319 = arith.cmpi sgt, %29, %318 : vector<8x1xi32>
    %320 = arith.extui %319 : vector<8x1xi1> to vector<8x1xi32>
    %321 = arith.sitofp %320 : vector<8x1xi32> to vector<8x1xf32>
    %322 = vector.broadcast %321 : vector<8x1xf32> to vector<8x32xf32>
    %323 = arith.mulf %322, %317 : vector<8x32xf32>
    %cst_84 = arith.constant 1.000000e+00 : f32
    %324 = vector.broadcast %cst_84 : f32 to vector<8x1xf32>
    %325 = arith.subf %324, %321 : vector<8x1xf32>
    %326 = vector.broadcast %325 : vector<8x1xf32> to vector<8x32xf32>
    %327 = arith.mulf %326, %286 : vector<8x32xf32>
    %328 = arith.addf %323, %327 : vector<8x32xf32>
    %c7 = arith.constant 7 : index
    %c0_85 = arith.constant 0 : index
    %c0_86 = arith.constant 0 : index
    %329 = vector.load %arg36[%c7, %c0_85, %c0_86] : memref<8x8x96xf32, #tpu.memory_space<vmem>>, vector<1x8x96xf32>
    %330 = vector.shape_cast %329 : vector<1x8x96xf32> to vector<8x96xf32>
    %331 = arith.truncf %328 : vector<8x32xf32> to vector<8x32xbf16>
    %cst_87 = arith.constant dense<0.000000e+00> : vector<8x96xf32>
    %332 = tpu.matmul %331, %30, %cst_87 {dimension_numbers = #tpu.dot_dimension_numbers<[1], [0], [0], [1], [0, 0, 1, 1], [], []>} : vector<8x32xbf16>, vector<32x96xbf16>, vector<8x96xf32> -> vector<8x96xf32>
    %333 = arith.addf %332, %33 : vector<8x96xf32>
    %334 = vector.extract_strided_slice %330 {offsets = [0, 0], sizes = [8, 32], strides = [1, 1]} : vector<8x96xf32> to vector<8x32xf32>
    %335 = vector.extract_strided_slice %333 {offsets = [0, 0], sizes = [8, 32], strides = [1, 1]} : vector<8x96xf32> to vector<8x32xf32>
    %336 = arith.addf %334, %335 : vector<8x32xf32>
    %337 = arith.negf %336 : vector<8x32xf32>
    %338 = math.exp %337 : vector<8x32xf32>
    %cst_88 = arith.constant 1.000000e+00 : f32
    %339 = vector.broadcast %cst_88 : f32 to vector<8x32xf32>
    %340 = arith.addf %339, %338 : vector<8x32xf32>
    %341 = arith.divf %339, %340 : vector<8x32xf32>
    %342 = vector.extract_strided_slice %330 {offsets = [0, 32], sizes = [8, 32], strides = [1, 1]} : vector<8x96xf32> to vector<8x32xf32>
    %343 = vector.extract_strided_slice %333 {offsets = [0, 32], sizes = [8, 32], strides = [1, 1]} : vector<8x96xf32> to vector<8x32xf32>
    %344 = arith.addf %342, %343 : vector<8x32xf32>
    %345 = arith.negf %344 : vector<8x32xf32>
    %346 = math.exp %345 : vector<8x32xf32>
    %cst_89 = arith.constant 1.000000e+00 : f32
    %347 = vector.broadcast %cst_89 : f32 to vector<8x32xf32>
    %348 = arith.addf %347, %346 : vector<8x32xf32>
    %349 = arith.divf %347, %348 : vector<8x32xf32>
    %350 = vector.extract_strided_slice %330 {offsets = [0, 64], sizes = [8, 32], strides = [1, 1]} : vector<8x96xf32> to vector<8x32xf32>
    %351 = vector.extract_strided_slice %333 {offsets = [0, 64], sizes = [8, 32], strides = [1, 1]} : vector<8x96xf32> to vector<8x32xf32>
    %352 = arith.mulf %341, %351 : vector<8x32xf32>
    %353 = arith.addf %350, %352 : vector<8x32xf32>
    %354 = math.tanh %353 : vector<8x32xf32>
    %cst_90 = arith.constant 1.000000e+00 : f32
    %355 = vector.broadcast %cst_90 : f32 to vector<8x32xf32>
    %356 = arith.subf %355, %349 : vector<8x32xf32>
    %357 = arith.mulf %356, %354 : vector<8x32xf32>
    %358 = arith.mulf %349, %328 : vector<8x32xf32>
    %359 = arith.addf %357, %358 : vector<8x32xf32>
    %c7_i32 = arith.constant 7 : i32
    %360 = vector.broadcast %c7_i32 : i32 to vector<8x1xi32>
    %361 = arith.cmpi sgt, %29, %360 : vector<8x1xi32>
    %362 = arith.extui %361 : vector<8x1xi1> to vector<8x1xi32>
    %363 = arith.sitofp %362 : vector<8x1xi32> to vector<8x1xf32>
    %364 = vector.broadcast %363 : vector<8x1xf32> to vector<8x32xf32>
    %365 = arith.mulf %364, %359 : vector<8x32xf32>
    %cst_91 = arith.constant 1.000000e+00 : f32
    %366 = vector.broadcast %cst_91 : f32 to vector<8x1xf32>
    %367 = arith.subf %366, %363 : vector<8x1xf32>
    %368 = vector.broadcast %367 : vector<8x1xf32> to vector<8x32xf32>
    %369 = arith.mulf %368, %328 : vector<8x32xf32>
    %370 = arith.addf %365, %369 : vector<8x32xf32>
    %c0_92 = arith.constant 0 : index
    %c0_93 = arith.constant 0 : index
    %371 = vector.load %arg3[%c0_92, %c0_93] : memref<8x1xi32, #tpu.memory_space<vmem>>, vector<8x1xi32>
    %c0_94 = arith.constant 0 : index
    %c0_95 = arith.constant 0 : index
    %372 = vector.load %arg29[%c0_94, %c0_95] : memref<32x96xbf16, #tpu.memory_space<vmem>>, vector<32x96xbf16>
    %c0_96 = arith.constant 0 : index
    %c0_97 = arith.constant 0 : index
    %373 = vector.load %arg27[%c0_96, %c0_97] : memref<1x96xf32, #tpu.memory_space<vmem>>, vector<1x96xf32>
    %374 = vector.shape_cast %373 : vector<1x96xf32> to vector<1x96xf32>
    %375 = vector.broadcast %374 : vector<1x96xf32> to vector<8x96xf32>
    %cst_98 = arith.constant 0.000000e+00 : f32
    %376 = vector.broadcast %cst_98 : f32 to vector<8x32xf32>
    %c0_99 = arith.constant 0 : index
    %c0_100 = arith.constant 0 : index
    %c0_101 = arith.constant 0 : index
    %377 = vector.load %arg37[%c0_99, %c0_100, %c0_101] : memref<8x8x96xf32, #tpu.memory_space<vmem>>, vector<1x8x96xf32>
    %378 = vector.shape_cast %377 : vector<1x8x96xf32> to vector<8x96xf32>
    %379 = arith.truncf %376 : vector<8x32xf32> to vector<8x32xbf16>
    %cst_102 = arith.constant dense<0.000000e+00> : vector<8x96xf32>
    %380 = tpu.matmul %379, %372, %cst_102 {dimension_numbers = #tpu.dot_dimension_numbers<[1], [0], [0], [1], [0, 0, 1, 1], [], []>} : vector<8x32xbf16>, vector<32x96xbf16>, vector<8x96xf32> -> vector<8x96xf32>
    %381 = arith.addf %380, %375 : vector<8x96xf32>
    %382 = vector.extract_strided_slice %378 {offsets = [0, 0], sizes = [8, 32], strides = [1, 1]} : vector<8x96xf32> to vector<8x32xf32>
    %383 = vector.extract_strided_slice %381 {offsets = [0, 0], sizes = [8, 32], strides = [1, 1]} : vector<8x96xf32> to vector<8x32xf32>
    %384 = arith.addf %382, %383 : vector<8x32xf32>
    %385 = arith.negf %384 : vector<8x32xf32>
    %386 = math.exp %385 : vector<8x32xf32>
    %cst_103 = arith.constant 1.000000e+00 : f32
    %387 = vector.broadcast %cst_103 : f32 to vector<8x32xf32>
    %388 = arith.addf %387, %386 : vector<8x32xf32>
    %389 = arith.divf %387, %388 : vector<8x32xf32>
    %390 = vector.extract_strided_slice %378 {offsets = [0, 32], sizes = [8, 32], strides = [1, 1]} : vector<8x96xf32> to vector<8x32xf32>
    %391 = vector.extract_strided_slice %381 {offsets = [0, 32], sizes = [8, 32], strides = [1, 1]} : vector<8x96xf32> to vector<8x32xf32>
    %392 = arith.addf %390, %391 : vector<8x32xf32>
    %393 = arith.negf %392 : vector<8x32xf32>
    %394 = math.exp %393 : vector<8x32xf32>
    %cst_104 = arith.constant 1.000000e+00 : f32
    %395 = vector.broadcast %cst_104 : f32 to vector<8x32xf32>
    %396 = arith.addf %395, %394 : vector<8x32xf32>
    %397 = arith.divf %395, %396 : vector<8x32xf32>
    %398 = vector.extract_strided_slice %378 {offsets = [0, 64], sizes = [8, 32], strides = [1, 1]} : vector<8x96xf32> to vector<8x32xf32>
    %399 = vector.extract_strided_slice %381 {offsets = [0, 64], sizes = [8, 32], strides = [1, 1]} : vector<8x96xf32> to vector<8x32xf32>
    %400 = arith.mulf %389, %399 : vector<8x32xf32>
    %401 = arith.addf %398, %400 : vector<8x32xf32>
    %402 = math.tanh %401 : vector<8x32xf32>
    %cst_105 = arith.constant 1.000000e+00 : f32
    %403 = vector.broadcast %cst_105 : f32 to vector<8x32xf32>
    %404 = arith.subf %403, %397 : vector<8x32xf32>
    %405 = arith.mulf %404, %402 : vector<8x32xf32>
    %406 = arith.mulf %397, %376 : vector<8x32xf32>
    %407 = arith.addf %405, %406 : vector<8x32xf32>
    %c0_i32_106 = arith.constant 0 : i32
    %408 = vector.broadcast %c0_i32_106 : i32 to vector<8x1xi32>
    %409 = arith.cmpi sgt, %371, %408 : vector<8x1xi32>
    %410 = arith.extui %409 : vector<8x1xi1> to vector<8x1xi32>
    %411 = arith.sitofp %410 : vector<8x1xi32> to vector<8x1xf32>
    %412 = vector.broadcast %411 : vector<8x1xf32> to vector<8x32xf32>
    %413 = arith.mulf %412, %407 : vector<8x32xf32>
    %cst_107 = arith.constant 1.000000e+00 : f32
    %414 = vector.broadcast %cst_107 : f32 to vector<8x1xf32>
    %415 = arith.subf %414, %411 : vector<8x1xf32>
    %416 = vector.broadcast %415 : vector<8x1xf32> to vector<8x32xf32>
    %417 = arith.mulf %416, %376 : vector<8x32xf32>
    %418 = arith.addf %413, %417 : vector<8x32xf32>
    %c1_108 = arith.constant 1 : index
    %c0_109 = arith.constant 0 : index
    %c0_110 = arith.constant 0 : index
    %419 = vector.load %arg37[%c1_108, %c0_109, %c0_110] : memref<8x8x96xf32, #tpu.memory_space<vmem>>, vector<1x8x96xf32>
    %420 = vector.shape_cast %419 : vector<1x8x96xf32> to vector<8x96xf32>
    %421 = arith.truncf %418 : vector<8x32xf32> to vector<8x32xbf16>
    %cst_111 = arith.constant dense<0.000000e+00> : vector<8x96xf32>
    %422 = tpu.matmul %421, %372, %cst_111 {dimension_numbers = #tpu.dot_dimension_numbers<[1], [0], [0], [1], [0, 0, 1, 1], [], []>} : vector<8x32xbf16>, vector<32x96xbf16>, vector<8x96xf32> -> vector<8x96xf32>
    %423 = arith.addf %422, %375 : vector<8x96xf32>
    %424 = vector.extract_strided_slice %420 {offsets = [0, 0], sizes = [8, 32], strides = [1, 1]} : vector<8x96xf32> to vector<8x32xf32>
    %425 = vector.extract_strided_slice %423 {offsets = [0, 0], sizes = [8, 32], strides = [1, 1]} : vector<8x96xf32> to vector<8x32xf32>
    %426 = arith.addf %424, %425 : vector<8x32xf32>
    %427 = arith.negf %426 : vector<8x32xf32>
    %428 = math.exp %427 : vector<8x32xf32>
    %cst_112 = arith.constant 1.000000e+00 : f32
    %429 = vector.broadcast %cst_112 : f32 to vector<8x32xf32>
    %430 = arith.addf %429, %428 : vector<8x32xf32>
    %431 = arith.divf %429, %430 : vector<8x32xf32>
    %432 = vector.extract_strided_slice %420 {offsets = [0, 32], sizes = [8, 32], strides = [1, 1]} : vector<8x96xf32> to vector<8x32xf32>
    %433 = vector.extract_strided_slice %423 {offsets = [0, 32], sizes = [8, 32], strides = [1, 1]} : vector<8x96xf32> to vector<8x32xf32>
    %434 = arith.addf %432, %433 : vector<8x32xf32>
    %435 = arith.negf %434 : vector<8x32xf32>
    %436 = math.exp %435 : vector<8x32xf32>
    %cst_113 = arith.constant 1.000000e+00 : f32
    %437 = vector.broadcast %cst_113 : f32 to vector<8x32xf32>
    %438 = arith.addf %437, %436 : vector<8x32xf32>
    %439 = arith.divf %437, %438 : vector<8x32xf32>
    %440 = vector.extract_strided_slice %420 {offsets = [0, 64], sizes = [8, 32], strides = [1, 1]} : vector<8x96xf32> to vector<8x32xf32>
    %441 = vector.extract_strided_slice %423 {offsets = [0, 64], sizes = [8, 32], strides = [1, 1]} : vector<8x96xf32> to vector<8x32xf32>
    %442 = arith.mulf %431, %441 : vector<8x32xf32>
    %443 = arith.addf %440, %442 : vector<8x32xf32>
    %444 = math.tanh %443 : vector<8x32xf32>
    %cst_114 = arith.constant 1.000000e+00 : f32
    %445 = vector.broadcast %cst_114 : f32 to vector<8x32xf32>
    %446 = arith.subf %445, %439 : vector<8x32xf32>
    %447 = arith.mulf %446, %444 : vector<8x32xf32>
    %448 = arith.mulf %439, %418 : vector<8x32xf32>
    %449 = arith.addf %447, %448 : vector<8x32xf32>
    %c1_i32_115 = arith.constant 1 : i32
    %450 = vector.broadcast %c1_i32_115 : i32 to vector<8x1xi32>
    %451 = arith.cmpi sgt, %371, %450 : vector<8x1xi32>
    %452 = arith.extui %451 : vector<8x1xi1> to vector<8x1xi32>
    %453 = arith.sitofp %452 : vector<8x1xi32> to vector<8x1xf32>
    %454 = vector.broadcast %453 : vector<8x1xf32> to vector<8x32xf32>
    %455 = arith.mulf %454, %449 : vector<8x32xf32>
    %cst_116 = arith.constant 1.000000e+00 : f32
    %456 = vector.broadcast %cst_116 : f32 to vector<8x1xf32>
    %457 = arith.subf %456, %453 : vector<8x1xf32>
    %458 = vector.broadcast %457 : vector<8x1xf32> to vector<8x32xf32>
    %459 = arith.mulf %458, %418 : vector<8x32xf32>
    %460 = arith.addf %455, %459 : vector<8x32xf32>
    %c2_117 = arith.constant 2 : index
    %c0_118 = arith.constant 0 : index
    %c0_119 = arith.constant 0 : index
    %461 = vector.load %arg37[%c2_117, %c0_118, %c0_119] : memref<8x8x96xf32, #tpu.memory_space<vmem>>, vector<1x8x96xf32>
    %462 = vector.shape_cast %461 : vector<1x8x96xf32> to vector<8x96xf32>
    %463 = arith.truncf %460 : vector<8x32xf32> to vector<8x32xbf16>
    %cst_120 = arith.constant dense<0.000000e+00> : vector<8x96xf32>
    %464 = tpu.matmul %463, %372, %cst_120 {dimension_numbers = #tpu.dot_dimension_numbers<[1], [0], [0], [1], [0, 0, 1, 1], [], []>} : vector<8x32xbf16>, vector<32x96xbf16>, vector<8x96xf32> -> vector<8x96xf32>
    %465 = arith.addf %464, %375 : vector<8x96xf32>
    %466 = vector.extract_strided_slice %462 {offsets = [0, 0], sizes = [8, 32], strides = [1, 1]} : vector<8x96xf32> to vector<8x32xf32>
    %467 = vector.extract_strided_slice %465 {offsets = [0, 0], sizes = [8, 32], strides = [1, 1]} : vector<8x96xf32> to vector<8x32xf32>
    %468 = arith.addf %466, %467 : vector<8x32xf32>
    %469 = arith.negf %468 : vector<8x32xf32>
    %470 = math.exp %469 : vector<8x32xf32>
    %cst_121 = arith.constant 1.000000e+00 : f32
    %471 = vector.broadcast %cst_121 : f32 to vector<8x32xf32>
    %472 = arith.addf %471, %470 : vector<8x32xf32>
    %473 = arith.divf %471, %472 : vector<8x32xf32>
    %474 = vector.extract_strided_slice %462 {offsets = [0, 32], sizes = [8, 32], strides = [1, 1]} : vector<8x96xf32> to vector<8x32xf32>
    %475 = vector.extract_strided_slice %465 {offsets = [0, 32], sizes = [8, 32], strides = [1, 1]} : vector<8x96xf32> to vector<8x32xf32>
    %476 = arith.addf %474, %475 : vector<8x32xf32>
    %477 = arith.negf %476 : vector<8x32xf32>
    %478 = math.exp %477 : vector<8x32xf32>
    %cst_122 = arith.constant 1.000000e+00 : f32
    %479 = vector.broadcast %cst_122 : f32 to vector<8x32xf32>
    %480 = arith.addf %479, %478 : vector<8x32xf32>
    %481 = arith.divf %479, %480 : vector<8x32xf32>
    %482 = vector.extract_strided_slice %462 {offsets = [0, 64], sizes = [8, 32], strides = [1, 1]} : vector<8x96xf32> to vector<8x32xf32>
    %483 = vector.extract_strided_slice %465 {offsets = [0, 64], sizes = [8, 32], strides = [1, 1]} : vector<8x96xf32> to vector<8x32xf32>
    %484 = arith.mulf %473, %483 : vector<8x32xf32>
    %485 = arith.addf %482, %484 : vector<8x32xf32>
    %486 = math.tanh %485 : vector<8x32xf32>
    %cst_123 = arith.constant 1.000000e+00 : f32
    %487 = vector.broadcast %cst_123 : f32 to vector<8x32xf32>
    %488 = arith.subf %487, %481 : vector<8x32xf32>
    %489 = arith.mulf %488, %486 : vector<8x32xf32>
    %490 = arith.mulf %481, %460 : vector<8x32xf32>
    %491 = arith.addf %489, %490 : vector<8x32xf32>
    %c2_i32_124 = arith.constant 2 : i32
    %492 = vector.broadcast %c2_i32_124 : i32 to vector<8x1xi32>
    %493 = arith.cmpi sgt, %371, %492 : vector<8x1xi32>
    %494 = arith.extui %493 : vector<8x1xi1> to vector<8x1xi32>
    %495 = arith.sitofp %494 : vector<8x1xi32> to vector<8x1xf32>
    %496 = vector.broadcast %495 : vector<8x1xf32> to vector<8x32xf32>
    %497 = arith.mulf %496, %491 : vector<8x32xf32>
    %cst_125 = arith.constant 1.000000e+00 : f32
    %498 = vector.broadcast %cst_125 : f32 to vector<8x1xf32>
    %499 = arith.subf %498, %495 : vector<8x1xf32>
    %500 = vector.broadcast %499 : vector<8x1xf32> to vector<8x32xf32>
    %501 = arith.mulf %500, %460 : vector<8x32xf32>
    %502 = arith.addf %497, %501 : vector<8x32xf32>
    %c3_126 = arith.constant 3 : index
    %c0_127 = arith.constant 0 : index
    %c0_128 = arith.constant 0 : index
    %503 = vector.load %arg37[%c3_126, %c0_127, %c0_128] : memref<8x8x96xf32, #tpu.memory_space<vmem>>, vector<1x8x96xf32>
    %504 = vector.shape_cast %503 : vector<1x8x96xf32> to vector<8x96xf32>
    %505 = arith.truncf %502 : vector<8x32xf32> to vector<8x32xbf16>
    %cst_129 = arith.constant dense<0.000000e+00> : vector<8x96xf32>
    %506 = tpu.matmul %505, %372, %cst_129 {dimension_numbers = #tpu.dot_dimension_numbers<[1], [0], [0], [1], [0, 0, 1, 1], [], []>} : vector<8x32xbf16>, vector<32x96xbf16>, vector<8x96xf32> -> vector<8x96xf32>
    %507 = arith.addf %506, %375 : vector<8x96xf32>
    %508 = vector.extract_strided_slice %504 {offsets = [0, 0], sizes = [8, 32], strides = [1, 1]} : vector<8x96xf32> to vector<8x32xf32>
    %509 = vector.extract_strided_slice %507 {offsets = [0, 0], sizes = [8, 32], strides = [1, 1]} : vector<8x96xf32> to vector<8x32xf32>
    %510 = arith.addf %508, %509 : vector<8x32xf32>
    %511 = arith.negf %510 : vector<8x32xf32>
    %512 = math.exp %511 : vector<8x32xf32>
    %cst_130 = arith.constant 1.000000e+00 : f32
    %513 = vector.broadcast %cst_130 : f32 to vector<8x32xf32>
    %514 = arith.addf %513, %512 : vector<8x32xf32>
    %515 = arith.divf %513, %514 : vector<8x32xf32>
    %516 = vector.extract_strided_slice %504 {offsets = [0, 32], sizes = [8, 32], strides = [1, 1]} : vector<8x96xf32> to vector<8x32xf32>
    %517 = vector.extract_strided_slice %507 {offsets = [0, 32], sizes = [8, 32], strides = [1, 1]} : vector<8x96xf32> to vector<8x32xf32>
    %518 = arith.addf %516, %517 : vector<8x32xf32>
    %519 = arith.negf %518 : vector<8x32xf32>
    %520 = math.exp %519 : vector<8x32xf32>
    %cst_131 = arith.constant 1.000000e+00 : f32
    %521 = vector.broadcast %cst_131 : f32 to vector<8x32xf32>
    %522 = arith.addf %521, %520 : vector<8x32xf32>
    %523 = arith.divf %521, %522 : vector<8x32xf32>
    %524 = vector.extract_strided_slice %504 {offsets = [0, 64], sizes = [8, 32], strides = [1, 1]} : vector<8x96xf32> to vector<8x32xf32>
    %525 = vector.extract_strided_slice %507 {offsets = [0, 64], sizes = [8, 32], strides = [1, 1]} : vector<8x96xf32> to vector<8x32xf32>
    %526 = arith.mulf %515, %525 : vector<8x32xf32>
    %527 = arith.addf %524, %526 : vector<8x32xf32>
    %528 = math.tanh %527 : vector<8x32xf32>
    %cst_132 = arith.constant 1.000000e+00 : f32
    %529 = vector.broadcast %cst_132 : f32 to vector<8x32xf32>
    %530 = arith.subf %529, %523 : vector<8x32xf32>
    %531 = arith.mulf %530, %528 : vector<8x32xf32>
    %532 = arith.mulf %523, %502 : vector<8x32xf32>
    %533 = arith.addf %531, %532 : vector<8x32xf32>
    %c3_i32_133 = arith.constant 3 : i32
    %534 = vector.broadcast %c3_i32_133 : i32 to vector<8x1xi32>
    %535 = arith.cmpi sgt, %371, %534 : vector<8x1xi32>
    %536 = arith.extui %535 : vector<8x1xi1> to vector<8x1xi32>
    %537 = arith.sitofp %536 : vector<8x1xi32> to vector<8x1xf32>
    %538 = vector.broadcast %537 : vector<8x1xf32> to vector<8x32xf32>
    %539 = arith.mulf %538, %533 : vector<8x32xf32>
    %cst_134 = arith.constant 1.000000e+00 : f32
    %540 = vector.broadcast %cst_134 : f32 to vector<8x1xf32>
    %541 = arith.subf %540, %537 : vector<8x1xf32>
    %542 = vector.broadcast %541 : vector<8x1xf32> to vector<8x32xf32>
    %543 = arith.mulf %542, %502 : vector<8x32xf32>
    %544 = arith.addf %539, %543 : vector<8x32xf32>
    %c4_135 = arith.constant 4 : index
    %c0_136 = arith.constant 0 : index
    %c0_137 = arith.constant 0 : index
    %545 = vector.load %arg37[%c4_135, %c0_136, %c0_137] : memref<8x8x96xf32, #tpu.memory_space<vmem>>, vector<1x8x96xf32>
    %546 = vector.shape_cast %545 : vector<1x8x96xf32> to vector<8x96xf32>
    %547 = arith.truncf %544 : vector<8x32xf32> to vector<8x32xbf16>
    %cst_138 = arith.constant dense<0.000000e+00> : vector<8x96xf32>
    %548 = tpu.matmul %547, %372, %cst_138 {dimension_numbers = #tpu.dot_dimension_numbers<[1], [0], [0], [1], [0, 0, 1, 1], [], []>} : vector<8x32xbf16>, vector<32x96xbf16>, vector<8x96xf32> -> vector<8x96xf32>
    %549 = arith.addf %548, %375 : vector<8x96xf32>
    %550 = vector.extract_strided_slice %546 {offsets = [0, 0], sizes = [8, 32], strides = [1, 1]} : vector<8x96xf32> to vector<8x32xf32>
    %551 = vector.extract_strided_slice %549 {offsets = [0, 0], sizes = [8, 32], strides = [1, 1]} : vector<8x96xf32> to vector<8x32xf32>
    %552 = arith.addf %550, %551 : vector<8x32xf32>
    %553 = arith.negf %552 : vector<8x32xf32>
    %554 = math.exp %553 : vector<8x32xf32>
    %cst_139 = arith.constant 1.000000e+00 : f32
    %555 = vector.broadcast %cst_139 : f32 to vector<8x32xf32>
    %556 = arith.addf %555, %554 : vector<8x32xf32>
    %557 = arith.divf %555, %556 : vector<8x32xf32>
    %558 = vector.extract_strided_slice %546 {offsets = [0, 32], sizes = [8, 32], strides = [1, 1]} : vector<8x96xf32> to vector<8x32xf32>
    %559 = vector.extract_strided_slice %549 {offsets = [0, 32], sizes = [8, 32], strides = [1, 1]} : vector<8x96xf32> to vector<8x32xf32>
    %560 = arith.addf %558, %559 : vector<8x32xf32>
    %561 = arith.negf %560 : vector<8x32xf32>
    %562 = math.exp %561 : vector<8x32xf32>
    %cst_140 = arith.constant 1.000000e+00 : f32
    %563 = vector.broadcast %cst_140 : f32 to vector<8x32xf32>
    %564 = arith.addf %563, %562 : vector<8x32xf32>
    %565 = arith.divf %563, %564 : vector<8x32xf32>
    %566 = vector.extract_strided_slice %546 {offsets = [0, 64], sizes = [8, 32], strides = [1, 1]} : vector<8x96xf32> to vector<8x32xf32>
    %567 = vector.extract_strided_slice %549 {offsets = [0, 64], sizes = [8, 32], strides = [1, 1]} : vector<8x96xf32> to vector<8x32xf32>
    %568 = arith.mulf %557, %567 : vector<8x32xf32>
    %569 = arith.addf %566, %568 : vector<8x32xf32>
    %570 = math.tanh %569 : vector<8x32xf32>
    %cst_141 = arith.constant 1.000000e+00 : f32
    %571 = vector.broadcast %cst_141 : f32 to vector<8x32xf32>
    %572 = arith.subf %571, %565 : vector<8x32xf32>
    %573 = arith.mulf %572, %570 : vector<8x32xf32>
    %574 = arith.mulf %565, %544 : vector<8x32xf32>
    %575 = arith.addf %573, %574 : vector<8x32xf32>
    %c4_i32_142 = arith.constant 4 : i32
    %576 = vector.broadcast %c4_i32_142 : i32 to vector<8x1xi32>
    %577 = arith.cmpi sgt, %371, %576 : vector<8x1xi32>
    %578 = arith.extui %577 : vector<8x1xi1> to vector<8x1xi32>
    %579 = arith.sitofp %578 : vector<8x1xi32> to vector<8x1xf32>
    %580 = vector.broadcast %579 : vector<8x1xf32> to vector<8x32xf32>
    %581 = arith.mulf %580, %575 : vector<8x32xf32>
    %cst_143 = arith.constant 1.000000e+00 : f32
    %582 = vector.broadcast %cst_143 : f32 to vector<8x1xf32>
    %583 = arith.subf %582, %579 : vector<8x1xf32>
    %584 = vector.broadcast %583 : vector<8x1xf32> to vector<8x32xf32>
    %585 = arith.mulf %584, %544 : vector<8x32xf32>
    %586 = arith.addf %581, %585 : vector<8x32xf32>
    %c5_144 = arith.constant 5 : index
    %c0_145 = arith.constant 0 : index
    %c0_146 = arith.constant 0 : index
    %587 = vector.load %arg37[%c5_144, %c0_145, %c0_146] : memref<8x8x96xf32, #tpu.memory_space<vmem>>, vector<1x8x96xf32>
    %588 = vector.shape_cast %587 : vector<1x8x96xf32> to vector<8x96xf32>
    %589 = arith.truncf %586 : vector<8x32xf32> to vector<8x32xbf16>
    %cst_147 = arith.constant dense<0.000000e+00> : vector<8x96xf32>
    %590 = tpu.matmul %589, %372, %cst_147 {dimension_numbers = #tpu.dot_dimension_numbers<[1], [0], [0], [1], [0, 0, 1, 1], [], []>} : vector<8x32xbf16>, vector<32x96xbf16>, vector<8x96xf32> -> vector<8x96xf32>
    %591 = arith.addf %590, %375 : vector<8x96xf32>
    %592 = vector.extract_strided_slice %588 {offsets = [0, 0], sizes = [8, 32], strides = [1, 1]} : vector<8x96xf32> to vector<8x32xf32>
    %593 = vector.extract_strided_slice %591 {offsets = [0, 0], sizes = [8, 32], strides = [1, 1]} : vector<8x96xf32> to vector<8x32xf32>
    %594 = arith.addf %592, %593 : vector<8x32xf32>
    %595 = arith.negf %594 : vector<8x32xf32>
    %596 = math.exp %595 : vector<8x32xf32>
    %cst_148 = arith.constant 1.000000e+00 : f32
    %597 = vector.broadcast %cst_148 : f32 to vector<8x32xf32>
    %598 = arith.addf %597, %596 : vector<8x32xf32>
    %599 = arith.divf %597, %598 : vector<8x32xf32>
    %600 = vector.extract_strided_slice %588 {offsets = [0, 32], sizes = [8, 32], strides = [1, 1]} : vector<8x96xf32> to vector<8x32xf32>
    %601 = vector.extract_strided_slice %591 {offsets = [0, 32], sizes = [8, 32], strides = [1, 1]} : vector<8x96xf32> to vector<8x32xf32>
    %602 = arith.addf %600, %601 : vector<8x32xf32>
    %603 = arith.negf %602 : vector<8x32xf32>
    %604 = math.exp %603 : vector<8x32xf32>
    %cst_149 = arith.constant 1.000000e+00 : f32
    %605 = vector.broadcast %cst_149 : f32 to vector<8x32xf32>
    %606 = arith.addf %605, %604 : vector<8x32xf32>
    %607 = arith.divf %605, %606 : vector<8x32xf32>
    %608 = vector.extract_strided_slice %588 {offsets = [0, 64], sizes = [8, 32], strides = [1, 1]} : vector<8x96xf32> to vector<8x32xf32>
    %609 = vector.extract_strided_slice %591 {offsets = [0, 64], sizes = [8, 32], strides = [1, 1]} : vector<8x96xf32> to vector<8x32xf32>
    %610 = arith.mulf %599, %609 : vector<8x32xf32>
    %611 = arith.addf %608, %610 : vector<8x32xf32>
    %612 = math.tanh %611 : vector<8x32xf32>
    %cst_150 = arith.constant 1.000000e+00 : f32
    %613 = vector.broadcast %cst_150 : f32 to vector<8x32xf32>
    %614 = arith.subf %613, %607 : vector<8x32xf32>
    %615 = arith.mulf %614, %612 : vector<8x32xf32>
    %616 = arith.mulf %607, %586 : vector<8x32xf32>
    %617 = arith.addf %615, %616 : vector<8x32xf32>
    %c5_i32_151 = arith.constant 5 : i32
    %618 = vector.broadcast %c5_i32_151 : i32 to vector<8x1xi32>
    %619 = arith.cmpi sgt, %371, %618 : vector<8x1xi32>
    %620 = arith.extui %619 : vector<8x1xi1> to vector<8x1xi32>
    %621 = arith.sitofp %620 : vector<8x1xi32> to vector<8x1xf32>
    %622 = vector.broadcast %621 : vector<8x1xf32> to vector<8x32xf32>
    %623 = arith.mulf %622, %617 : vector<8x32xf32>
    %cst_152 = arith.constant 1.000000e+00 : f32
    %624 = vector.broadcast %cst_152 : f32 to vector<8x1xf32>
    %625 = arith.subf %624, %621 : vector<8x1xf32>
    %626 = vector.broadcast %625 : vector<8x1xf32> to vector<8x32xf32>
    %627 = arith.mulf %626, %586 : vector<8x32xf32>
    %628 = arith.addf %623, %627 : vector<8x32xf32>
    %c6_153 = arith.constant 6 : index
    %c0_154 = arith.constant 0 : index
    %c0_155 = arith.constant 0 : index
    %629 = vector.load %arg37[%c6_153, %c0_154, %c0_155] : memref<8x8x96xf32, #tpu.memory_space<vmem>>, vector<1x8x96xf32>
    %630 = vector.shape_cast %629 : vector<1x8x96xf32> to vector<8x96xf32>
    %631 = arith.truncf %628 : vector<8x32xf32> to vector<8x32xbf16>
    %cst_156 = arith.constant dense<0.000000e+00> : vector<8x96xf32>
    %632 = tpu.matmul %631, %372, %cst_156 {dimension_numbers = #tpu.dot_dimension_numbers<[1], [0], [0], [1], [0, 0, 1, 1], [], []>} : vector<8x32xbf16>, vector<32x96xbf16>, vector<8x96xf32> -> vector<8x96xf32>
    %633 = arith.addf %632, %375 : vector<8x96xf32>
    %634 = vector.extract_strided_slice %630 {offsets = [0, 0], sizes = [8, 32], strides = [1, 1]} : vector<8x96xf32> to vector<8x32xf32>
    %635 = vector.extract_strided_slice %633 {offsets = [0, 0], sizes = [8, 32], strides = [1, 1]} : vector<8x96xf32> to vector<8x32xf32>
    %636 = arith.addf %634, %635 : vector<8x32xf32>
    %637 = arith.negf %636 : vector<8x32xf32>
    %638 = math.exp %637 : vector<8x32xf32>
    %cst_157 = arith.constant 1.000000e+00 : f32
    %639 = vector.broadcast %cst_157 : f32 to vector<8x32xf32>
    %640 = arith.addf %639, %638 : vector<8x32xf32>
    %641 = arith.divf %639, %640 : vector<8x32xf32>
    %642 = vector.extract_strided_slice %630 {offsets = [0, 32], sizes = [8, 32], strides = [1, 1]} : vector<8x96xf32> to vector<8x32xf32>
    %643 = vector.extract_strided_slice %633 {offsets = [0, 32], sizes = [8, 32], strides = [1, 1]} : vector<8x96xf32> to vector<8x32xf32>
    %644 = arith.addf %642, %643 : vector<8x32xf32>
    %645 = arith.negf %644 : vector<8x32xf32>
    %646 = math.exp %645 : vector<8x32xf32>
    %cst_158 = arith.constant 1.000000e+00 : f32
    %647 = vector.broadcast %cst_158 : f32 to vector<8x32xf32>
    %648 = arith.addf %647, %646 : vector<8x32xf32>
    %649 = arith.divf %647, %648 : vector<8x32xf32>
    %650 = vector.extract_strided_slice %630 {offsets = [0, 64], sizes = [8, 32], strides = [1, 1]} : vector<8x96xf32> to vector<8x32xf32>
    %651 = vector.extract_strided_slice %633 {offsets = [0, 64], sizes = [8, 32], strides = [1, 1]} : vector<8x96xf32> to vector<8x32xf32>
    %652 = arith.mulf %641, %651 : vector<8x32xf32>
    %653 = arith.addf %650, %652 : vector<8x32xf32>
    %654 = math.tanh %653 : vector<8x32xf32>
    %cst_159 = arith.constant 1.000000e+00 : f32
    %655 = vector.broadcast %cst_159 : f32 to vector<8x32xf32>
    %656 = arith.subf %655, %649 : vector<8x32xf32>
    %657 = arith.mulf %656, %654 : vector<8x32xf32>
    %658 = arith.mulf %649, %628 : vector<8x32xf32>
    %659 = arith.addf %657, %658 : vector<8x32xf32>
    %c6_i32_160 = arith.constant 6 : i32
    %660 = vector.broadcast %c6_i32_160 : i32 to vector<8x1xi32>
    %661 = arith.cmpi sgt, %371, %660 : vector<8x1xi32>
    %662 = arith.extui %661 : vector<8x1xi1> to vector<8x1xi32>
    %663 = arith.sitofp %662 : vector<8x1xi32> to vector<8x1xf32>
    %664 = vector.broadcast %663 : vector<8x1xf32> to vector<8x32xf32>
    %665 = arith.mulf %664, %659 : vector<8x32xf32>
    %cst_161 = arith.constant 1.000000e+00 : f32
    %666 = vector.broadcast %cst_161 : f32 to vector<8x1xf32>
    %667 = arith.subf %666, %663 : vector<8x1xf32>
    %668 = vector.broadcast %667 : vector<8x1xf32> to vector<8x32xf32>
    %669 = arith.mulf %668, %628 : vector<8x32xf32>
    %670 = arith.addf %665, %669 : vector<8x32xf32>
    %c7_162 = arith.constant 7 : index
    %c0_163 = arith.constant 0 : index
    %c0_164 = arith.constant 0 : index
    %671 = vector.load %arg37[%c7_162, %c0_163, %c0_164] : memref<8x8x96xf32, #tpu.memory_space<vmem>>, vector<1x8x96xf32>
    %672 = vector.shape_cast %671 : vector<1x8x96xf32> to vector<8x96xf32>
    %673 = arith.truncf %670 : vector<8x32xf32> to vector<8x32xbf16>
    %cst_165 = arith.constant dense<0.000000e+00> : vector<8x96xf32>
    %674 = tpu.matmul %673, %372, %cst_165 {dimension_numbers = #tpu.dot_dimension_numbers<[1], [0], [0], [1], [0, 0, 1, 1], [], []>} : vector<8x32xbf16>, vector<32x96xbf16>, vector<8x96xf32> -> vector<8x96xf32>
    %675 = arith.addf %674, %375 : vector<8x96xf32>
    %676 = vector.extract_strided_slice %672 {offsets = [0, 0], sizes = [8, 32], strides = [1, 1]} : vector<8x96xf32> to vector<8x32xf32>
    %677 = vector.extract_strided_slice %675 {offsets = [0, 0], sizes = [8, 32], strides = [1, 1]} : vector<8x96xf32> to vector<8x32xf32>
    %678 = arith.addf %676, %677 : vector<8x32xf32>
    %679 = arith.negf %678 : vector<8x32xf32>
    %680 = math.exp %679 : vector<8x32xf32>
    %cst_166 = arith.constant 1.000000e+00 : f32
    %681 = vector.broadcast %cst_166 : f32 to vector<8x32xf32>
    %682 = arith.addf %681, %680 : vector<8x32xf32>
    %683 = arith.divf %681, %682 : vector<8x32xf32>
    %684 = vector.extract_strided_slice %672 {offsets = [0, 32], sizes = [8, 32], strides = [1, 1]} : vector<8x96xf32> to vector<8x32xf32>
    %685 = vector.extract_strided_slice %675 {offsets = [0, 32], sizes = [8, 32], strides = [1, 1]} : vector<8x96xf32> to vector<8x32xf32>
    %686 = arith.addf %684, %685 : vector<8x32xf32>
    %687 = arith.negf %686 : vector<8x32xf32>
    %688 = math.exp %687 : vector<8x32xf32>
    %cst_167 = arith.constant 1.000000e+00 : f32
    %689 = vector.broadcast %cst_167 : f32 to vector<8x32xf32>
    %690 = arith.addf %689, %688 : vector<8x32xf32>
    %691 = arith.divf %689, %690 : vector<8x32xf32>
    %692 = vector.extract_strided_slice %672 {offsets = [0, 64], sizes = [8, 32], strides = [1, 1]} : vector<8x96xf32> to vector<8x32xf32>
    %693 = vector.extract_strided_slice %675 {offsets = [0, 64], sizes = [8, 32], strides = [1, 1]} : vector<8x96xf32> to vector<8x32xf32>
    %694 = arith.mulf %683, %693 : vector<8x32xf32>
    %695 = arith.addf %692, %694 : vector<8x32xf32>
    %696 = math.tanh %695 : vector<8x32xf32>
    %cst_168 = arith.constant 1.000000e+00 : f32
    %697 = vector.broadcast %cst_168 : f32 to vector<8x32xf32>
    %698 = arith.subf %697, %691 : vector<8x32xf32>
    %699 = arith.mulf %698, %696 : vector<8x32xf32>
    %700 = arith.mulf %691, %670 : vector<8x32xf32>
    %701 = arith.addf %699, %700 : vector<8x32xf32>
    %c7_i32_169 = arith.constant 7 : i32
    %702 = vector.broadcast %c7_i32_169 : i32 to vector<8x1xi32>
    %703 = arith.cmpi sgt, %371, %702 : vector<8x1xi32>
    %704 = arith.extui %703 : vector<8x1xi1> to vector<8x1xi32>
    %705 = arith.sitofp %704 : vector<8x1xi32> to vector<8x1xf32>
    %706 = vector.broadcast %705 : vector<8x1xf32> to vector<8x32xf32>
    %707 = arith.mulf %706, %701 : vector<8x32xf32>
    %cst_170 = arith.constant 1.000000e+00 : f32
    %708 = vector.broadcast %cst_170 : f32 to vector<8x1xf32>
    %709 = arith.subf %708, %705 : vector<8x1xf32>
    %710 = vector.broadcast %709 : vector<8x1xf32> to vector<8x32xf32>
    %711 = arith.mulf %710, %670 : vector<8x32xf32>
    %712 = arith.addf %707, %711 : vector<8x32xf32>
    %713 = arith.truncf %370 : vector<8x32xf32> to vector<8x32xbf16>
    %c0_171 = arith.constant 0 : index
    %c0_172 = arith.constant 0 : index
    %714 = vector.load %arg18[%c0_171, %c0_172] : memref<32x24xbf16, #tpu.memory_space<vmem>>, vector<32x24xbf16>
    %cst_173 = arith.constant dense<0.000000e+00> : vector<8x24xf32>
    %715 = tpu.matmul %713, %714, %cst_173 {dimension_numbers = #tpu.dot_dimension_numbers<[1], [0], [0], [1], [0, 0, 1, 1], [], []>} : vector<8x32xbf16>, vector<32x24xbf16>, vector<8x24xf32> -> vector<8x24xf32>
    %c0_174 = arith.constant 0 : index
    %c0_175 = arith.constant 0 : index
    %716 = vector.load %arg16[%c0_174, %c0_175] : memref<1x24xf32, #tpu.memory_space<vmem>>, vector<1x24xf32>
    %717 = vector.broadcast %716 : vector<1x24xf32> to vector<8x24xf32>
    %718 = arith.addf %715, %717 : vector<8x24xf32>
    %719 = math.tanh %718 : vector<8x24xf32>
    %720 = arith.truncf %719 : vector<8x24xf32> to vector<8x24xbf16>
    %c0_176 = arith.constant 0 : index
    %c0_177 = arith.constant 0 : index
    %721 = vector.load %arg19[%c0_176, %c0_177] : memref<24x32xbf16, #tpu.memory_space<vmem>>, vector<24x32xbf16>
    %cst_178 = arith.constant dense<0.000000e+00> : vector<8x32xf32>
    %722 = tpu.matmul %720, %721, %cst_178 {dimension_numbers = #tpu.dot_dimension_numbers<[1], [0], [0], [1], [0, 0, 1, 1], [], []>} : vector<8x24xbf16>, vector<24x32xbf16>, vector<8x32xf32> -> vector<8x32xf32>
    %c0_179 = arith.constant 0 : index
    %c0_180 = arith.constant 0 : index
    %723 = vector.load %arg17[%c0_179, %c0_180] : memref<1x32xf32, #tpu.memory_space<vmem>>, vector<1x32xf32>
    %724 = vector.broadcast %723 : vector<1x32xf32> to vector<8x32xf32>
    %725 = arith.addf %722, %724 : vector<8x32xf32>
    %726 = vector.extract_strided_slice %725 {offsets = [0, 0], sizes = [8, 16], strides = [1, 1]} : vector<8x32xf32> to vector<8x16xf32>
    %c0_181 = arith.constant 0 : index
    %c0_182 = arith.constant 0 : index
    %727 = vector.load %arg32[%c0_181, %c0_182] : memref<8x16xf32, #tpu.memory_space<vmem>>, vector<8x16xf32>
    tpu.vector_store %arg32[%c0_181, %c0_182], %726 {strides = array<i32>} : memref<8x16xf32, #tpu.memory_space<vmem>>, vector<8x16xf32>,
    %728 = vector.extract_strided_slice %725 {offsets = [0, 16], sizes = [8, 16], strides = [1, 1]} : vector<8x32xf32> to vector<8x16xf32>
    %c0_183 = arith.constant 0 : index
    %c0_184 = arith.constant 0 : index
    %729 = vector.load %arg33[%c0_183, %c0_184] : memref<8x16xf32, #tpu.memory_space<vmem>>, vector<8x16xf32>
    tpu.vector_store %arg33[%c0_183, %c0_184], %728 {strides = array<i32>} : memref<8x16xf32, #tpu.memory_space<vmem>>, vector<8x16xf32>,
    %c0_185 = arith.constant 0 : index
    %c0_186 = arith.constant 0 : index
    %730 = vector.load %arg24[%c0_185, %c0_186] : memref<32x24xbf16, #tpu.memory_space<vmem>>, vector<32x24xbf16>
    %cst_187 = arith.constant dense<0.000000e+00> : vector<8x24xf32>
    %731 = tpu.matmul %713, %730, %cst_187 {dimension_numbers = #tpu.dot_dimension_numbers<[1], [0], [0], [1], [0, 0, 1, 1], [], []>} : vector<8x32xbf16>, vector<32x24xbf16>, vector<8x24xf32> -> vector<8x24xf32>
    %732 = arith.truncf %712 : vector<8x32xf32> to vector<8x32xbf16>
    %c0_188 = arith.constant 0 : index
    %c0_189 = arith.constant 0 : index
    %733 = vector.load %arg25[%c0_188, %c0_189] : memref<32x24xbf16, #tpu.memory_space<vmem>>, vector<32x24xbf16>
    %cst_190 = arith.constant dense<0.000000e+00> : vector<8x24xf32>
    %734 = tpu.matmul %732, %733, %cst_190 {dimension_numbers = #tpu.dot_dimension_numbers<[1], [0], [0], [1], [0, 0, 1, 1], [], []>} : vector<8x32xbf16>, vector<32x24xbf16>, vector<8x24xf32> -> vector<8x24xf32>
    %735 = arith.addf %731, %734 : vector<8x24xf32>
    %c0_191 = arith.constant 0 : index
    %c0_192 = arith.constant 0 : index
    %736 = vector.load %arg22[%c0_191, %c0_192] : memref<1x24xf32, #tpu.memory_space<vmem>>, vector<1x24xf32>
    %737 = vector.broadcast %736 : vector<1x24xf32> to vector<8x24xf32>
    %738 = arith.addf %735, %737 : vector<8x24xf32>
    %739 = math.tanh %738 : vector<8x24xf32>
    %740 = arith.truncf %739 : vector<8x24xf32> to vector<8x24xbf16>
    %c0_193 = arith.constant 0 : index
    %c0_194 = arith.constant 0 : index
    %741 = vector.load %arg26[%c0_193, %c0_194] : memref<24x32xbf16, #tpu.memory_space<vmem>>, vector<24x32xbf16>
    %cst_195 = arith.constant dense<0.000000e+00> : vector<8x32xf32>
    %742 = tpu.matmul %740, %741, %cst_195 {dimension_numbers = #tpu.dot_dimension_numbers<[1], [0], [0], [1], [0, 0, 1, 1], [], []>} : vector<8x24xbf16>, vector<24x32xbf16>, vector<8x32xf32> -> vector<8x32xf32>
    %c0_196 = arith.constant 0 : index
    %c0_197 = arith.constant 0 : index
    %743 = vector.load %arg23[%c0_196, %c0_197] : memref<1x32xf32, #tpu.memory_space<vmem>>, vector<1x32xf32>
    %744 = vector.broadcast %743 : vector<1x32xf32> to vector<8x32xf32>
    %745 = arith.addf %742, %744 : vector<8x32xf32>
    %746 = vector.extract_strided_slice %745 {offsets = [0, 0], sizes = [8, 16], strides = [1, 1]} : vector<8x32xf32> to vector<8x16xf32>
    %747 = vector.extract_strided_slice %745 {offsets = [0, 16], sizes = [8, 16], strides = [1, 1]} : vector<8x32xf32> to vector<8x16xf32>
    %c0_198 = arith.constant 0 : index
    %c0_199 = arith.constant 0 : index
    %748 = vector.load %arg34[%c0_198, %c0_199] : memref<8x16xf32, #tpu.memory_space<vmem>>, vector<8x16xf32>
    tpu.vector_store %arg34[%c0_198, %c0_199], %746 {strides = array<i32>} : memref<8x16xf32, #tpu.memory_space<vmem>>, vector<8x16xf32>,
    %c0_200 = arith.constant 0 : index
    %c0_201 = arith.constant 0 : index
    %749 = vector.load %arg35[%c0_200, %c0_201] : memref<8x16xf32, #tpu.memory_space<vmem>>, vector<8x16xf32>
    tpu.vector_store %arg35[%c0_200, %c0_201], %747 {strides = array<i32>} : memref<8x16xf32, #tpu.memory_space<vmem>>, vector<8x16xf32>,
    %cst_202 = arith.constant 5.000000e-01 : f32
    %750 = vector.broadcast %cst_202 : f32 to vector<8x16xf32>
    %751 = arith.mulf %750, %747 : vector<8x16xf32>
    %752 = math.exp %751 : vector<8x16xf32>
    %c0_203 = arith.constant 0 : index
    %c0_204 = arith.constant 0 : index
    %753 = vector.load %arg4[%c0_203, %c0_204] : memref<8x16xf32, #tpu.memory_space<vmem>>, vector<8x16xf32>
    %754 = arith.mulf %752, %753 : vector<8x16xf32>
    %755 = arith.addf %746, %754 : vector<8x16xf32>
    %756 = arith.truncf %755 : vector<8x16xf32> to vector<8x16xbf16>
    %c0_205 = arith.constant 0 : index
    %c0_206 = arith.constant 0 : index
    %757 = vector.load %arg15[%c0_205, %c0_206] : memref<16x32xbf16, #tpu.memory_space<vmem>>, vector<16x32xbf16>
    %cst_207 = arith.constant dense<0.000000e+00> : vector<8x32xf32>
    %758 = tpu.matmul %756, %757, %cst_207 {dimension_numbers = #tpu.dot_dimension_numbers<[1], [0], [0], [1], [0, 0, 1, 1], [], []>} : vector<8x16xbf16>, vector<16x32xbf16>, vector<8x32xf32> -> vector<8x32xf32>
    %c0_208 = arith.constant 0 : index
    %c0_209 = arith.constant 0 : index
    %759 = vector.load %arg14[%c0_208, %c0_209] : memref<32x32xbf16, #tpu.memory_space<vmem>>, vector<32x32xbf16>
    %cst_210 = arith.constant dense<0.000000e+00> : vector<8x32xf32>
    %760 = tpu.matmul %713, %759, %cst_210 {dimension_numbers = #tpu.dot_dimension_numbers<[1], [0], [0], [1], [0, 0, 1, 1], [], []>} : vector<8x32xbf16>, vector<32x32xbf16>, vector<8x32xf32> -> vector<8x32xf32>
    %761 = arith.addf %758, %760 : vector<8x32xf32>
    %c0_211 = arith.constant 0 : index
    %c0_212 = arith.constant 0 : index
    %762 = vector.load %arg13[%c0_211, %c0_212] : memref<1x32xf32, #tpu.memory_space<vmem>>, vector<1x32xf32>
    %763 = vector.broadcast %762 : vector<1x32xf32> to vector<8x32xf32>
    %764 = arith.addf %761, %763 : vector<8x32xf32>
    %c0_213 = arith.constant 0 : index
    %c0_214 = arith.constant 0 : index
    %765 = vector.load %arg7[%c0_213, %c0_214] : memref<32x96xbf16, #tpu.memory_space<vmem>>, vector<32x96xbf16>
    %c0_215 = arith.constant 0 : index
    %c0_216 = arith.constant 0 : index
    %766 = vector.load %arg5[%c0_215, %c0_216] : memref<1x96xf32, #tpu.memory_space<vmem>>, vector<1x96xf32>
    %767 = vector.shape_cast %766 : vector<1x96xf32> to vector<1x96xf32>
    %768 = vector.broadcast %767 : vector<1x96xf32> to vector<8x96xf32>
    %c0_217 = arith.constant 0 : index
    %c0_218 = arith.constant 0 : index
    %769 = vector.load %arg21[%c0_217, %c0_218] : memref<32x256xbf16, #tpu.memory_space<vmem>>, vector<32x256xbf16>
    %c0_219 = arith.constant 0 : index
    %c0_220 = arith.constant 0 : index
    %770 = vector.load %arg20[%c0_219, %c0_220] : memref<1x256xf32, #tpu.memory_space<vmem>>, vector<1x256xf32>
    %771 = vector.shape_cast %770 : vector<1x256xf32> to vector<1x256xf32>
    %772 = vector.broadcast %771 : vector<1x256xf32> to vector<8x256xf32>
    %c0_221 = arith.constant 0 : index
    %c0_222 = arith.constant 0 : index
    %c0_223 = arith.constant 0 : index
    %773 = vector.load %arg38[%c0_221, %c0_222, %c0_223] : memref<8x8x96xf32, #tpu.memory_space<vmem>>, vector<1x8x96xf32>
    %774 = vector.shape_cast %773 : vector<1x8x96xf32> to vector<8x96xf32>
    %775 = arith.truncf %764 : vector<8x32xf32> to vector<8x32xbf16>
    %cst_224 = arith.constant dense<0.000000e+00> : vector<8x96xf32>
    %776 = tpu.matmul %775, %765, %cst_224 {dimension_numbers = #tpu.dot_dimension_numbers<[1], [0], [0], [1], [0, 0, 1, 1], [], []>} : vector<8x32xbf16>, vector<32x96xbf16>, vector<8x96xf32> -> vector<8x96xf32>
    %777 = arith.addf %776, %768 : vector<8x96xf32>
    %778 = vector.extract_strided_slice %774 {offsets = [0, 0], sizes = [8, 32], strides = [1, 1]} : vector<8x96xf32> to vector<8x32xf32>
    %779 = vector.extract_strided_slice %777 {offsets = [0, 0], sizes = [8, 32], strides = [1, 1]} : vector<8x96xf32> to vector<8x32xf32>
    %780 = arith.addf %778, %779 : vector<8x32xf32>
    %781 = arith.negf %780 : vector<8x32xf32>
    %782 = math.exp %781 : vector<8x32xf32>
    %cst_225 = arith.constant 1.000000e+00 : f32
    %783 = vector.broadcast %cst_225 : f32 to vector<8x32xf32>
    %784 = arith.addf %783, %782 : vector<8x32xf32>
    %785 = arith.divf %783, %784 : vector<8x32xf32>
    %786 = vector.extract_strided_slice %774 {offsets = [0, 32], sizes = [8, 32], strides = [1, 1]} : vector<8x96xf32> to vector<8x32xf32>
    %787 = vector.extract_strided_slice %777 {offsets = [0, 32], sizes = [8, 32], strides = [1, 1]} : vector<8x96xf32> to vector<8x32xf32>
    %788 = arith.addf %786, %787 : vector<8x32xf32>
    %789 = arith.negf %788 : vector<8x32xf32>
    %790 = math.exp %789 : vector<8x32xf32>
    %cst_226 = arith.constant 1.000000e+00 : f32
    %791 = vector.broadcast %cst_226 : f32 to vector<8x32xf32>
    %792 = arith.addf %791, %790 : vector<8x32xf32>
    %793 = arith.divf %791, %792 : vector<8x32xf32>
    %794 = vector.extract_strided_slice %774 {offsets = [0, 64], sizes = [8, 32], strides = [1, 1]} : vector<8x96xf32> to vector<8x32xf32>
    %795 = vector.extract_strided_slice %777 {offsets = [0, 64], sizes = [8, 32], strides = [1, 1]} : vector<8x96xf32> to vector<8x32xf32>
    %796 = arith.mulf %785, %795 : vector<8x32xf32>
    %797 = arith.addf %794, %796 : vector<8x32xf32>
    %798 = math.tanh %797 : vector<8x32xf32>
    %cst_227 = arith.constant 1.000000e+00 : f32
    %799 = vector.broadcast %cst_227 : f32 to vector<8x32xf32>
    %800 = arith.subf %799, %793 : vector<8x32xf32>
    %801 = arith.mulf %800, %798 : vector<8x32xf32>
    %802 = arith.mulf %793, %764 : vector<8x32xf32>
    %803 = arith.addf %801, %802 : vector<8x32xf32>
    %804 = arith.truncf %803 : vector<8x32xf32> to vector<8x32xbf16>
    %cst_228 = arith.constant dense<0.000000e+00> : vector<8x256xf32>
    %805 = tpu.matmul %804, %769, %cst_228 {dimension_numbers = #tpu.dot_dimension_numbers<[1], [0], [0], [1], [0, 0, 1, 1], [], []>} : vector<8x32xbf16>, vector<32x256xbf16>, vector<8x256xf32> -> vector<8x256xf32>
    %806 = arith.addf %805, %772 : vector<8x256xf32>
    %cst_229 = arith.constant dense<0xFF800000> : vector<8xf32>
    %807 = vector.multi_reduction <maximumf>, %806, %cst_229 [1] : vector<8x256xf32> to vector<8xf32>
    %808 = vector.shape_cast %807 : vector<8xf32> to vector<8x1xf32>
    %809 = vector.broadcast %808 : vector<8x1xf32> to vector<8x256xf32>
    %810 = arith.subf %806, %809 : vector<8x256xf32>
    %811 = math.exp %810 : vector<8x256xf32>
    %cst_230 = arith.constant dense<0.000000e+00> : vector<8xf32>
    %812 = vector.multi_reduction <add>, %811, %cst_230 [1] : vector<8x256xf32> to vector<8xf32>
    %813 = vector.shape_cast %812 : vector<8xf32> to vector<8x1xf32>
    %814 = tpu.reciprocal %813 {approx = true} : vector<8x1xf32> -> vector<8x1xf32>
    %815 = vector.broadcast %814 : vector<8x1xf32> to vector<8x256xf32>
    %816 = arith.mulf %811, %815 : vector<8x256xf32>
    %c0_231 = arith.constant 0 : index
    %c0_232 = arith.constant 0 : index
    %c0_233 = arith.constant 0 : index
    %817 = vector.load %arg31[%c0_231, %c0_232, %c0_233] : memref<7x8x256xf32, #tpu.memory_space<vmem>>, vector<1x8x256xf32>
    %818 = vector.shape_cast %817 : vector<1x8x256xf32> to vector<8x256xf32>
    %819 = vector.shape_cast %816 : vector<8x256xf32> to vector<1x8x256xf32>
    tpu.vector_store %arg31[%c0_231, %c0_232, %c0_233], %819 {strides = array<i32>} : memref<7x8x256xf32, #tpu.memory_space<vmem>>, vector<1x8x256xf32>,
    %c1_234 = arith.constant 1 : index
    %c0_235 = arith.constant 0 : index
    %c0_236 = arith.constant 0 : index
    %820 = vector.load %arg38[%c1_234, %c0_235, %c0_236] : memref<8x8x96xf32, #tpu.memory_space<vmem>>, vector<1x8x96xf32>
    %821 = vector.shape_cast %820 : vector<1x8x96xf32> to vector<8x96xf32>
    %822 = arith.truncf %803 : vector<8x32xf32> to vector<8x32xbf16>
    %cst_237 = arith.constant dense<0.000000e+00> : vector<8x96xf32>
    %823 = tpu.matmul %822, %765, %cst_237 {dimension_numbers = #tpu.dot_dimension_numbers<[1], [0], [0], [1], [0, 0, 1, 1], [], []>} : vector<8x32xbf16>, vector<32x96xbf16>, vector<8x96xf32> -> vector<8x96xf32>
    %824 = arith.addf %823, %768 : vector<8x96xf32>
    %825 = vector.extract_strided_slice %821 {offsets = [0, 0], sizes = [8, 32], strides = [1, 1]} : vector<8x96xf32> to vector<8x32xf32>
    %826 = vector.extract_strided_slice %824 {offsets = [0, 0], sizes = [8, 32], strides = [1, 1]} : vector<8x96xf32> to vector<8x32xf32>
    %827 = arith.addf %825, %826 : vector<8x32xf32>
    %828 = arith.negf %827 : vector<8x32xf32>
    %829 = math.exp %828 : vector<8x32xf32>
    %cst_238 = arith.constant 1.000000e+00 : f32
    %830 = vector.broadcast %cst_238 : f32 to vector<8x32xf32>
    %831 = arith.addf %830, %829 : vector<8x32xf32>
    %832 = arith.divf %830, %831 : vector<8x32xf32>
    %833 = vector.extract_strided_slice %821 {offsets = [0, 32], sizes = [8, 32], strides = [1, 1]} : vector<8x96xf32> to vector<8x32xf32>
    %834 = vector.extract_strided_slice %824 {offsets = [0, 32], sizes = [8, 32], strides = [1, 1]} : vector<8x96xf32> to vector<8x32xf32>
    %835 = arith.addf %833, %834 : vector<8x32xf32>
    %836 = arith.negf %835 : vector<8x32xf32>
    %837 = math.exp %836 : vector<8x32xf32>
    %cst_239 = arith.constant 1.000000e+00 : f32
    %838 = vector.broadcast %cst_239 : f32 to vector<8x32xf32>
    %839 = arith.addf %838, %837 : vector<8x32xf32>
    %840 = arith.divf %838, %839 : vector<8x32xf32>
    %841 = vector.extract_strided_slice %821 {offsets = [0, 64], sizes = [8, 32], strides = [1, 1]} : vector<8x96xf32> to vector<8x32xf32>
    %842 = vector.extract_strided_slice %824 {offsets = [0, 64], sizes = [8, 32], strides = [1, 1]} : vector<8x96xf32> to vector<8x32xf32>
    %843 = arith.mulf %832, %842 : vector<8x32xf32>
    %844 = arith.addf %841, %843 : vector<8x32xf32>
    %845 = math.tanh %844 : vector<8x32xf32>
    %cst_240 = arith.constant 1.000000e+00 : f32
    %846 = vector.broadcast %cst_240 : f32 to vector<8x32xf32>
    %847 = arith.subf %846, %840 : vector<8x32xf32>
    %848 = arith.mulf %847, %845 : vector<8x32xf32>
    %849 = arith.mulf %840, %803 : vector<8x32xf32>
    %850 = arith.addf %848, %849 : vector<8x32xf32>
    %851 = arith.truncf %850 : vector<8x32xf32> to vector<8x32xbf16>
    %cst_241 = arith.constant dense<0.000000e+00> : vector<8x256xf32>
    %852 = tpu.matmul %851, %769, %cst_241 {dimension_numbers = #tpu.dot_dimension_numbers<[1], [0], [0], [1], [0, 0, 1, 1], [], []>} : vector<8x32xbf16>, vector<32x256xbf16>, vector<8x256xf32> -> vector<8x256xf32>
    %853 = arith.addf %852, %772 : vector<8x256xf32>
    %cst_242 = arith.constant dense<0xFF800000> : vector<8xf32>
    %854 = vector.multi_reduction <maximumf>, %853, %cst_242 [1] : vector<8x256xf32> to vector<8xf32>
    %855 = vector.shape_cast %854 : vector<8xf32> to vector<8x1xf32>
    %856 = vector.broadcast %855 : vector<8x1xf32> to vector<8x256xf32>
    %857 = arith.subf %853, %856 : vector<8x256xf32>
    %858 = math.exp %857 : vector<8x256xf32>
    %cst_243 = arith.constant dense<0.000000e+00> : vector<8xf32>
    %859 = vector.multi_reduction <add>, %858, %cst_243 [1] : vector<8x256xf32> to vector<8xf32>
    %860 = vector.shape_cast %859 : vector<8xf32> to vector<8x1xf32>
    %861 = tpu.reciprocal %860 {approx = true} : vector<8x1xf32> -> vector<8x1xf32>
    %862 = vector.broadcast %861 : vector<8x1xf32> to vector<8x256xf32>
    %863 = arith.mulf %858, %862 : vector<8x256xf32>
    %c1_244 = arith.constant 1 : index
    %c0_245 = arith.constant 0 : index
    %c0_246 = arith.constant 0 : index
    %864 = vector.load %arg31[%c1_244, %c0_245, %c0_246] : memref<7x8x256xf32, #tpu.memory_space<vmem>>, vector<1x8x256xf32>
    %865 = vector.shape_cast %864 : vector<1x8x256xf32> to vector<8x256xf32>
    %866 = vector.shape_cast %863 : vector<8x256xf32> to vector<1x8x256xf32>
    tpu.vector_store %arg31[%c1_244, %c0_245, %c0_246], %866 {strides = array<i32>} : memref<7x8x256xf32, #tpu.memory_space<vmem>>, vector<1x8x256xf32>,
    %c2_247 = arith.constant 2 : index
    %c0_248 = arith.constant 0 : index
    %c0_249 = arith.constant 0 : index
    %867 = vector.load %arg38[%c2_247, %c0_248, %c0_249] : memref<8x8x96xf32, #tpu.memory_space<vmem>>, vector<1x8x96xf32>
    %868 = vector.shape_cast %867 : vector<1x8x96xf32> to vector<8x96xf32>
    %869 = arith.truncf %850 : vector<8x32xf32> to vector<8x32xbf16>
    %cst_250 = arith.constant dense<0.000000e+00> : vector<8x96xf32>
    %870 = tpu.matmul %869, %765, %cst_250 {dimension_numbers = #tpu.dot_dimension_numbers<[1], [0], [0], [1], [0, 0, 1, 1], [], []>} : vector<8x32xbf16>, vector<32x96xbf16>, vector<8x96xf32> -> vector<8x96xf32>
    %871 = arith.addf %870, %768 : vector<8x96xf32>
    %872 = vector.extract_strided_slice %868 {offsets = [0, 0], sizes = [8, 32], strides = [1, 1]} : vector<8x96xf32> to vector<8x32xf32>
    %873 = vector.extract_strided_slice %871 {offsets = [0, 0], sizes = [8, 32], strides = [1, 1]} : vector<8x96xf32> to vector<8x32xf32>
    %874 = arith.addf %872, %873 : vector<8x32xf32>
    %875 = arith.negf %874 : vector<8x32xf32>
    %876 = math.exp %875 : vector<8x32xf32>
    %cst_251 = arith.constant 1.000000e+00 : f32
    %877 = vector.broadcast %cst_251 : f32 to vector<8x32xf32>
    %878 = arith.addf %877, %876 : vector<8x32xf32>
    %879 = arith.divf %877, %878 : vector<8x32xf32>
    %880 = vector.extract_strided_slice %868 {offsets = [0, 32], sizes = [8, 32], strides = [1, 1]} : vector<8x96xf32> to vector<8x32xf32>
    %881 = vector.extract_strided_slice %871 {offsets = [0, 32], sizes = [8, 32], strides = [1, 1]} : vector<8x96xf32> to vector<8x32xf32>
    %882 = arith.addf %880, %881 : vector<8x32xf32>
    %883 = arith.negf %882 : vector<8x32xf32>
    %884 = math.exp %883 : vector<8x32xf32>
    %cst_252 = arith.constant 1.000000e+00 : f32
    %885 = vector.broadcast %cst_252 : f32 to vector<8x32xf32>
    %886 = arith.addf %885, %884 : vector<8x32xf32>
    %887 = arith.divf %885, %886 : vector<8x32xf32>
    %888 = vector.extract_strided_slice %868 {offsets = [0, 64], sizes = [8, 32], strides = [1, 1]} : vector<8x96xf32> to vector<8x32xf32>
    %889 = vector.extract_strided_slice %871 {offsets = [0, 64], sizes = [8, 32], strides = [1, 1]} : vector<8x96xf32> to vector<8x32xf32>
    %890 = arith.mulf %879, %889 : vector<8x32xf32>
    %891 = arith.addf %888, %890 : vector<8x32xf32>
    %892 = math.tanh %891 : vector<8x32xf32>
    %cst_253 = arith.constant 1.000000e+00 : f32
    %893 = vector.broadcast %cst_253 : f32 to vector<8x32xf32>
    %894 = arith.subf %893, %887 : vector<8x32xf32>
    %895 = arith.mulf %894, %892 : vector<8x32xf32>
    %896 = arith.mulf %887, %850 : vector<8x32xf32>
    %897 = arith.addf %895, %896 : vector<8x32xf32>
    %898 = arith.truncf %897 : vector<8x32xf32> to vector<8x32xbf16>
    %cst_254 = arith.constant dense<0.000000e+00> : vector<8x256xf32>
    %899 = tpu.matmul %898, %769, %cst_254 {dimension_numbers = #tpu.dot_dimension_numbers<[1], [0], [0], [1], [0, 0, 1, 1], [], []>} : vector<8x32xbf16>, vector<32x256xbf16>, vector<8x256xf32> -> vector<8x256xf32>
    %900 = arith.addf %899, %772 : vector<8x256xf32>
    %cst_255 = arith.constant dense<0xFF800000> : vector<8xf32>
    %901 = vector.multi_reduction <maximumf>, %900, %cst_255 [1] : vector<8x256xf32> to vector<8xf32>
    %902 = vector.shape_cast %901 : vector<8xf32> to vector<8x1xf32>
    %903 = vector.broadcast %902 : vector<8x1xf32> to vector<8x256xf32>
    %904 = arith.subf %900, %903 : vector<8x256xf32>
    %905 = math.exp %904 : vector<8x256xf32>
    %cst_256 = arith.constant dense<0.000000e+00> : vector<8xf32>
    %906 = vector.multi_reduction <add>, %905, %cst_256 [1] : vector<8x256xf32> to vector<8xf32>
    %907 = vector.shape_cast %906 : vector<8xf32> to vector<8x1xf32>
    %908 = tpu.reciprocal %907 {approx = true} : vector<8x1xf32> -> vector<8x1xf32>
    %909 = vector.broadcast %908 : vector<8x1xf32> to vector<8x256xf32>
    %910 = arith.mulf %905, %909 : vector<8x256xf32>
    %c2_257 = arith.constant 2 : index
    %c0_258 = arith.constant 0 : index
    %c0_259 = arith.constant 0 : index
    %911 = vector.load %arg31[%c2_257, %c0_258, %c0_259] : memref<7x8x256xf32, #tpu.memory_space<vmem>>, vector<1x8x256xf32>
    %912 = vector.shape_cast %911 : vector<1x8x256xf32> to vector<8x256xf32>
    %913 = vector.shape_cast %910 : vector<8x256xf32> to vector<1x8x256xf32>
    tpu.vector_store %arg31[%c2_257, %c0_258, %c0_259], %913 {strides = array<i32>} : memref<7x8x256xf32, #tpu.memory_space<vmem>>, vector<1x8x256xf32>,
    %c3_260 = arith.constant 3 : index
    %c0_261 = arith.constant 0 : index
    %c0_262 = arith.constant 0 : index
    %914 = vector.load %arg38[%c3_260, %c0_261, %c0_262] : memref<8x8x96xf32, #tpu.memory_space<vmem>>, vector<1x8x96xf32>
    %915 = vector.shape_cast %914 : vector<1x8x96xf32> to vector<8x96xf32>
    %916 = arith.truncf %897 : vector<8x32xf32> to vector<8x32xbf16>
    %cst_263 = arith.constant dense<0.000000e+00> : vector<8x96xf32>
    %917 = tpu.matmul %916, %765, %cst_263 {dimension_numbers = #tpu.dot_dimension_numbers<[1], [0], [0], [1], [0, 0, 1, 1], [], []>} : vector<8x32xbf16>, vector<32x96xbf16>, vector<8x96xf32> -> vector<8x96xf32>
    %918 = arith.addf %917, %768 : vector<8x96xf32>
    %919 = vector.extract_strided_slice %915 {offsets = [0, 0], sizes = [8, 32], strides = [1, 1]} : vector<8x96xf32> to vector<8x32xf32>
    %920 = vector.extract_strided_slice %918 {offsets = [0, 0], sizes = [8, 32], strides = [1, 1]} : vector<8x96xf32> to vector<8x32xf32>
    %921 = arith.addf %919, %920 : vector<8x32xf32>
    %922 = arith.negf %921 : vector<8x32xf32>
    %923 = math.exp %922 : vector<8x32xf32>
    %cst_264 = arith.constant 1.000000e+00 : f32
    %924 = vector.broadcast %cst_264 : f32 to vector<8x32xf32>
    %925 = arith.addf %924, %923 : vector<8x32xf32>
    %926 = arith.divf %924, %925 : vector<8x32xf32>
    %927 = vector.extract_strided_slice %915 {offsets = [0, 32], sizes = [8, 32], strides = [1, 1]} : vector<8x96xf32> to vector<8x32xf32>
    %928 = vector.extract_strided_slice %918 {offsets = [0, 32], sizes = [8, 32], strides = [1, 1]} : vector<8x96xf32> to vector<8x32xf32>
    %929 = arith.addf %927, %928 : vector<8x32xf32>
    %930 = arith.negf %929 : vector<8x32xf32>
    %931 = math.exp %930 : vector<8x32xf32>
    %cst_265 = arith.constant 1.000000e+00 : f32
    %932 = vector.broadcast %cst_265 : f32 to vector<8x32xf32>
    %933 = arith.addf %932, %931 : vector<8x32xf32>
    %934 = arith.divf %932, %933 : vector<8x32xf32>
    %935 = vector.extract_strided_slice %915 {offsets = [0, 64], sizes = [8, 32], strides = [1, 1]} : vector<8x96xf32> to vector<8x32xf32>
    %936 = vector.extract_strided_slice %918 {offsets = [0, 64], sizes = [8, 32], strides = [1, 1]} : vector<8x96xf32> to vector<8x32xf32>
    %937 = arith.mulf %926, %936 : vector<8x32xf32>
    %938 = arith.addf %935, %937 : vector<8x32xf32>
    %939 = math.tanh %938 : vector<8x32xf32>
    %cst_266 = arith.constant 1.000000e+00 : f32
    %940 = vector.broadcast %cst_266 : f32 to vector<8x32xf32>
    %941 = arith.subf %940, %934 : vector<8x32xf32>
    %942 = arith.mulf %941, %939 : vector<8x32xf32>
    %943 = arith.mulf %934, %897 : vector<8x32xf32>
    %944 = arith.addf %942, %943 : vector<8x32xf32>
    %945 = arith.truncf %944 : vector<8x32xf32> to vector<8x32xbf16>
    %cst_267 = arith.constant dense<0.000000e+00> : vector<8x256xf32>
    %946 = tpu.matmul %945, %769, %cst_267 {dimension_numbers = #tpu.dot_dimension_numbers<[1], [0], [0], [1], [0, 0, 1, 1], [], []>} : vector<8x32xbf16>, vector<32x256xbf16>, vector<8x256xf32> -> vector<8x256xf32>
    %947 = arith.addf %946, %772 : vector<8x256xf32>
    %cst_268 = arith.constant dense<0xFF800000> : vector<8xf32>
    %948 = vector.multi_reduction <maximumf>, %947, %cst_268 [1] : vector<8x256xf32> to vector<8xf32>
    %949 = vector.shape_cast %948 : vector<8xf32> to vector<8x1xf32>
    %950 = vector.broadcast %949 : vector<8x1xf32> to vector<8x256xf32>
    %951 = arith.subf %947, %950 : vector<8x256xf32>
    %952 = math.exp %951 : vector<8x256xf32>
    %cst_269 = arith.constant dense<0.000000e+00> : vector<8xf32>
    %953 = vector.multi_reduction <add>, %952, %cst_269 [1] : vector<8x256xf32> to vector<8xf32>
    %954 = vector.shape_cast %953 : vector<8xf32> to vector<8x1xf32>
    %955 = tpu.reciprocal %954 {approx = true} : vector<8x1xf32> -> vector<8x1xf32>
    %956 = vector.broadcast %955 : vector<8x1xf32> to vector<8x256xf32>
    %957 = arith.mulf %952, %956 : vector<8x256xf32>
    %c3_270 = arith.constant 3 : index
    %c0_271 = arith.constant 0 : index
    %c0_272 = arith.constant 0 : index
    %958 = vector.load %arg31[%c3_270, %c0_271, %c0_272] : memref<7x8x256xf32, #tpu.memory_space<vmem>>, vector<1x8x256xf32>
    %959 = vector.shape_cast %958 : vector<1x8x256xf32> to vector<8x256xf32>
    %960 = vector.shape_cast %957 : vector<8x256xf32> to vector<1x8x256xf32>
    tpu.vector_store %arg31[%c3_270, %c0_271, %c0_272], %960 {strides = array<i32>} : memref<7x8x256xf32, #tpu.memory_space<vmem>>, vector<1x8x256xf32>,
    %c4_273 = arith.constant 4 : index
    %c0_274 = arith.constant 0 : index
    %c0_275 = arith.constant 0 : index
    %961 = vector.load %arg38[%c4_273, %c0_274, %c0_275] : memref<8x8x96xf32, #tpu.memory_space<vmem>>, vector<1x8x96xf32>
    %962 = vector.shape_cast %961 : vector<1x8x96xf32> to vector<8x96xf32>
    %963 = arith.truncf %944 : vector<8x32xf32> to vector<8x32xbf16>
    %cst_276 = arith.constant dense<0.000000e+00> : vector<8x96xf32>
    %964 = tpu.matmul %963, %765, %cst_276 {dimension_numbers = #tpu.dot_dimension_numbers<[1], [0], [0], [1], [0, 0, 1, 1], [], []>} : vector<8x32xbf16>, vector<32x96xbf16>, vector<8x96xf32> -> vector<8x96xf32>
    %965 = arith.addf %964, %768 : vector<8x96xf32>
    %966 = vector.extract_strided_slice %962 {offsets = [0, 0], sizes = [8, 32], strides = [1, 1]} : vector<8x96xf32> to vector<8x32xf32>
    %967 = vector.extract_strided_slice %965 {offsets = [0, 0], sizes = [8, 32], strides = [1, 1]} : vector<8x96xf32> to vector<8x32xf32>
    %968 = arith.addf %966, %967 : vector<8x32xf32>
    %969 = arith.negf %968 : vector<8x32xf32>
    %970 = math.exp %969 : vector<8x32xf32>
    %cst_277 = arith.constant 1.000000e+00 : f32
    %971 = vector.broadcast %cst_277 : f32 to vector<8x32xf32>
    %972 = arith.addf %971, %970 : vector<8x32xf32>
    %973 = arith.divf %971, %972 : vector<8x32xf32>
    %974 = vector.extract_strided_slice %962 {offsets = [0, 32], sizes = [8, 32], strides = [1, 1]} : vector<8x96xf32> to vector<8x32xf32>
    %975 = vector.extract_strided_slice %965 {offsets = [0, 32], sizes = [8, 32], strides = [1, 1]} : vector<8x96xf32> to vector<8x32xf32>
    %976 = arith.addf %974, %975 : vector<8x32xf32>
    %977 = arith.negf %976 : vector<8x32xf32>
    %978 = math.exp %977 : vector<8x32xf32>
    %cst_278 = arith.constant 1.000000e+00 : f32
    %979 = vector.broadcast %cst_278 : f32 to vector<8x32xf32>
    %980 = arith.addf %979, %978 : vector<8x32xf32>
    %981 = arith.divf %979, %980 : vector<8x32xf32>
    %982 = vector.extract_strided_slice %962 {offsets = [0, 64], sizes = [8, 32], strides = [1, 1]} : vector<8x96xf32> to vector<8x32xf32>
    %983 = vector.extract_strided_slice %965 {offsets = [0, 64], sizes = [8, 32], strides = [1, 1]} : vector<8x96xf32> to vector<8x32xf32>
    %984 = arith.mulf %973, %983 : vector<8x32xf32>
    %985 = arith.addf %982, %984 : vector<8x32xf32>
    %986 = math.tanh %985 : vector<8x32xf32>
    %cst_279 = arith.constant 1.000000e+00 : f32
    %987 = vector.broadcast %cst_279 : f32 to vector<8x32xf32>
    %988 = arith.subf %987, %981 : vector<8x32xf32>
    %989 = arith.mulf %988, %986 : vector<8x32xf32>
    %990 = arith.mulf %981, %944 : vector<8x32xf32>
    %991 = arith.addf %989, %990 : vector<8x32xf32>
    %992 = arith.truncf %991 : vector<8x32xf32> to vector<8x32xbf16>
    %cst_280 = arith.constant dense<0.000000e+00> : vector<8x256xf32>
    %993 = tpu.matmul %992, %769, %cst_280 {dimension_numbers = #tpu.dot_dimension_numbers<[1], [0], [0], [1], [0, 0, 1, 1], [], []>} : vector<8x32xbf16>, vector<32x256xbf16>, vector<8x256xf32> -> vector<8x256xf32>
    %994 = arith.addf %993, %772 : vector<8x256xf32>
    %cst_281 = arith.constant dense<0xFF800000> : vector<8xf32>
    %995 = vector.multi_reduction <maximumf>, %994, %cst_281 [1] : vector<8x256xf32> to vector<8xf32>
    %996 = vector.shape_cast %995 : vector<8xf32> to vector<8x1xf32>
    %997 = vector.broadcast %996 : vector<8x1xf32> to vector<8x256xf32>
    %998 = arith.subf %994, %997 : vector<8x256xf32>
    %999 = math.exp %998 : vector<8x256xf32>
    %cst_282 = arith.constant dense<0.000000e+00> : vector<8xf32>
    %1000 = vector.multi_reduction <add>, %999, %cst_282 [1] : vector<8x256xf32> to vector<8xf32>
    %1001 = vector.shape_cast %1000 : vector<8xf32> to vector<8x1xf32>
    %1002 = tpu.reciprocal %1001 {approx = true} : vector<8x1xf32> -> vector<8x1xf32>
    %1003 = vector.broadcast %1002 : vector<8x1xf32> to vector<8x256xf32>
    %1004 = arith.mulf %999, %1003 : vector<8x256xf32>
    %c4_283 = arith.constant 4 : index
    %c0_284 = arith.constant 0 : index
    %c0_285 = arith.constant 0 : index
    %1005 = vector.load %arg31[%c4_283, %c0_284, %c0_285] : memref<7x8x256xf32, #tpu.memory_space<vmem>>, vector<1x8x256xf32>
    %1006 = vector.shape_cast %1005 : vector<1x8x256xf32> to vector<8x256xf32>
    %1007 = vector.shape_cast %1004 : vector<8x256xf32> to vector<1x8x256xf32>
    tpu.vector_store %arg31[%c4_283, %c0_284, %c0_285], %1007 {strides = array<i32>} : memref<7x8x256xf32, #tpu.memory_space<vmem>>, vector<1x8x256xf32>,
    %c5_286 = arith.constant 5 : index
    %c0_287 = arith.constant 0 : index
    %c0_288 = arith.constant 0 : index
    %1008 = vector.load %arg38[%c5_286, %c0_287, %c0_288] : memref<8x8x96xf32, #tpu.memory_space<vmem>>, vector<1x8x96xf32>
    %1009 = vector.shape_cast %1008 : vector<1x8x96xf32> to vector<8x96xf32>
    %1010 = arith.truncf %991 : vector<8x32xf32> to vector<8x32xbf16>
    %cst_289 = arith.constant dense<0.000000e+00> : vector<8x96xf32>
    %1011 = tpu.matmul %1010, %765, %cst_289 {dimension_numbers = #tpu.dot_dimension_numbers<[1], [0], [0], [1], [0, 0, 1, 1], [], []>} : vector<8x32xbf16>, vector<32x96xbf16>, vector<8x96xf32> -> vector<8x96xf32>
    %1012 = arith.addf %1011, %768 : vector<8x96xf32>
    %1013 = vector.extract_strided_slice %1009 {offsets = [0, 0], sizes = [8, 32], strides = [1, 1]} : vector<8x96xf32> to vector<8x32xf32>
    %1014 = vector.extract_strided_slice %1012 {offsets = [0, 0], sizes = [8, 32], strides = [1, 1]} : vector<8x96xf32> to vector<8x32xf32>
    %1015 = arith.addf %1013, %1014 : vector<8x32xf32>
    %1016 = arith.negf %1015 : vector<8x32xf32>
    %1017 = math.exp %1016 : vector<8x32xf32>
    %cst_290 = arith.constant 1.000000e+00 : f32
    %1018 = vector.broadcast %cst_290 : f32 to vector<8x32xf32>
    %1019 = arith.addf %1018, %1017 : vector<8x32xf32>
    %1020 = arith.divf %1018, %1019 : vector<8x32xf32>
    %1021 = vector.extract_strided_slice %1009 {offsets = [0, 32], sizes = [8, 32], strides = [1, 1]} : vector<8x96xf32> to vector<8x32xf32>
    %1022 = vector.extract_strided_slice %1012 {offsets = [0, 32], sizes = [8, 32], strides = [1, 1]} : vector<8x96xf32> to vector<8x32xf32>
    %1023 = arith.addf %1021, %1022 : vector<8x32xf32>
    %1024 = arith.negf %1023 : vector<8x32xf32>
    %1025 = math.exp %1024 : vector<8x32xf32>
    %cst_291 = arith.constant 1.000000e+00 : f32
    %1026 = vector.broadcast %cst_291 : f32 to vector<8x32xf32>
    %1027 = arith.addf %1026, %1025 : vector<8x32xf32>
    %1028 = arith.divf %1026, %1027 : vector<8x32xf32>
    %1029 = vector.extract_strided_slice %1009 {offsets = [0, 64], sizes = [8, 32], strides = [1, 1]} : vector<8x96xf32> to vector<8x32xf32>
    %1030 = vector.extract_strided_slice %1012 {offsets = [0, 64], sizes = [8, 32], strides = [1, 1]} : vector<8x96xf32> to vector<8x32xf32>
    %1031 = arith.mulf %1020, %1030 : vector<8x32xf32>
    %1032 = arith.addf %1029, %1031 : vector<8x32xf32>
    %1033 = math.tanh %1032 : vector<8x32xf32>
    %cst_292 = arith.constant 1.000000e+00 : f32
    %1034 = vector.broadcast %cst_292 : f32 to vector<8x32xf32>
    %1035 = arith.subf %1034, %1028 : vector<8x32xf32>
    %1036 = arith.mulf %1035, %1033 : vector<8x32xf32>
    %1037 = arith.mulf %1028, %991 : vector<8x32xf32>
    %1038 = arith.addf %1036, %1037 : vector<8x32xf32>
    %1039 = arith.truncf %1038 : vector<8x32xf32> to vector<8x32xbf16>
    %cst_293 = arith.constant dense<0.000000e+00> : vector<8x256xf32>
    %1040 = tpu.matmul %1039, %769, %cst_293 {dimension_numbers = #tpu.dot_dimension_numbers<[1], [0], [0], [1], [0, 0, 1, 1], [], []>} : vector<8x32xbf16>, vector<32x256xbf16>, vector<8x256xf32> -> vector<8x256xf32>
    %1041 = arith.addf %1040, %772 : vector<8x256xf32>
    %cst_294 = arith.constant dense<0xFF800000> : vector<8xf32>
    %1042 = vector.multi_reduction <maximumf>, %1041, %cst_294 [1] : vector<8x256xf32> to vector<8xf32>
    %1043 = vector.shape_cast %1042 : vector<8xf32> to vector<8x1xf32>
    %1044 = vector.broadcast %1043 : vector<8x1xf32> to vector<8x256xf32>
    %1045 = arith.subf %1041, %1044 : vector<8x256xf32>
    %1046 = math.exp %1045 : vector<8x256xf32>
    %cst_295 = arith.constant dense<0.000000e+00> : vector<8xf32>
    %1047 = vector.multi_reduction <add>, %1046, %cst_295 [1] : vector<8x256xf32> to vector<8xf32>
    %1048 = vector.shape_cast %1047 : vector<8xf32> to vector<8x1xf32>
    %1049 = tpu.reciprocal %1048 {approx = true} : vector<8x1xf32> -> vector<8x1xf32>
    %1050 = vector.broadcast %1049 : vector<8x1xf32> to vector<8x256xf32>
    %1051 = arith.mulf %1046, %1050 : vector<8x256xf32>
    %c5_296 = arith.constant 5 : index
    %c0_297 = arith.constant 0 : index
    %c0_298 = arith.constant 0 : index
    %1052 = vector.load %arg31[%c5_296, %c0_297, %c0_298] : memref<7x8x256xf32, #tpu.memory_space<vmem>>, vector<1x8x256xf32>
    %1053 = vector.shape_cast %1052 : vector<1x8x256xf32> to vector<8x256xf32>
    %1054 = vector.shape_cast %1051 : vector<8x256xf32> to vector<1x8x256xf32>
    tpu.vector_store %arg31[%c5_296, %c0_297, %c0_298], %1054 {strides = array<i32>} : memref<7x8x256xf32, #tpu.memory_space<vmem>>, vector<1x8x256xf32>,
    %c6_299 = arith.constant 6 : index
    %c0_300 = arith.constant 0 : index
    %c0_301 = arith.constant 0 : index
    %1055 = vector.load %arg38[%c6_299, %c0_300, %c0_301] : memref<8x8x96xf32, #tpu.memory_space<vmem>>, vector<1x8x96xf32>
    %1056 = vector.shape_cast %1055 : vector<1x8x96xf32> to vector<8x96xf32>
    %1057 = arith.truncf %1038 : vector<8x32xf32> to vector<8x32xbf16>
    %cst_302 = arith.constant dense<0.000000e+00> : vector<8x96xf32>
    %1058 = tpu.matmul %1057, %765, %cst_302 {dimension_numbers = #tpu.dot_dimension_numbers<[1], [0], [0], [1], [0, 0, 1, 1], [], []>} : vector<8x32xbf16>, vector<32x96xbf16>, vector<8x96xf32> -> vector<8x96xf32>
    %1059 = arith.addf %1058, %768 : vector<8x96xf32>
    %1060 = vector.extract_strided_slice %1056 {offsets = [0, 0], sizes = [8, 32], strides = [1, 1]} : vector<8x96xf32> to vector<8x32xf32>
    %1061 = vector.extract_strided_slice %1059 {offsets = [0, 0], sizes = [8, 32], strides = [1, 1]} : vector<8x96xf32> to vector<8x32xf32>
    %1062 = arith.addf %1060, %1061 : vector<8x32xf32>
    %1063 = arith.negf %1062 : vector<8x32xf32>
    %1064 = math.exp %1063 : vector<8x32xf32>
    %cst_303 = arith.constant 1.000000e+00 : f32
    %1065 = vector.broadcast %cst_303 : f32 to vector<8x32xf32>
    %1066 = arith.addf %1065, %1064 : vector<8x32xf32>
    %1067 = arith.divf %1065, %1066 : vector<8x32xf32>
    %1068 = vector.extract_strided_slice %1056 {offsets = [0, 32], sizes = [8, 32], strides = [1, 1]} : vector<8x96xf32> to vector<8x32xf32>
    %1069 = vector.extract_strided_slice %1059 {offsets = [0, 32], sizes = [8, 32], strides = [1, 1]} : vector<8x96xf32> to vector<8x32xf32>
    %1070 = arith.addf %1068, %1069 : vector<8x32xf32>
    %1071 = arith.negf %1070 : vector<8x32xf32>
    %1072 = math.exp %1071 : vector<8x32xf32>
    %cst_304 = arith.constant 1.000000e+00 : f32
    %1073 = vector.broadcast %cst_304 : f32 to vector<8x32xf32>
    %1074 = arith.addf %1073, %1072 : vector<8x32xf32>
    %1075 = arith.divf %1073, %1074 : vector<8x32xf32>
    %1076 = vector.extract_strided_slice %1056 {offsets = [0, 64], sizes = [8, 32], strides = [1, 1]} : vector<8x96xf32> to vector<8x32xf32>
    %1077 = vector.extract_strided_slice %1059 {offsets = [0, 64], sizes = [8, 32], strides = [1, 1]} : vector<8x96xf32> to vector<8x32xf32>
    %1078 = arith.mulf %1067, %1077 : vector<8x32xf32>
    %1079 = arith.addf %1076, %1078 : vector<8x32xf32>
    %1080 = math.tanh %1079 : vector<8x32xf32>
    %cst_305 = arith.constant 1.000000e+00 : f32
    %1081 = vector.broadcast %cst_305 : f32 to vector<8x32xf32>
    %1082 = arith.subf %1081, %1075 : vector<8x32xf32>
    %1083 = arith.mulf %1082, %1080 : vector<8x32xf32>
    %1084 = arith.mulf %1075, %1038 : vector<8x32xf32>
    %1085 = arith.addf %1083, %1084 : vector<8x32xf32>
    %1086 = arith.truncf %1085 : vector<8x32xf32> to vector<8x32xbf16>
    %cst_306 = arith.constant dense<0.000000e+00> : vector<8x256xf32>
    %1087 = tpu.matmul %1086, %769, %cst_306 {dimension_numbers = #tpu.dot_dimension_numbers<[1], [0], [0], [1], [0, 0, 1, 1], [], []>} : vector<8x32xbf16>, vector<32x256xbf16>, vector<8x256xf32> -> vector<8x256xf32>
    %1088 = arith.addf %1087, %772 : vector<8x256xf32>
    %cst_307 = arith.constant dense<0xFF800000> : vector<8xf32>
    %1089 = vector.multi_reduction <maximumf>, %1088, %cst_307 [1] : vector<8x256xf32> to vector<8xf32>
    %1090 = vector.shape_cast %1089 : vector<8xf32> to vector<8x1xf32>
    %1091 = vector.broadcast %1090 : vector<8x1xf32> to vector<8x256xf32>
    %1092 = arith.subf %1088, %1091 : vector<8x256xf32>
    %1093 = math.exp %1092 : vector<8x256xf32>
    %cst_308 = arith.constant dense<0.000000e+00> : vector<8xf32>
    %1094 = vector.multi_reduction <add>, %1093, %cst_308 [1] : vector<8x256xf32> to vector<8xf32>
    %1095 = vector.shape_cast %1094 : vector<8xf32> to vector<8x1xf32>
    %1096 = tpu.reciprocal %1095 {approx = true} : vector<8x1xf32> -> vector<8x1xf32>
    %1097 = vector.broadcast %1096 : vector<8x1xf32> to vector<8x256xf32>
    %1098 = arith.mulf %1093, %1097 : vector<8x256xf32>
    %c6_309 = arith.constant 6 : index
    %c0_310 = arith.constant 0 : index
    %c0_311 = arith.constant 0 : index
    %1099 = vector.load %arg31[%c6_309, %c0_310, %c0_311] : memref<7x8x256xf32, #tpu.memory_space<vmem>>, vector<1x8x256xf32>
    %1100 = vector.shape_cast %1099 : vector<1x8x256xf32> to vector<8x256xf32>
    %1101 = vector.shape_cast %1098 : vector<8x256xf32> to vector<1x8x256xf32>
    tpu.vector_store %arg31[%c6_309, %c0_310, %c0_311], %1101 {strides = array<i32>} : memref<7x8x256xf32, #tpu.memory_space<vmem>>, vector<1x8x256xf32>,
    return
  }
}

</mosaic_0001>

<bundles_post_ra>
// kernel: tpu_custom_call.1
= control target key start
LH: loop header
LB: loop body
LE: loop exit
PB: predicated region body
PF: predicated region fallthrough
CT: control target
= control target key end

     0   :  { %s5122_s6 = smov 1   ;;  %s5123_s10 = smov 2   ;;  %s6061_s0 = inlined_call_operand.smem [shape: u32[36], index: -1, kind: input, shape index: {}] }
   0x1   :  { %s5201_s5 = sld [smem:[%s6061_s0]]   ;;  %s5124_s14 = smov 3  }
   0x2   :  { %s5206_s9 = sld [smem:[%s6061_s0 + %s5122_s6]]   ;;  %s5125_s18 = smov 4  }
   0x3   :  { %s5211_s13 = sld [smem:[%s6061_s0 + %s5123_s10]]   ;;  %s5126_s22 = smov 5  }
   0x4   :  { %s5216_s17 = sld [smem:[%s6061_s0 + %s5124_s14]]   ;;  %s5127_s26 = smov 6  }
   0x5   :  { %s5221_s21 = sld [smem:[%s6061_s0 + %s5125_s18]]   ;;  %s5128_s30 = smov 7  }
   0x6   :  { %s5226_s25 = sld [smem:[%s6061_s0 + %s5126_s22]]   ;;  %s5129_s4 = smov 8  }
   0x7   :  { %6071 = sst [smem:[#allocation55_spill]] %s5201_s5  ;;  %s5130_s10 = smov 9  }
   0x8   :  { %s5231_s29 = sld [smem:[%s6061_s0 + %s5127_s26]]   ;;  %s5131_s15 = smov 10  }
   0x9   :  { %6072 = sst [smem:[#allocation56_spill]] %s5211_s13  ;;  %s5132_s20 = smov 11  }
   0xa   :  { %6073 = sst [smem:[#allocation57_spill]] %s5216_s17  ;;  %s5133_s26 = smov 12  }
   0xb   :  { %s5236_s3 = sld [smem:[%s6061_s0 + %s5128_s30]]   ;;  %s5134_s1 = smov 13  }
   0xc   :  { %s5241_s8 = sld [smem:[%s6061_s0 + %s5129_s4]]   ;;  %s5135_s7 = smov 14  }
   0xd   :  { %s5246_s14 = sld [smem:[%s6061_s0 + %s5130_s10]]   ;;  %s5137_s22 = smov 16  }
   0xe   :  { %s5251_s19 = sld [smem:[%s6061_s0 + %s5131_s15]]   ;;  %s5136_s15 = smov 15  }
   0xf   :  { %s5256_s24 = sld [smem:[%s6061_s0 + %s5132_s20]]   ;;  %s5138_s28 = smov 17  }
  0x10   :  { %s5261_s30 = sld [smem:[%s6061_s0 + %s5133_s26]]  }
  0x11   :  { %6074 = sst [smem:[#allocation58_spill]] %s5236_s3 }
  0x12   :  { %s5266_s6 = sld [smem:[%s6061_s0 + %s5134_s1]]  }
  0x13   :  { %s5271_s12 = sld [smem:[%s6061_s0 + %s5135_s7]]   ;;  %s5139_s7 = smov 18  }
  0x14   :  { %s5276_s20 = sld [smem:[%s6061_s0 + %s5136_s15]]   ;;  %s5140_s15 = smov 19  }
  0x15   :  { %s5281_s27 = sld [smem:[%s6061_s0 + %s5137_s22]]   ;;  %s5141_s22 = smov 20  }
  0x16   :  { %s5286_s4 = sld [smem:[%s6061_s0 + %s5138_s28]]   ;;  %s5142_s28 = smov 21  }
  0x17   :  { %s5291_s3 = sld [smem:[%s6061_s0 + %s5139_s7]]   ;;  %s5143_s7 = smov 22  }
  0x18   :  { %s5296_s17 = sld [smem:[%s6061_s0 + %s5140_s15]]   ;;  %s5144_s15 = smov 23  }
  0x19   :  { %6075 = sst [smem:[#allocation59_spill]] %s5271_s12 }
  0x1a   :  { %s5301_s13 = sld [smem:[%s6061_s0 + %s5141_s22]]   ;;  %s5145_s22 = smov 24  }
  0x1b   :  { %6076 = sst [smem:[#allocation60_spill]] %s5281_s27 }
  0x1c   :  { %s5306_s5 = sld [smem:[%s6061_s0 + %s5142_s28]]   ;;  %s5146_s28 = smov 25  }
  0x1d   :  { %6077 = sst [smem:[#allocation61_spill]] %s5291_s3 }
  0x1e   :  { %6078 = sst [smem:[#allocation62_spill]] %s5296_s17 }
  0x1f   :  { %s5311_s3 = sld [smem:[%s6061_s0 + %s5143_s7]]   ;;  %s5147_s7 = smov 26  }
  0x20   :  { %s5316_s17 = sld [smem:[%s6061_s0 + %s5144_s15]]   ;;  %s5148_s15 = smov 27  }
  0x21   :  { %s5321_s27 = sld [smem:[%s6061_s0 + %s5145_s22]]   ;;  %s5149_s22 = smov 28  }
  0x22   :  { %6079 = sst [smem:[#allocation63_spill]] %s5306_s5 }
  0x23   :  { %s5326_s5 = sld [smem:[%s6061_s0 + %s5146_s28]]   ;;  %s5150_s28 = smov 29  }
  0x24   :  { %s5336_s12 = sld [smem:[%s6061_s0 + %s5148_s15]]   ;;  %s5152_s15 = smov 31  }
  0x25   :  { %6080 = sst [smem:[#allocation64_spill]] %s5311_s3 }
  0x26   :  { %s5331_s3 = sld [smem:[%s6061_s0 + %s5147_s7]]   ;;  %s5151_s7 = smov 30  }
  0x27   :  { %6081 = sst [smem:[#allocation65_spill]] %s5321_s27 }
  0x28   :  { %s5341_s27 = sld [smem:[%s6061_s0 + %s5149_s22]]   ;;  %s5153_s22 = smov 32  }
  0x29   :  { %6082 = sst [smem:[#allocation66_spill]] %s5326_s5 }
  0x2a   :  { %6084 = sst [smem:[#allocation68_spill]] %s5336_s12 }
  0x2b   :  { %s5346_s5 = sld [smem:[%s6061_s0 + %s5150_s28]]   ;;  %s5154_s28 = smov 33  }
  0x2c   :  { %6083 = sst [smem:[#allocation67_spill]] %s5331_s3 }
  0x2d   :  { %s5351_s3 = sld [smem:[%s6061_s0 + %s5151_s7]]   ;;  %s5155_s7 = smov 34  }
  0x2e   :  { %6085 = sst [smem:[#allocation69_spill]] %s5341_s27 }
  0x2f   :  { %s5356_s12 = sld [smem:[%s6061_s0 + %s5152_s15]]   ;;  %s5156_s15 = smov 35  }
  0x30   :  { %s5361_s27 = sld [smem:[%s6061_s0 + %s5153_s22]]  }
  0x31   :  { %6086 = sst [smem:[#allocation70_spill]] %s5346_s5 }
  0x32   :  { %s5366_s5 = sld [smem:[%s6061_s0 + %s5154_s28]]  }
  0x33   :  { %6087 = sst [smem:[#allocation71_spill]] %s5351_s3 }
  0x34   :  { %s5371_s3 = sld [smem:[%s6061_s0 + %s5155_s7]]  }
  0x35   :  { %6088 = sst [smem:[#allocation72_spill]] %s5356_s12 }
  0x36   :  { %s5376_s12 = sld [smem:[%s6061_s0 + %s5156_s15]]  }
  0x37   :  { %77 = vsyncpa [#allocation6], 0 }
  0x38   :  { %78 = vsyncpa [#allocation9], 0 }
  0x39   :  { %79 = vsyncpa [#allocation12], 0 }
  0x3a   :  { %80 = vsyncpa [#allocation15], 0 }
  0x3b   :  { %81 = vsyncpa [#allocation18], 0 }
  0x3c   :  { %82 = vsyncpa [#allocation21], 0 }
  0x3d   :  { %83 = vsyncpa [#allocation24], 0 }
  0x3e   :  { %84 = vsyncpa [#allocation27], 0 }
  0x3f   :  { %85 = vsyncpa [#allocation30], 0 }
  0x40   :  { %86 = vsyncpa [#allocation33], 0 }
  0x41   :  { %87 = vsyncpa [#allocation7], 0 }
  0x42   :  { %88 = vsyncpa [#allocation37], 0 }
  0x43   :  { %89 = vsyncpa [#allocation40], 0  ;;  %s5157_s22 = smov [#allocation8]   ;;  %s5158_s26 = smov [#allocation11]  }
  0x44   :  { %s114_s23 = sshll.u32 %s5157_s22, 4  ;;  %s134_s28 = sshll.u32 %s5158_s26, 4  ;;  %s115_s23 = int_to_ptr.vmem [resolvable:$true] %s114_s23  ;;  %s135_s28 = int_to_ptr.vmem [resolvable:$true] %s134_s28 }
  0x45   :  { %s4624_s0 = scalar_lea.vmem %s115_s23, 128  ;;  %p4629_p1 = scmp.lt.s32.totalorder %s115_s23, %s115_s23 }
  0x46   :  { %p4625_p0 = scmp.ne.s32.totalorder %s115_s23, %s4624_s0  ;;  %p4630_p2 = scmp.lt.s32.totalorder %s4624_s0, %s4624_s0 }
  0x48   :  { %p4631_p3 = por %p4630_p2, %p4629_p1 }
  0x4a   :  { %p4632_p4 = pnand %p4631_p3, %p4625_p0 }
  0x4c   :  { %4635 = shalt.err (!%p4632_p4)
}
  0x4d   :  { %117 = dma.hbm_to_vmem [thread:$0]  %s5221_s21, 128, %s115_s23, [#allocation9]  }
  0x4e   :  { %s4644_s1 = scalar_lea.vmem %s135_s28, 16  ;;  %s4648_s2 = scalar_lea.vmem %s135_s28, 32 }
  0x4f   :  { %p4645_p5 = scmp.ne.s32.totalorder %s135_s28, %s4644_s1  ;;  %p4649_p6 = scmp.lt.s32.totalorder %s135_s28, %s135_s28 }
  0x50   :  { %p4650_p7 = scmp.lt.s32.totalorder %s4648_s2, %s4644_s1 }
  0x52   :  { %p4651_p8 = por %p4650_p7, %p4649_p6 }
  0x54   :  { %p4652_p9 = pnand %p4651_p8, %p4645_p5 }
  0x56   :  { %4655 = shalt.err (!%p4652_p9)
}
  0x57   :  { %137 = dma.hbm_to_vmem [thread:$0]  %s5231_s29, 16, %s135_s28, [#allocation12]  }
  0x58   :  { %s5159_s7 = smov [#allocation14]  }
  0x59   :  { %s158_s10 = sshll.u32 %s5159_s7, 4  ;;  %s159_s10 = int_to_ptr.vmem [resolvable:$true] %s158_s10 }
  0x5a   :  { %s4664_s11 = scalar_lea.vmem %s159_s10, 16  ;;  %s4668_s15 = scalar_lea.vmem %s159_s10, 32 }
  0x5b   :  { %p4665_p10 = scmp.ne.s32.totalorder %s159_s10, %s4664_s11  ;;  %p4669_p11 = scmp.lt.s32.totalorder %s159_s10, %s159_s10 }
  0x5c   :  { %p4670_p12 = scmp.lt.s32.totalorder %s4668_s15, %s4664_s11 }
  0x5e   :  { %p4671_p13 = por %p4670_p12, %p4669_p11 }
  0x60   :  { %p4672_p0 = pnand %p4671_p13, %p4665_p10 }
  0x62   :  { %4675 = shalt.err (!%p4672_p0)
}
  0x63   :  { %161 = dma.hbm_to_vmem [thread:$0]  %s5246_s14, 16, %s159_s10, [#allocation15]  }
  0x64   :  { %s5160_s21 = smov [#allocation17]   ;;  %s5161_s18 = smov [#allocation20]  }
  0x65   :  { %s177_s16 = sshll.u32 %s5160_s21, 4  ;;  %s202_s22 = sshll.u32 %s5161_s18, 4  ;;  %s178_s16 = int_to_ptr.vmem [resolvable:$true] %s177_s16  ;;  %s203_s22 = int_to_ptr.vmem [resolvable:$true] %s202_s22 }
  0x66   :  { %s4684_s23 = scalar_lea.vmem %s178_s16, 256  ;;  %p4689_p2 = scmp.lt.s32.totalorder %s178_s16, %s178_s16 }
  0x67   :  { %p4685_p1 = scmp.ne.s32.totalorder %s178_s16, %s4684_s23  ;;  %p4690_p3 = scmp.lt.s32.totalorder %s4684_s23, %s4684_s23 }
  0x69   :  { %p4691_p4 = por %p4690_p3, %p4689_p2 }
  0x6b   :  { %p4692_p5 = pnand %p4691_p4, %p4685_p1 }
  0x6d   :  { %4695 = shalt.err (!%p4692_p5)
}
  0x6e   :  { %s5162_s29 = smov 64   ;;  %s5163_s26 = smov 4  }
  0x6f   :  { %183 = dma.hbm_to_vmem [thread:$0]  %s5256_s24, 256, %s178_s16, [#allocation18], %s5162_s29, %s5162_s29, %s5163_s26  }
  0x70   :  { %s4704_s14 = scalar_lea.vmem %s203_s22, 16  ;;  %s4708_s28 = scalar_lea.vmem %s203_s22, 32 }
  0x71   :  { %p4705_p6 = scmp.ne.s32.totalorder %s203_s22, %s4704_s14  ;;  %p4709_p7 = scmp.lt.s32.totalorder %s203_s22, %s203_s22 }
  0x72   :  { %p4710_p8 = scmp.lt.s32.totalorder %s4708_s28, %s4704_s14 }
  0x74   :  { %p4711_p9 = por %p4710_p8, %p4709_p7 }
  0x76   :  { %p4712_p10 = pnand %p4711_p9, %p4705_p6 }
  0x78   :  { %4715 = shalt.err (!%p4712_p10)
}
  0x79   :  { %205 = dma.hbm_to_vmem [thread:$0]  %s5266_s6, 16, %s203_s22, [#allocation21]  }
  0x7a   :  { %s5164_s0 = smov [#allocation23]   ;;  %s5165_s2 = smov [#allocation26]  }
  0x7b   :  { %s223_s1 = sshll.u32 %s5164_s0, 4  ;;  %s246_s7 = sshll.u32 %s5165_s2, 4  ;;  %s224_s1 = int_to_ptr.vmem [resolvable:$true] %s223_s1  ;;  %s247_s7 = int_to_ptr.vmem [resolvable:$true] %s246_s7 }
  0x7c   :  { %s4724_s10 = scalar_lea.vmem %s224_s1, 128  ;;  %p4729_p12 = scmp.lt.s32.totalorder %s224_s1, %s224_s1 }
  0x7d   :  { %p4725_p11 = scmp.ne.s32.totalorder %s224_s1, %s4724_s10  ;;  %p4730_p13 = scmp.lt.s32.totalorder %s4724_s10, %s4724_s10 }
  0x7f   :  { %p4731_p0 = por %p4730_p13, %p4729_p12 }
  0x81   :  { %p4732_p1 = pnand %p4731_p0, %p4725_p11 }
  0x83   :  { %4735 = shalt.err (!%p4732_p1)
}
  0x84   :  { %229 = dma.hbm_to_vmem [thread:$0]  %s5276_s20, 128, %s224_s1, [#allocation24], %s5162_s29, %s5162_s29, %s5163_s26  }
  0x85   :  { %s4744_s24 = scalar_lea.vmem %s247_s7, 16  ;;  %s4748_s6 = scalar_lea.vmem %s247_s7, 32 }
  0x86   :  { %p4745_p2 = scmp.ne.s32.totalorder %s247_s7, %s4744_s24  ;;  %p4749_p3 = scmp.lt.s32.totalorder %s247_s7, %s247_s7 }
  0x87   :  { %p4750_p4 = scmp.lt.s32.totalorder %s4748_s6, %s4744_s24 }
  0x89   :  { %p4751_p5 = por %p4750_p4, %p4749_p3 }
  0x8b   :  { %p4752_p6 = pnand %p4751_p5, %p4745_p2 }
  0x8d   :  { %4755 = shalt.err (!%p4752_p6)
}
  0x8e   :  { %249 = dma.hbm_to_vmem [thread:$0]  %s5286_s4, 16, %s247_s7, [#allocation27]  }
  0x8f   :  { %s5166_s11 = smov [#allocation29]   ;;  %s5167_s21 = smov [#allocation32]  }
  0x90   :  { %s270_s15 = sshll.u32 %s5166_s11, 4  ;;  %s292_s16 = sshll.u32 %s5167_s21, 4  ;;  %s271_s15 = int_to_ptr.vmem [resolvable:$true] %s270_s15  ;;  %s293_s16 = int_to_ptr.vmem [resolvable:$true] %s292_s16 }
  0x91   :  { %s4764_s18 = scalar_lea.vmem %s271_s15, 32  ;;  %p4769_p8 = scmp.lt.s32.totalorder %s271_s15, %s271_s15 }
  0x92   :  { %p4765_p7 = scmp.ne.s32.totalorder %s271_s15, %s4764_s18  ;;  %p4770_p9 = scmp.lt.s32.totalorder %s4764_s18, %s4764_s18 }
  0x94   :  { %p4771_p10 = por %p4770_p9, %p4769_p8 }
  0x96   :  { %p4772_p11 = pnand %p4771_p10, %p4765_p7 }
  0x98   :  { %4775 = shalt.err (!%p4772_p11)
}
  0x99   :  { %273 = dma.hbm_to_vmem [thread:$0]  %s5301_s13, 32, %s271_s15, [#allocation30]  }
  0x9a   :  { %s4784_s20 = scalar_lea.vmem %s293_s16, 16  ;;  %s4788_s22 = scalar_lea.vmem %s293_s16, 32 }
  0x9b   :  { %p4785_p12 = scmp.ne.s32.totalorder %s293_s16, %s4784_s20  ;;  %p4789_p13 = scmp.lt.s32.totalorder %s293_s16, %s293_s16 }
  0x9c   :  { %p4790_p0 = scmp.lt.s32.totalorder %s4788_s22, %s4784_s20 }
  0x9e   :  { %p4791_p1 = por %p4790_p0, %p4789_p13 }
  0xa0   :  { %p4792_p2 = pnand %p4791_p1, %p4785_p12 }
  0xa2   :  { %4795 = shalt.err (!%p4792_p2)
}
  0xa3   :  { %295 = dma.hbm_to_vmem [thread:$0]  %s5316_s17, 16, %s293_s16, [#allocation33]  }
  0xa4   :  { %s5168_s4 = smov [#allocation5]  }
  0xa5   :  { %s97_s23 = sshll.u32 %s5168_s4, 4  ;;  %s98_s23 = int_to_ptr.vmem [resolvable:$true] %s97_s23 }
  0xa6   :  { %s4804_s14 = scalar_lea.vmem %s98_s23, 1024  ;;  %p4809_p4 = scmp.lt.s32.totalorder %s98_s23, %s98_s23 }
  0xa7   :  { %p4805_p3 = scmp.ne.s32.totalorder %s98_s23, %s4804_s14  ;;  %p4810_p5 = scmp.lt.s32.totalorder %s4804_s14, %s4804_s14 }
  0xa9   :  { %p4811_p6 = por %p4810_p5, %p4809_p4 }
  0xab   :  { %p4812_p7 = pnand %p4811_p6, %p4805_p3 }
  0xad   :  { %4815 = shalt.err (!%p4812_p7)
}
  0xae   :  { %s5169_s13 = smov 128   ;;  %s5170_s28 = smov 8  }
  0xaf   :  { %103 = dma.hbm_to_vmem [thread:$0]  %s5206_s9, 1024, %s98_s23, [#allocation6], %s5169_s13, %s5169_s13, %s5170_s28  }
  0xb0   :  { %s5171_s0 = smov [#allocation10]   ;;  %s5172_s2 = smov [#allocation13]  }
  0xb1   :  { %s124_s1 = sshll.u32 %s5171_s0, 4  ;;  %s145_s7 = sshll.u32 %s5172_s2, 4  ;;  %s125_s1 = int_to_ptr.vmem [resolvable:$true] %s124_s1  ;;  %s146_s7 = int_to_ptr.vmem [resolvable:$true] %s145_s7 }
  0xb2   :  { %s4824_s17 = scalar_lea.vmem %s125_s1, 16  ;;  %s4828_s10 = scalar_lea.vmem %s125_s1, 32 }
  0xb3   :  { %p4825_p8 = scmp.ne.s32.totalorder %s125_s1, %s4824_s17  ;;  %p4829_p9 = scmp.lt.s32.totalorder %s125_s1, %s125_s1 }
  0xb4   :  { %p4830_p10 = scmp.lt.s32.totalorder %s4828_s10, %s4824_s17 }
  0xb6   :  { %p4831_p11 = por %p4830_p10, %p4829_p9 }
  0xb8   :  { %p4832_p12 = pnand %p4831_p11, %p4825_p8 }
  0xba   :  { %4835 = shalt.err (!%p4832_p12)
}
  0xbb   :  { %127 = dma.hbm_to_vmem [thread:$0]  %s5226_s25, 16, %s125_s1, [#allocation9]  }
  0xbc   :  { %s4844_s24 = scalar_lea.vmem %s146_s7, 256  ;;  %p4849_p0 = scmp.lt.s32.totalorder %s146_s7, %s146_s7 }
  0xbd   :  { %p4845_p13 = scmp.ne.s32.totalorder %s146_s7, %s4844_s24  ;;  %p4850_p1 = scmp.lt.s32.totalorder %s4844_s24, %s4844_s24 }
  0xbf   :  { %p4851_p2 = por %p4850_p1, %p4849_p0 }
  0xc1   :  { %p4852_p3 = pnand %p4851_p2, %p4845_p13 }
  0xc3   :  { %4855 = shalt.err (!%p4852_p3)
}
  0xc4   :  { %151 = dma.hbm_to_vmem [thread:$0]  %s5241_s8, 256, %s146_s7, [#allocation12], %s5162_s29, %s5162_s29, %s5163_s26  }
  0xc5   :  { %s5173_s9 = smov [#allocation16]   ;;  %s5174_s11 = smov [#allocation19]  }
  0xc6   :  { %s168_s6 = sshll.u32 %s5173_s9, 4  ;;  %s189_s15 = sshll.u32 %s5174_s11, 4  ;;  %s169_s6 = int_to_ptr.vmem [resolvable:$true] %s168_s6  ;;  %s190_s15 = int_to_ptr.vmem [resolvable:$true] %s189_s15 }
  0xc7   :  { %s4864_s21 = scalar_lea.vmem %s169_s6, 16  ;;  %s4868_s25 = scalar_lea.vmem %s169_s6, 32 }
  0xc8   :  { %p4865_p4 = scmp.ne.s32.totalorder %s169_s6, %s4864_s21  ;;  %p4869_p5 = scmp.lt.s32.totalorder %s169_s6, %s169_s6 }
  0xc9   :  { %p4870_p6 = scmp.lt.s32.totalorder %s4868_s25, %s4864_s21 }
  0xcb   :  { %p4871_p7 = por %p4870_p6, %p4869_p5 }
  0xcd   :  { %p4872_p8 = pnand %p4871_p7, %p4865_p4 }
  0xcf   :  { %4875 = shalt.err (!%p4872_p8)
}
  0xd0   :  { %171 = dma.hbm_to_vmem [thread:$0]  %s5251_s19, 16, %s169_s6, [#allocation15]  }
  0xd1   :  { %s4884_s16 = scalar_lea.vmem %s190_s15, 256  ;;  %p4889_p10 = scmp.lt.s32.totalorder %s190_s15, %s190_s15 }
  0xd2   :  { %p4885_p9 = scmp.ne.s32.totalorder %s190_s15, %s4884_s16  ;;  %p4890_p11 = scmp.lt.s32.totalorder %s4884_s16, %s4884_s16 }
  0xd4   :  { %p4891_p12 = por %p4890_p11, %p4889_p10 }
  0xd6   :  { %p4892_p13 = pnand %p4891_p12, %p4885_p9 }
  0xd8   :  { %4895 = shalt.err (!%p4892_p13)
}
  0xd9   :  { %195 = dma.hbm_to_vmem [thread:$0]  %s5261_s30, 256, %s190_s15, [#allocation18], %s5162_s29, %s5162_s29, %s5163_s26  }
  0xda   :  { %s5175_s8 = smov [#allocation22]   ;;  %s5176_s20 = smov [#allocation25]  }
  0xdb   :  { %s211_s18 = sshll.u32 %s5175_s8, 4  ;;  %s236_s22 = sshll.u32 %s5176_s20, 4  ;;  %s212_s18 = int_to_ptr.vmem [resolvable:$true] %s211_s18  ;;  %s237_s22 = int_to_ptr.vmem [resolvable:$true] %s236_s22 }
  0xdc   :  { %s4904_s4 = scalar_lea.vmem %s212_s18, 256  ;;  %p4909_p1 = scmp.lt.s32.totalorder %s212_s18, %s212_s18 }
  0xdd   :  { %p4905_p0 = scmp.ne.s32.totalorder %s212_s18, %s4904_s4  ;;  %p4910_p2 = scmp.lt.s32.totalorder %s4904_s4, %s4904_s4 }
  0xdf   :  { %p4911_p3 = por %p4910_p2, %p4909_p1 }
  0xe1   :  { %p4912_p4 = pnand %p4911_p3, %p4905_p0 }
  0xe3   :  { %4915 = shalt.err (!%p4912_p4)
}
  0xe4   :  { %s6089_s19 = sld [smem:[#allocation59_spill]]  ;;  %s4924_s23 = scalar_lea.vmem %s237_s22, 16 }
  0xe5   :  { %p4925_p5 = scmp.ne.s32.totalorder %s237_s22, %s4924_s23  ;;  %s4928_s30 = scalar_lea.vmem %s237_s22, 32 }
  0xe6   :  { %p4929_p6 = scmp.lt.s32.totalorder %s237_s22, %s237_s22  ;;  %p4930_p7 = scmp.lt.s32.totalorder %s4928_s30, %s4924_s23 }
  0xe8   :  { %p4931_p8 = por %p4930_p7, %p4929_p6 }
  0xea   :  { %217 = dma.hbm_to_vmem [thread:$0]  %s6089_s19, 256, %s212_s18, [#allocation21], %s5162_s29, %s5162_s29, %s5163_s26  }
  0xeb   :  { %p4932_p9 = pnand %p4931_p8, %p4925_p5 }
  0xed   :  { %4935 = shalt.err (!%p4932_p9)
}
  0xee   :  { %s6090_s14 = sld [smem:[#allocation60_spill]]  ;;  %s5177_s13 = smov [#allocation28]  }
  0xef   :  { %s257_s28 = sshll.u32 %s5177_s13, 4  ;;  %s5178_s0 = smov [#allocation31]   ;;  %s258_s28 = int_to_ptr.vmem [resolvable:$true] %s257_s28 }
  0xf0   :  { %s282_s1 = sshll.u32 %s5178_s0, 4  ;;  %s4944_s2 = scalar_lea.vmem %s258_s28, 192  ;;  %s283_s1 = int_to_ptr.vmem [resolvable:$true] %s282_s1 }
  0xf1   :  { %p4945_p10 = scmp.ne.s32.totalorder %s258_s28, %s4944_s2  ;;  %p4949_p11 = scmp.lt.s32.totalorder %s258_s28, %s258_s28 }
  0xf2   :  { %p4950_p12 = scmp.lt.s32.totalorder %s4944_s2, %s4944_s2 }
  0xf4   :  { %239 = dma.hbm_to_vmem [thread:$0]  %s6090_s14, 16, %s237_s22, [#allocation24]  }
  0xf5   :  { %p4951_p13 = por %p4950_p12, %p4949_p11 }
  0xf7   :  { %p4952_p0 = pnand %p4951_p13, %p4945_p10 }
  0xf9   :  { %4955 = shalt.err (!%p4952_p0)
}
  0xfa   :  { %s6091_s7 = sld [smem:[#allocation62_spill]]  ;;  %s4964_s17 = scalar_lea.vmem %s283_s1, 16 }
  0xfb   :  { %p4965_p1 = scmp.ne.s32.totalorder %s283_s1, %s4964_s17  ;;  %s4968_s10 = scalar_lea.vmem %s283_s1, 32 }
  0xfc   :  { %p4969_p2 = scmp.lt.s32.totalorder %s283_s1, %s283_s1  ;;  %p4970_p3 = scmp.lt.s32.totalorder %s4968_s10, %s4964_s17 }
  0xfe   :  { %p4971_p4 = por %p4970_p3, %p4969_p2 }
 0x100   :  { %263 = dma.hbm_to_vmem [thread:$0]  %s6091_s7, 192, %s258_s28, [#allocation27], %s5162_s29, %s5162_s29, %s5163_s26  }
 0x101   :  { %p4972_p5 = pnand %p4971_p4, %p4965_p1 }
 0x103   :  { %4975 = shalt.err (!%p4972_p5)
}
 0x104   :  { %s6092_s24 = sld [smem:[#allocation64_spill]]  ;;  %s5179_s9 = smov [#allocation34]  }
 0x105   :  { %s305_s6 = sshll.u32 %s5179_s9, 4  ;;  %s306_s6 = int_to_ptr.vmem [resolvable:$true] %s305_s6 }
 0x106   :  { %s4984_s11 = scalar_lea.vmem %s306_s6, 192  ;;  %p4989_p7 = scmp.lt.s32.totalorder %s306_s6, %s306_s6 }
 0x107   :  { %p4985_p6 = scmp.ne.s32.totalorder %s306_s6, %s4984_s11  ;;  %p4990_p8 = scmp.lt.s32.totalorder %s4984_s11, %s4984_s11 }
 0x109   :  { %p4991_p9 = por %p4990_p8, %p4989_p7 }
 0x10a   :  { %285 = dma.hbm_to_vmem [thread:$0]  %s6092_s24, 16, %s283_s1, [#allocation30]  }
 0x10b   :  { %p4992_p10 = pnand %p4991_p9, %p4985_p6 }
 0x10d   :  { %4995 = shalt.err (!%p4992_p10)
}
 0x10e   :  { %s6093_s15 = sld [smem:[#allocation67_spill]] }
 0x114   :  { %311 = dma.hbm_to_vmem [thread:$0]  %s6093_s15, 192, %s306_s6, [#allocation33], %s5162_s29, %s5162_s29, %s5163_s26  }
 0x115   :  { %5096 = dma.done.wait [#allocation6], 1024  }
 0x116   :  { %5097 = vsyncadd [#allocation6], 4294966272 }
 0x117   :  { %5098 = dma.done.wait [#allocation9], 144  }
 0x118   :  { %5099 = vsyncadd [#allocation9], 4294967152 }
 0x119   :  { %5100 = dma.done.wait [#allocation12], 272  }
 0x11a   :  { %5101 = vsyncadd [#allocation12], 4294967024 }
 0x11b   :  { %5102 = dma.done.wait [#allocation15], 32  }
 0x11c   :  { %5103 = vsyncadd [#allocation15], 4294967264 }
 0x11d   :  { %5104 = dma.done.wait [#allocation18], 512  }
 0x11e   :  { %5105 = vsyncadd [#allocation18], 4294966784 }
 0x11f   :  { %5106 = dma.done.wait [#allocation21], 272  }
 0x120   :  { %5107 = vsyncadd [#allocation21], 4294967024 }
 0x121   :  { %5108 = dma.done.wait [#allocation24], 144  }
 0x122   :  { %5109 = vsyncadd [#allocation24], 4294967152 }
 0x123   :  { %5110 = dma.done.wait [#allocation27], 208  }
 0x124   :  { %5111 = vsyncadd [#allocation27], 4294967088 }
 0x125   :  { %5112 = dma.done.wait [#allocation30], 48  }
 0x126   :  { %5113 = vsyncadd [#allocation30], 4294967248 }
 0x127   :  { %5114 = dma.done.wait [#allocation33], 208  }
 0x128   :  { %5115 = vsyncadd [#allocation33], 4294967088  ;;  %s6094_s26 = sld [smem:[#allocation71_spill]]  ;;  %v5180_v0 = vmov 0   ;;  %v4399_v3 = vld [vmem:[#allocation19 + $0x8] sm:$0xff]   ;;  %vm413_vm0 = vcmask 261120  }
 0x129   :  { %4395 = vset.pattern.permute.xlu1 %v5180_v0  ;;  %4396 = vset.pattern.permute.xlu0 %v5180_v0  ;;  %s6095_s21 = sld [smem:[#allocation55_spill]]  ;;  %v500_v4 = vld [vmem:[#allocation5] sm:$0xff]  ;;  %v501_v5 = vld [vmem:[#allocation5 + $0x8] sm:$0xff]  ;;  %v502_v6 = vld [vmem:[#allocation5 + $0x10] sm:$0xff]  ;;  %v5181_v18 = vmov 0.0   ;;  %vm5182_vm1 = vmmov 0  }
 0x12a   :  { %4050 = vmatprep.subr.bf16.mxu0 %v4399_v3  ;;  %v5422_v7 = vpack.c.bf16 %v501_v5, %v500_v4  ;;  %v503_v8 = vld [vmem:[#allocation5 + $0x18] sm:$0xff]  ;;  %v5424_v9 = vld [vmem:[#allocation17 + $0x8] sm:$0xff]   ;;  %v4401_v11 = vld [vmem:[#allocation19] sm:$0xff]   ;;  %s6096_s25 = sld [smem:[#allocation69_spill]]  ;;  %vm491_vm2 = vcmask 785408   ;;  %s5183_s8 = smov 96  }
 0x12b   :  { %4051 = vmatpush3.bf16.msra.mxu0 %v4399_v3  ;;  %v5428_v10 = vpack.c.bf16 %v503_v8, %v502_v6  ;;  %v504_v17 = vld [vmem:[#allocation5 + $0x20] sm:$0xff]  ;;  %v505_v20 = vld [vmem:[#allocation5 + $0x28] sm:$0xff]  ;;  %v506_v22 = vld [vmem:[#allocation5 + $0x30] sm:$0xff]  ;;  %s6097_s16 = sld [smem:[#allocation56_spill]]  ;;  %s5184_s30 = smov 16  }
 0x12c   :  { %4066 = vmatprep.mubr.msk.bf16.mxu1 %vm413_vm0, %v5422_v7  ;;  %4052 = vmatprep.subr.bf16.mxu0 %v4401_v11  ;;  %v5436_v21 = vpack.c.bf16 %v505_v20, %v504_v17  ;;  %v507_v23 = vld [vmem:[#allocation5 + $0x38] sm:$0xff]  ;;  %v5438_v24 = vld [vmem:[#allocation17] sm:$0xff]   ;;  %s6098_s18 = sld [smem:[#allocation70_spill]]  ;;  %s5185_s13 = smov 112  }
 0x12d   :  { %v5447_v25 = vpack.c.bf16 %v507_v23, %v506_v22  ;;  %v5463_v31 = vld [vmem:[#allocation16] ss:$0 sm:$0xff]  ;;  %v5479_v51 = vld [vmem:[#allocation14] ss:$0 sm:$0xff]  ;;  %s6099_s20 = sld [smem:[#allocation68_spill]]  ;;  %s5186_s0 = smov 32  }
 0x12e   :  { %v4397_v1 = vld [vmem:[%s6094_s26 + $0x8] sm:$0xff]   ;;  %v4398_v2 = vld [vmem:[%s6094_s26] sm:$0xff]   ;;  %s6100_s22 = sld [smem:[#allocation57_spill]]  ;;  %s5188_s2 = smov [#allocation39]  }
 0x12f   :  { %4062 = vmatprep.subr.bf16.mxu1 %v4397_v1  ;;  %v378_v12 = vld [vmem:[%s6095_s21] sm:$0xff]  ;;  %v379_v13 = vld [vmem:[%s6095_s21 + $0x8] sm:$0xff]  ;;  %v380_v15 = vld [vmem:[%s6095_s21 + $0x10] sm:$0xff]  ;;  %4053 = vmatpush3.bf16.msra.mxu0 %v4401_v11  ;;  %s6101_s4 = sld [smem:[#allocation61_spill]]  ;;  %s3740_s7 = sshll.u32 %s5188_s2, 4  ;;  %s3741_s7 = int_to_ptr.vmem [resolvable:$true] %s3740_s7 }
 0x130   :  { %4063 = vmatpush3.bf16.msra.mxu1 %v4397_v1  ;;  %v386_v14 = vpack.c.bf16 %v379_v13, %v378_v12  ;;  %v381_v16 = vld [vmem:[%s6095_s21 + $0x18] sm:$0xff]  ;;  %v3824_v26 = vld [vmem:[%s6096_s25] ss:$0 sm:$0xff]  ;;  %s6102_s19 = sld [smem:[#allocation65_spill]] }
 0x131   :  { %4064 = vmatprep.subr.bf16.mxu1 %v4398_v2  ;;  %v387_v19 = vpack.c.bf16 %v381_v16, %v380_v15  ;;  %v5486_v63 = vld [vmem:[%s6097_s16] sm:$0xff]  ;;  %s6103_s23 = sld [smem:[#allocation66_spill]] }
 0x132   :  { %4054 = vmatprep.mubr.msk.bf16.mxu0 %vm413_vm0, %v386_v14  ;;  %vm810_vm3 = vcmp.gt.s32.totalorder %v5486_v63, 0  ;;  %vm902_vm4 = vcmp.gt.s32.totalorder %v5486_v63, 1  ;;  %vm994_vm5 = vcmp.gt.s32.totalorder %v5486_v63, 2  ;;  %vm1086_vm6 = vcmp.gt.s32.totalorder %v5486_v63, 3  ;;  %s6104_s14 = sld [smem:[#allocation58_spill]] }
 0x133   :  { %4055 = vmatmul.mubr.msk.bf16.vlgmr.msra.gmra.mxu0 %vm413_vm0, %v387_v19  ;;  %v3842_v1 = vsel %vm810_vm3, 1.0, %v5181_v18  ;;  %vm1178_vm7 = vcmp.gt.s32.totalorder %v5486_v63, 4  ;;  %vm1270_vm8 = vcmp.gt.s32.totalorder %v5486_v63, 5  ;;  %vm1362_vm9 = vcmp.gt.s32.totalorder %v5486_v63, 6  ;;  %s6105_s28 = sld [smem:[#allocation63_spill]] }
 0x134   :  { %4065 = vmatpush3.bf16.msra.mxu1 %v4398_v2  ;;  %815 = vperm.xlu1 %4395, %v3842_v1   ;;  %v819_v2 = vsub.f32 1.0, %v3842_v1 }
 0x135   :  { %4086 = vmatprep.subr.bf16.mxu1 %v5181_v18 }
 0x137   :  { %4067 = vmatmul.mubr.msk.bf16.vlgmr.msra.gmra.mxu1 %vm413_vm0, %v5428_v10 }
 0x138   :  { %4087 = vmatpush3.bf16.msra.mxu1 %v5424_v9  ;;  %4070 = vmatprep.mubr.msk.bf16.mxu1 %vm413_vm0, %v5436_v21 }
 0x139   :  { %4088 = vmatprep.subr.bf16.mxu1 %v5181_v18  ;;  %822 = vperm.xlu1 %4395, %v819_v2  }
 0x13c   :  { %4089 = vmatpush3.bf16.msra.mxu1 %v5438_v24 }
 0x13d   :  { %4094 = vmatprep.subr.bf16.mxu1 %v5181_v18 }
 0x13f   :  { %4071 = vmatmul.mubr.msk.bf16.gmra.mxu1 %vm413_vm0, %v5447_v25 }
 0x140   :  { %4090 = vmatprep.mubr.msk.bf16.mxu1 %vm5182_vm1, %v5181_v18 }
 0x147   :  { %4091 = vmatmul.mubr.bf16.vlgmr.msra.gmra.mxu1 %v5180_v0 }
 0x148   :  { %4095 = vmatpush3.bf16.msra.mxu1 %v5424_v9  ;;  %4098 = vmatprep.mubr.msk.bf16.mxu1 %vm5182_vm1, %v5181_v18 }
 0x149   :  { %4096 = vmatprep.subr.bf16.mxu1 %v5181_v18 }
 0x14c   :  { %4097 = vmatpush3.bf16.msra.mxu1 %v5438_v24 }
 0x14d   :  { %4110 = vmatprep.subr.bf16.mxu1 %v5181_v18 }
 0x1af   :  { %v816_v12 = vpop.permute.xlu1 %815 }
 0x1b4   :  { %v823_v17 = vpop.permute.xlu1 %822 }
 0x1b5   :  { %v825_v22 = vmul.f32 0.0, %v823_v17 }
 0x1f3   :  { %v4056_v30 = vpop.f32.mrf.mxu0 }
 0x1f4   :  { %v469_v33 = vadd.f32 %v4056_v30, %v5463_v31 }
 0x1f5   :  { %v460_v35 = vpop.f32.mrf.mxu0 }
 0x1f6   :  { %494 = vst.msk [vmem:[#allocation2 + $0x10] sm:$0xff] %vm491_vm2, %v469_v33  ;;  %v461_v37 = vadd.f32 %v5463_v31, %v460_v35 }
 0x1f7   :  { %v4068_v27 = vpop.f32.mrf.mxu1  ;;  %v4057_v39 = vpop.f32.mrf.mxu0 }
 0x1f8   :  { %v590_v28 = vadd.f32 %v4068_v27, %v3824_v26  ;;  %492 = vst.msk [vmem:[#allocation2] sm:$0xff] %vm491_vm2, %v461_v37  ;;  %v472_v41 = vadd.f32 %v4057_v39, %v5463_v31 }
 0x1f9   :  { %v581_v29 = vpop.f32.mrf.mxu1  ;;  %v463_v43 = vpop.f32.mrf.mxu0 }
 0x1fa   :  { %614 = vst.msk [vmem:[#allocation3 + $0x10] sm:$0xff] %vm491_vm2, %v590_v28  ;;  %v582_v32 = vadd.f32 %v3824_v26, %v581_v29  ;;  %495 = vst.msk [vmem:[#allocation2 + $0x18] sm:$0xff] %vm491_vm2, %v472_v41  ;;  %v464_v45 = vadd.f32 %v5463_v31, %v463_v43 }
 0x1fb   :  { %v4069_v34 = vpop.f32.mrf.mxu1 }
 0x1fc   :  { %612 = vst.msk [vmem:[#allocation3] sm:$0xff] %vm491_vm2, %v582_v32  ;;  %v593_v36 = vadd.f32 %v4069_v34, %v3824_v26  ;;  %493 = vst.msk [vmem:[#allocation2 + $0x8] sm:$0xff] %vm491_vm2, %v464_v45  ;;  %v3845_v34 = vsel %vm902_vm4, 1.0, %v5181_v18 }
 0x1fd   :  { %v584_v38 = vpop.f32.mrf.mxu1  ;;  %v911_v43 = vsub.f32 1.0, %v3845_v34 }
 0x1fe   :  { %615 = vst.msk [vmem:[#allocation3 + $0x18] sm:$0xff] %vm491_vm2, %v593_v36  ;;  %v585_v40 = vadd.f32 %v3824_v26, %v584_v38 }
 0x1ff   :  { %v4072_v42 = vpop.f32.mrf.mxu1  ;;  %v728_v58 = vld [vmem:[#allocation2] sm:$0xff] }
 0x200   :  { %613 = vst.msk [vmem:[#allocation3 + $0x8] sm:$0xff] %vm491_vm2, %v585_v40  ;;  %v606_v44 = vadd.f32 %v4072_v42, %v3824_v26 }
 0x201   :  { %v597_v46 = vpop.f32.mrf.mxu1 }
 0x202   :  { %618 = vst.msk [vmem:[#allocation3 + $0x30] sm:$0xff] %vm491_vm2, %v606_v44  ;;  %v598_v47 = vadd.f32 %v3824_v26, %v597_v46  ;;  %v4403_v46 = vld [vmem:[#allocation13 + $0x8] sm:$0xff]  }
 0x203   :  { %v4073_v48 = vpop.f32.mrf.mxu1  ;;  %v828_v35 = vld [vmem:[#allocation2 + $0x8] sm:$0xff]  ;;  %4074 = vmatprep.subr.bf16.mxu0 %v4403_v46 }
 0x204   :  { %616 = vst.msk [vmem:[#allocation3 + $0x20] sm:$0xff] %vm491_vm2, %v598_v47  ;;  %v609_v49 = vadd.f32 %v4073_v48, %v3824_v26  ;;  %v382_v47 = vld [vmem:[%s6095_s21 + $0x20] sm:$0xff]  ;;  %v383_v48 = vld [vmem:[%s6095_s21 + $0x28] sm:$0xff]  ;;  %4075 = vmatpush3.bf16.msra.mxu0 %v4403_v46 }
 0x205   :  { %v600_v50 = vpop.f32.mrf.mxu1 }
 0x206   :  { %619 = vst.msk [vmem:[#allocation3 + $0x38] sm:$0xff] %vm491_vm2, %v609_v49  ;;  %v601_v52 = vadd.f32 %v3824_v26, %v600_v50  ;;  %v388_v49 = vpack.c.bf16 %v383_v48, %v382_v47  ;;  %v384_v50 = vld [vmem:[%s6095_s21 + $0x30] sm:$0xff] }
 0x207   :  { %v778_v53 = vpop.f32.mrf.mxu1 }
 0x208   :  { %617 = vst.msk [vmem:[#allocation3 + $0x28] sm:$0xff] %vm491_vm2, %v601_v52  ;;  %v779_v54 = vadd.f32 %v5479_v51, %v778_v53  ;;  %v385_v52 = vld [vmem:[%s6095_s21 + $0x38] sm:$0xff]  ;;  %v4404_v53 = vld [vmem:[#allocation13] sm:$0xff]   ;;  %4058 = vmatprep.mubr.msk.bf16.mxu0 %vm413_vm0, %v388_v49 }
 0x209   :  { %v4092_v55 = vpop.f32.mrf.mxu1  ;;  %4076 = vmatprep.subr.bf16.mxu0 %v4404_v53 }
 0x20a   :  { %792 = vrot.lane.b32.xlu0 %v779_v54, %s5162_s29  ;;  %v784_v59 = vadd.f32 %v779_v54, %v728_v58  ;;  %v389_v55 = vpack.c.bf16 %v385_v52, %v384_v50  ;;  %4077 = vmatpush3.bf16.msra.mxu0 %v4404_v53 }
 0x20b   :  { %v781_v56 = vpop.f32.mrf.mxu1  ;;  %4102 = vmatprep.subr.bf16.mxu0 %v5181_v18 }
 0x20c   :  { %v3841_v60 = vmul.f32 -1.442695, %v784_v59  ;;  %4059 = vmatmul.mubr.msk.bf16.gmra.mxu0 %vm413_vm0, %v389_v55 }
 0x20d   :  { %v4093_v57 = vpop.f32.mrf.mxu1  ;;  %4078 = vmatprep.mubr.msk.bf16.mxu0 %vm413_vm0, %v5422_v7 }
 0x20e   :  { %4428 = vpow2.f32 %v3841_v60 }
 0x214   :  { %4079 = vmatmul.mubr.msk.bf16.vlgmr.msra.gmra.mxu0 %vm413_vm0, %v5428_v10 }
 0x215   :  { %4103 = vmatpush3.bf16.msra.mxu0 %v5424_v9  ;;  %4082 = vmatprep.mubr.msk.bf16.mxu0 %vm413_vm0, %v5436_v21 }
 0x216   :  { %4104 = vmatprep.subr.bf16.mxu0 %v5181_v18 }
 0x219   :  { %4105 = vmatpush3.bf16.msra.mxu0 %v5438_v24 }
 0x21a   :  { %4118 = vmatprep.subr.bf16.mxu0 %v5181_v18 }
 0x21b   :  { %v4429_v61 = vpop.eup %4428 }
 0x21c   :  { %v788_v62 = vadd.f32 1.0, %v4429_v61  ;;  %4083 = vmatmul.mubr.msk.bf16.gmra.mxu0 %vm413_vm0, %v5447_v25 }
 0x21d   :  { %4106 = vmatprep.mubr.msk.bf16.mxu0 %vm5182_vm1, %v5181_v18 }
 0x21e   :  { %4430 = vrcp.f32 %v788_v62 }
 0x22b   :  { %v4431_v3 = vpop.eup %4430 }
 0x22c   :  { %v802_v13 = vsub.f32 1.0, %v4431_v3  ;;  %v808_v15 = vmul.f32 0.0, %v4431_v3 }
 0x27c   :  { %v793_v4 = vpop.permute.xlu0 %792 }
 0x27d   :  { %v795_v5 = vmul.f32 %v4431_v3, %v793_v4 }
 0x27f   :  { %797 = vrot.lane.b32.xlu0 %v795_v5, %s5162_s29 }
 0x2cc   :  { %v4060_v25 = vpop.f32.mrf.mxu0 }
 0x2cd   :  { %v485_v2 = vadd.f32 %v4060_v25, %v5463_v31 }
 0x2ce   :  { %v476_v3 = vpop.f32.mrf.mxu0 }
 0x2cf   :  { %498 = vst.msk [vmem:[#allocation2 + $0x30] sm:$0xff] %vm491_vm2, %v485_v2  ;;  %v477_v4 = vadd.f32 %v5463_v31, %v476_v3  ;;  %v3851_v2 = vsel %vm1086_vm6, 1.0, %v5181_v18  ;;  %vm2314_vm6 = vcmask 195584  }
 0x2d0   :  { %v4061_v5 = vpop.f32.mrf.mxu0 }
 0x2d1   :  { %496 = vst.msk [vmem:[#allocation2 + $0x20] sm:$0xff] %vm491_vm2, %v477_v4  ;;  %v1012_v4 = vld [vmem:[#allocation2 + $0x18] sm:$0xff] }
 0x2f1   :  { %v798_v6 = vpop.permute.xlu0 %797 }
 0x2f2   :  { %v800_v8 = vadd.f32 %v798_v6, %v728_v58  ;;  %v488_v6 = vadd.f32 %v4061_v5, %v5463_v31 }
 0x2f4   :  { %4432 = vtanh.f32 %v800_v8  ;;  %v479_v8 = vpop.f32.mrf.mxu0  ;;  %499 = vst.msk [vmem:[#allocation2 + $0x38] sm:$0xff] %vm491_vm2, %v488_v6 }
 0x301   :  { %v4433_v11 = vpop.eup %4432 }
 0x302   :  { %804 = vrot.lane.b32.xlu0 %v4433_v11, %s5183_s8  ;;  %v3831_v11 = vld [vmem:[#allocation11] ss:$0 sm:$0xff] }
 0x374   :  { %v805_v14 = vpop.permute.xlu0 %804 }
 0x375   :  { %v807_v16 = vmul.f32 %v805_v14, %v802_v13  ;;  %v4080_v13 = vpop.f32.mrf.mxu0 }
 0x376   :  { %v686_v14 = vadd.f32 %v4080_v13, %v3831_v11 }
 0x377   :  { %v809_v19 = vadd.f32 %v808_v15, %v807_v16  ;;  %v677_v15 = vpop.f32.mrf.mxu0 }
 0x378   :  { %710 = vst.msk [vmem:[#allocation4 + $0x10] sm:$0xff] %vm491_vm2, %v686_v14  ;;  %v678_v16 = vadd.f32 %v3831_v11, %v677_v15  ;;  %v1095_v15 = vsub.f32 1.0, %v3851_v2 }
 0x379   :  { %v818_v20 = vmul.f32 %v816_v12, %v809_v19  ;;  %v480_v12 = vadd.f32 %v5463_v31, %v479_v8  ;;  %v4081_v17 = vpop.f32.mrf.mxu0 }
 0x37a   :  { %708 = vst.msk [vmem:[#allocation4] sm:$0xff] %vm491_vm2, %v678_v16  ;;  %v689_v19 = vadd.f32 %v4081_v17, %v3831_v11 }
 0x37b   :  { %v5492_v23 = vadd.f32 %v825_v22, %v818_v20  ;;  %497 = vst.msk [vmem:[#allocation2 + $0x28] sm:$0xff] %vm491_vm2, %v480_v12  ;;  %v680_v20 = vpop.f32.mrf.mxu0 }
 0x37c   :  { %711 = vst.msk [vmem:[#allocation4 + $0x18] sm:$0xff] %vm491_vm2, %v689_v19  ;;  %v681_v22 = vadd.f32 %v3831_v11, %v680_v20 }
 0x37d   :  { %v829_v26 = vpack.c.bf16 %v5492_v23, %v5492_v23 }
 0x37e   :  { %709 = vst.msk [vmem:[#allocation4 + $0x8] sm:$0xff] %vm491_vm2, %v681_v22 }
 0x37f   :  { %831 = vrot.lane.b32.xlu1 %v829_v26, %s5183_s8 }
 0x3f1   :  { %v832_v27 = vpop.permute.xlu1 %831 }
 0x3f2   :  { %4099 = vmatmul.mubr.msk.bf16.vlgmr.msra.gmra.mxu1 %vm413_vm0, %v832_v27 }
 0x3f3   :  { %4111 = vmatpush3.bf16.msra.mxu1 %v5424_v9  ;;  %4114 = vmatprep.mubr.msk.bf16.mxu1 %vm5182_vm1, %v5181_v18 }
 0x3f4   :  { %4112 = vmatprep.subr.bf16.mxu1 %v5181_v18 }
 0x3f7   :  { %4113 = vmatpush3.bf16.msra.mxu1 %v5438_v24 }
 0x3f8   :  { %4126 = vmatprep.subr.bf16.mxu1 %v5181_v18 }
 0x4b2   :  { %v870_v28 = vpop.f32.mrf.mxu1 }
 0x4b3   :  { %v871_v29 = vadd.f32 %v5479_v51, %v870_v28 }
 0x4b4   :  { %v4100_v30 = vpop.f32.mrf.mxu1 }
 0x4b5   :  { %884 = vrot.lane.b32.xlu0 %v871_v29, %s5162_s29  ;;  %v876_v36 = vadd.f32 %v871_v29, %v828_v35 }
 0x4b6   :  { %v873_v32 = vpop.f32.mrf.mxu1 }
 0x4b7   :  { %v3844_v37 = vmul.f32 -1.442695, %v876_v36 }
 0x4b8   :  { %v4101_v33 = vpop.f32.mrf.mxu1 }
 0x4b9   :  { %907 = vperm.xlu0 %4396, %v3845_v34   ;;  %4434 = vpow2.f32 %v3844_v37  ;;  %v3848_v37 = vsel %vm994_vm5, 1.0, %v5181_v18  ;;  %vm2318_vm5 = vcmask 1043456  }
 0x4ba   :  { %v1003_v47 = vsub.f32 1.0, %v3848_v37 }
 0x4c6   :  { %v4435_v38 = vpop.eup %4434 }
 0x4c7   :  { %v880_v39 = vadd.f32 1.0, %v4435_v38 }
 0x4c9   :  { %4436 = vrcp.f32 %v880_v39  ;;  %v920_v39 = vld [vmem:[#allocation2 + $0x10] sm:$0xff] }
 0x4d6   :  { %v4437_v40 = vpop.eup %4436 }
 0x4d7   :  { %v894_v56 = vsub.f32 1.0, %v4437_v40  ;;  %v900_v58 = vmul.f32 %v4437_v40, %v5492_v23 }
 0x527   :  { %v885_v41 = vpop.permute.xlu0 %884 }
 0x528   :  { %v887_v42 = vmul.f32 %v4437_v40, %v885_v41 }
 0x52a   :  { %889 = vrot.lane.b32.xlu1 %v887_v42, %s5162_s29 }
 0x52e   :  { %914 = vperm.xlu1 %4395, %v911_v43  }
 0x534   :  { %v908_v59 = vpop.permute.xlu0 %907 }
 0x59c   :  { %v890_v44 = vpop.permute.xlu1 %889 }
 0x59d   :  { %v892_v45 = vadd.f32 %v890_v44, %v828_v35 }
 0x59f   :  { %4438 = vtanh.f32 %v892_v45 }
 0x5a9   :  { %v915_v7 = vpop.permute.xlu1 %914 }
 0x5aa   :  { %v917_v60 = vmul.f32 %v915_v7, %v5492_v23  ;;  %v4084_v23 = vpop.f32.mrf.mxu0 }
 0x5ab   :  { %v702_v31 = vadd.f32 %v4084_v23, %v3831_v11 }
 0x5ac   :  { %v4439_v54 = vpop.eup %4438  ;;  %v693_v26 = vpop.f32.mrf.mxu0 }
 0x5ad   :  { %896 = vrot.lane.b32.xlu1 %v4439_v54, %s5183_s8  ;;  %714 = vst.msk [vmem:[#allocation4 + $0x30] sm:$0xff] %vm491_vm2, %v702_v31  ;;  %v694_v27 = vadd.f32 %v3831_v11, %v693_v26 }
 0x5ae   :  { %v4085_v28 = vpop.f32.mrf.mxu0 }
 0x5af   :  { %712 = vst.msk [vmem:[#allocation4 + $0x20] sm:$0xff] %vm491_vm2, %v694_v27 }
 0x5b0   :  { %v696_v29 = vpop.f32.mrf.mxu0 }
 0x5b1   :  { %v697_v30 = vadd.f32 %v3831_v11, %v696_v29 }
 0x5b3   :  { %713 = vst.msk [vmem:[#allocation4 + $0x28] sm:$0xff] %vm491_vm2, %v697_v30 }
 0x61f   :  { %v897_v10 = vpop.permute.xlu1 %896 }
 0x620   :  { %v899_v57 = vmul.f32 %v897_v10, %v894_v56 }
 0x622   :  { %v901_v21 = vadd.f32 %v900_v58, %v899_v57 }
 0x624   :  { %v910_v61 = vmul.f32 %v908_v59, %v901_v21 }
 0x626   :  { %v5533_v62 = vadd.f32 %v917_v60, %v910_v61 }
 0x628   :  { %v921_v1 = vpack.c.bf16 %v5533_v62, %v5533_v62 }
 0x62a   :  { %923 = vrot.lane.b32.xlu0 %v921_v1, %s5183_s8 }
 0x69c   :  { %v924_v32 = vpop.permute.xlu0 %923 }
 0x69d   :  { %4107 = vmatmul.mubr.msk.bf16.vlgmr.msra.gmra.mxu0 %vm413_vm0, %v924_v32 }
 0x69e   :  { %4119 = vmatpush3.bf16.msra.mxu0 %v5424_v9  ;;  %4122 = vmatprep.mubr.msk.bf16.mxu0 %vm5182_vm1, %v5181_v18 }
 0x69f   :  { %4120 = vmatprep.subr.bf16.mxu0 %v5181_v18 }
 0x6a2   :  { %4121 = vmatpush3.bf16.msra.mxu0 %v5438_v24 }
 0x6a3   :  { %4134 = vmatprep.subr.bf16.mxu0 %v5181_v18 }
 0x75d   :  { %v962_v33 = vpop.f32.mrf.mxu0 }
 0x75e   :  { %v963_v34 = vadd.f32 %v5479_v51, %v962_v33 }
 0x75f   :  { %v4108_v35 = vpop.f32.mrf.mxu0 }
 0x760   :  { %976 = vrot.lane.b32.xlu1 %v963_v34, %s5162_s29  ;;  %v968_v40 = vadd.f32 %v963_v34, %v920_v39 }
 0x761   :  { %v965_v36 = vpop.f32.mrf.mxu0 }
 0x762   :  { %v3847_v41 = vmul.f32 -1.442695, %v968_v40 }
 0x763   :  { %v4109_v38 = vpop.f32.mrf.mxu0 }
 0x764   :  { %999 = vperm.xlu1 %4395, %v3848_v37   ;;  %4440 = vpow2.f32 %v3847_v41  ;;  %v1104_v41 = vld [vmem:[#allocation2 + $0x20] sm:$0xff] }
 0x771   :  { %v4441_v42 = vpop.eup %4440 }
 0x772   :  { %v972_v43 = vadd.f32 1.0, %v4441_v42 }
 0x774   :  { %4442 = vrcp.f32 %v972_v43 }
 0x781   :  { %v4443_v44 = vpop.eup %4442 }
 0x782   :  { %v986_v53 = vsub.f32 1.0, %v4443_v44  ;;  %v992_v55 = vmul.f32 %v4443_v44, %v5533_v62 }
 0x7d2   :  { %v977_v45 = vpop.permute.xlu1 %976 }
 0x7d3   :  { %v979_v46 = vmul.f32 %v4443_v44, %v977_v45 }
 0x7d5   :  { %981 = vrot.lane.b32.xlu0 %v979_v46, %s5162_s29 }
 0x7d9   :  { %1006 = vperm.xlu0 %4396, %v1003_v47  }
 0x7df   :  { %v1000_v52 = vpop.permute.xlu1 %999 }
 0x847   :  { %v982_v48 = vpop.permute.xlu0 %981 }
 0x848   :  { %v984_v49 = vadd.f32 %v982_v48, %v920_v39  ;;  %v3854_v39 = vsel %vm1178_vm7, 1.0, %v5181_v18  ;;  %vm2362_vm7 = vcmask 130048  }
 0x84a   :  { %4444 = vtanh.f32 %v984_v49  ;;  %v1187_v49 = vsub.f32 1.0, %v3854_v39 }
 0x854   :  { %v1007_v56 = vpop.permute.xlu0 %1006 }
 0x855   :  { %v1009_v57 = vmul.f32 %v1007_v56, %v5533_v62 }
 0x857   :  { %v4445_v50 = vpop.eup %4444 }
 0x858   :  { %988 = vrot.lane.b32.xlu1 %v4445_v50, %s5183_s8 }
 0x8ca   :  { %v989_v54 = vpop.permute.xlu1 %988 }
 0x8cb   :  { %v991_v7 = vmul.f32 %v989_v54, %v986_v53 }
 0x8cd   :  { %v993_v10 = vadd.f32 %v992_v55, %v991_v7 }
 0x8cf   :  { %v1002_v58 = vmul.f32 %v1000_v52, %v993_v10 }
 0x8d1   :  { %v1010_v59 = vadd.f32 %v1009_v57, %v1002_v58 }
 0x8d3   :  { %v1013_v21 = vpack.c.bf16 %v1010_v59, %v1010_v59 }
 0x8d5   :  { %1015 = vrot.lane.b32.xlu0 %v1013_v21, %s5183_s8 }
 0x947   :  { %v1016_v60 = vpop.permute.xlu0 %1015 }
 0x948   :  { %4115 = vmatmul.mubr.msk.bf16.vlgmr.msra.gmra.mxu1 %vm413_vm0, %v1016_v60 }
 0x949   :  { %4127 = vmatpush3.bf16.msra.mxu1 %v5424_v9  ;;  %4130 = vmatprep.mubr.msk.bf16.mxu1 %vm5182_vm1, %v5181_v18 }
 0x94a   :  { %4128 = vmatprep.subr.bf16.mxu1 %v5181_v18 }
 0x94d   :  { %4129 = vmatpush3.bf16.msra.mxu1 %v5438_v24 }
 0x94e   :  { %4142 = vmatprep.subr.bf16.mxu1 %v5181_v18 }
 0xa08   :  { %v1054_v61 = vpop.f32.mrf.mxu1 }
 0xa09   :  { %v1055_v62 = vadd.f32 %v5479_v51, %v1054_v61 }
 0xa0a   :  { %v4116_v1 = vpop.f32.mrf.mxu1 }
 0xa0b   :  { %1068 = vrot.lane.b32.xlu1 %v1055_v62, %s5162_s29  ;;  %v1060_v5 = vadd.f32 %v1055_v62, %v1012_v4 }
 0xa0c   :  { %v1057_v25 = vpop.f32.mrf.mxu1 }
 0xa0d   :  { %v3850_v6 = vmul.f32 -1.442695, %v1060_v5  ;;  %v1196_v5 = vld [vmem:[#allocation2 + $0x28] sm:$0xff] }
 0xa0e   :  { %v4117_v3 = vpop.f32.mrf.mxu1 }
 0xa0f   :  { %1091 = vperm.xlu1 %4395, %v3851_v2   ;;  %4446 = vpow2.f32 %v3850_v6 }
 0xa1c   :  { %v4447_v8 = vpop.eup %4446 }
 0xa1d   :  { %v1064_v11 = vadd.f32 1.0, %v4447_v8 }
 0xa1f   :  { %4448 = vrcp.f32 %v1064_v11 }
 0xa2c   :  { %v4449_v12 = vpop.eup %4448 }
 0xa2d   :  { %v1078_v22 = vsub.f32 1.0, %v4449_v12  ;;  %v1084_v31 = vmul.f32 %v4449_v12, %v1010_v59 }
 0xa7d   :  { %v1069_v13 = vpop.permute.xlu1 %1068 }
 0xa7e   :  { %v1071_v14 = vmul.f32 %v4449_v12, %v1069_v13 }
 0xa80   :  { %1073 = vrot.lane.b32.xlu0 %v1071_v14, %s5162_s29 }
 0xa84   :  { %1098 = vperm.xlu0 %4396, %v1095_v15  }
 0xa8a   :  { %v1092_v20 = vpop.permute.xlu1 %1091 }
 0xaf2   :  { %v1074_v16 = vpop.permute.xlu0 %1073 }
 0xaf3   :  { %v1076_v17 = vadd.f32 %v1074_v16, %v1012_v4 }
 0xaf5   :  { %4450 = vtanh.f32 %v1076_v17 }
 0xaff   :  { %v1099_v27 = vpop.permute.xlu0 %1098 }
 0xb00   :  { %v1101_v29 = vmul.f32 %v1099_v27, %v1010_v59 }
 0xb02   :  { %v4451_v19 = vpop.eup %4450 }
 0xb03   :  { %1080 = vrot.lane.b32.xlu1 %v4451_v19, %s5183_s8 }
 0xb75   :  { %v1081_v23 = vpop.permute.xlu1 %1080 }
 0xb76   :  { %v1083_v26 = vmul.f32 %v1081_v23, %v1078_v22 }
 0xb78   :  { %v1085_v28 = vadd.f32 %v1084_v31, %v1083_v26 }
 0xb7a   :  { %v1094_v30 = vmul.f32 %v1092_v20, %v1085_v28 }
 0xb7c   :  { %v1102_v32 = vadd.f32 %v1101_v29, %v1094_v30 }
 0xb7e   :  { %v1105_v33 = vpack.c.bf16 %v1102_v32, %v1102_v32 }
 0xb80   :  { %1107 = vrot.lane.b32.xlu0 %v1105_v33, %s5183_s8 }
 0xbf2   :  { %v1108_v34 = vpop.permute.xlu0 %1107 }
 0xbf3   :  { %4123 = vmatmul.mubr.msk.bf16.vlgmr.msra.gmra.mxu0 %vm413_vm0, %v1108_v34  ;;  %v5616_v34 = vld [vmem:[%s6098_s18 + $0x8] sm:$0xff]  }
 0xbf4   :  { %4135 = vmatpush3.bf16.msra.mxu0 %v5424_v9  ;;  %4138 = vmatprep.mubr.msk.bf16.mxu0 %vm5182_vm1, %v5181_v18 }
 0xbf5   :  { %4136 = vmatprep.subr.bf16.mxu0 %v5181_v18 }
 0xbf8   :  { %4137 = vmatpush3.bf16.msra.mxu0 %v5438_v24 }
 0xbf9   :  { %4150 = vmatprep.subr.bf16.mxu0 %v5181_v18 }
 0xcb3   :  { %v1146_v35 = vpop.f32.mrf.mxu0 }
 0xcb4   :  { %v1147_v36 = vadd.f32 %v5479_v51, %v1146_v35 }
 0xcb5   :  { %v4124_v37 = vpop.f32.mrf.mxu0 }
 0xcb6   :  { %1160 = vrot.lane.b32.xlu1 %v1147_v36, %s5162_s29  ;;  %v1152_v42 = vadd.f32 %v1147_v36, %v1104_v41  ;;  %v5621_v36 = vld [vmem:[%s6098_s18] sm:$0xff]  }
 0xcb7   :  { %v1149_v38 = vpop.f32.mrf.mxu0 }
 0xcb8   :  { %v3853_v43 = vmul.f32 -1.442695, %v1152_v42  ;;  %v5638_v42 = vld [vmem:[%s6099_s20] ss:$0 sm:$0xff] }
 0xcb9   :  { %v4125_v40 = vpop.f32.mrf.mxu0 }
 0xcba   :  { %1183 = vperm.xlu1 %4395, %v3854_v39   ;;  %4452 = vpow2.f32 %v3853_v43 }
 0xcc7   :  { %v4453_v44 = vpop.eup %4452 }
 0xcc8   :  { %v1156_v45 = vadd.f32 1.0, %v4453_v44 }
 0xcca   :  { %4454 = vrcp.f32 %v1156_v45 }
 0xcd7   :  { %v4455_v46 = vpop.eup %4454 }
 0xcd8   :  { %v1170_v55 = vsub.f32 1.0, %v4455_v46  ;;  %v1176_v56 = vmul.f32 %v4455_v46, %v1102_v32 }
 0xd28   :  { %v1161_v47 = vpop.permute.xlu1 %1160 }
 0xd29   :  { %v1163_v48 = vmul.f32 %v4455_v46, %v1161_v47 }
 0xd2b   :  { %1165 = vrot.lane.b32.xlu0 %v1163_v48, %s5162_s29  ;;  %v1288_v48 = vld [vmem:[#allocation2 + $0x30] sm:$0xff] }
 0xd2f   :  { %1190 = vperm.xlu0 %4396, %v1187_v49  }
 0xd35   :  { %v1184_v54 = vpop.permute.xlu1 %1183 }
 0xd9d   :  { %v1166_v50 = vpop.permute.xlu0 %1165 }
 0xd9e   :  { %v1168_v52 = vadd.f32 %v1166_v50, %v1104_v41 }
 0xda0   :  { %4456 = vtanh.f32 %v1168_v52  ;;  %v1483_v52 = vld [vmem:[#allocation3] sm:$0xff] }
 0xdaa   :  { %v1191_v57 = vpop.permute.xlu0 %1190 }
 0xdab   :  { %v1193_v59 = vmul.f32 %v1191_v57, %v1102_v32 }
 0xdad   :  { %v4457_v53 = vpop.eup %4456 }
 0xdae   :  { %1172 = vrot.lane.b32.xlu1 %v4457_v53, %s5183_s8 }
 0xe20   :  { %v1173_v7 = vpop.permute.xlu1 %1172 }
 0xe21   :  { %v1175_v10 = vmul.f32 %v1173_v7, %v1170_v55 }
 0xe23   :  { %v1177_v58 = vadd.f32 %v1176_v56, %v1175_v10 }
 0xe25   :  { %v1186_v21 = vmul.f32 %v1184_v54, %v1177_v58 }
 0xe27   :  { %v1194_v60 = vadd.f32 %v1193_v59, %v1186_v21  ;;  %v3860_v59 = vsel %vm1362_vm9, 1.0, %v5181_v18 }
 0xe29   :  { %v1197_v61 = vpack.c.bf16 %v1194_v60, %v1194_v60 }
 0xe2b   :  { %1199 = vrot.lane.b32.xlu0 %v1197_v61, %s5183_s8 }
 0xe9d   :  { %v1200_v62 = vpop.permute.xlu0 %1199 }
 0xe9e   :  { %4131 = vmatmul.mubr.msk.bf16.vlgmr.msra.gmra.mxu1 %vm413_vm0, %v1200_v62  ;;  %v5646_v62 = vld [vmem:[%s6100_s22] sm:$0xff] }
 0xe9f   :  { %4143 = vmatpush3.bf16.msra.mxu1 %v5424_v9  ;;  %4146 = vmatprep.mubr.msk.bf16.mxu1 %vm5182_vm1, %v5181_v18  ;;  %v3857_v9 = vsel %vm1270_vm8, 1.0, %v5181_v18  ;;  %vm1562_vm10 = vcmp.gt.s32.totalorder %v5646_v62, 0  ;;  %vm1654_vm11 = vcmp.gt.s32.totalorder %v5646_v62, 1  ;;  %vm1746_vm12 = vcmp.gt.s32.totalorder %v5646_v62, 2 }
 0xea0   :  { %4144 = vmatprep.subr.bf16.mxu1 %v5181_v18  ;;  %v1279_v15 = vsub.f32 1.0, %v3857_v9  ;;  %vm1838_vm13 = vcmp.gt.s32.totalorder %v5646_v62, 3  ;;  %vm1930_vm14 = vcmp.gt.s32.totalorder %v5646_v62, 4  ;;  %vm2022_vm15 = vcmp.gt.s32.totalorder %v5646_v62, 5 }
 0xea1   :  { %vm2114_vm2 = vcmp.gt.s32.totalorder %v5646_v62, 6  ;;  %vm2206_vm4 = vcmp.gt.s32.totalorder %v5646_v62, 7 }
 0xea3   :  { %4145 = vmatpush3.bf16.msra.mxu1 %v5438_v24 }
 0xea4   :  { %4158 = vmatprep.subr.bf16.mxu1 %v5181_v18 }
 0xf5e   :  { %v1238_v1 = vpop.f32.mrf.mxu1 }
 0xf5f   :  { %v1239_v25 = vadd.f32 %v5479_v51, %v1238_v1  ;;  %v1371_v1 = vsub.f32 1.0, %v3860_v59 }
 0xf60   :  { %v4132_v2 = vpop.f32.mrf.mxu1 }
 0xf61   :  { %1252 = vrot.lane.b32.xlu1 %v1239_v25, %s5162_s29  ;;  %v1244_v6 = vadd.f32 %v1239_v25, %v1196_v5  ;;  %v3868_v25 = vsel %vm1562_vm10, 1.0, %v5181_v18 }
 0xf62   :  { %v1241_v3 = vpop.f32.mrf.mxu1 }
 0xf63   :  { %v3856_v8 = vmul.f32 -1.442695, %v1244_v6 }
 0xf64   :  { %v4133_v4 = vpop.f32.mrf.mxu1 }
 0xf65   :  { %1275 = vperm.xlu1 %4395, %v3857_v9   ;;  %4458 = vpow2.f32 %v3856_v8 }
 0xf72   :  { %v4459_v24 = vpop.eup %4458 }
 0xf73   :  { %v1248_v11 = vadd.f32 1.0, %v4459_v24 }
 0xf75   :  { %4460 = vrcp.f32 %v1248_v11 }
 0xf82   :  { %v4461_v12 = vpop.eup %4460 }
 0xf83   :  { %v1262_v22 = vsub.f32 1.0, %v4461_v12  ;;  %v1268_v31 = vmul.f32 %v4461_v12, %v1194_v60 }
 0xfd3   :  { %v1253_v13 = vpop.permute.xlu1 %1252 }
 0xfd4   :  { %v1255_v14 = vmul.f32 %v4461_v12, %v1253_v13 }
 0xfd6   :  { %1257 = vrot.lane.b32.xlu0 %v1255_v14, %s5162_s29 }
 0xfda   :  { %1282 = vperm.xlu0 %4396, %v1279_v15  }
 0xfe0   :  { %v1276_v20 = vpop.permute.xlu1 %1275 }
0x1048   :  { %v1258_v16 = vpop.permute.xlu0 %1257 }
0x1049   :  { %v1260_v17 = vadd.f32 %v1258_v16, %v1196_v5  ;;  %v1571_v5 = vsub.f32 1.0, %v3868_v25 }
0x104b   :  { %4462 = vtanh.f32 %v1260_v17 }
0x1055   :  { %v1283_v27 = vpop.permute.xlu0 %1282 }
0x1056   :  { %v1285_v29 = vmul.f32 %v1283_v27, %v1194_v60 }
0x1058   :  { %v4463_v19 = vpop.eup %4462 }
0x1059   :  { %1264 = vrot.lane.b32.xlu1 %v4463_v19, %s5183_s8 }
0x10cb   :  { %v1265_v23 = vpop.permute.xlu1 %1264 }
0x10cc   :  { %v1267_v26 = vmul.f32 %v1265_v23, %v1262_v22 }
0x10ce   :  { %v1269_v28 = vadd.f32 %v1268_v31, %v1267_v26 }
0x10d0   :  { %v1278_v30 = vmul.f32 %v1276_v20, %v1269_v28 }
0x10d2   :  { %v5610_v32 = vadd.f32 %v1285_v29, %v1278_v30 }
0x10d4   :  { %v1289_v33 = vpack.c.bf16 %v5610_v32, %v5610_v32 }
0x10d6   :  { %1291 = vrot.lane.b32.xlu0 %v1289_v33, %s5183_s8 }
0x1148   :  { %v1292_v35 = vpop.permute.xlu0 %1291 }
0x1149   :  { %4139 = vmatmul.mubr.msk.bf16.vlgmr.msra.gmra.mxu0 %vm413_vm0, %v1292_v35 }
0x114a   :  { %4151 = vmatpush3.bf16.msra.mxu0 %v5616_v34  ;;  %4154 = vmatprep.mubr.msk.bf16.mxu0 %vm5182_vm1, %v5181_v18 }
0x114b   :  { %4152 = vmatprep.subr.bf16.mxu0 %v5181_v18 }
0x114e   :  { %4153 = vmatpush3.bf16.msra.mxu0 %v5621_v36 }
0x114f   :  { %4166 = vmatprep.subr.bf16.mxu0 %v5181_v18 }
0x1151   :  { %4155 = vmatmul.mubr.bf16.vlgmr.msra.gmra.mxu0 %v5180_v0 }
0x1152   :  { %4167 = vmatpush3.bf16.msra.mxu0 %v5616_v34  ;;  %4170 = vmatprep.mubr.msk.bf16.mxu0 %vm5182_vm1, %v5181_v18 }
0x1153   :  { %4168 = vmatprep.subr.bf16.mxu0 %v5181_v18 }
0x1156   :  { %4169 = vmatpush3.bf16.msra.mxu0 %v5621_v36 }
0x1157   :  { %4182 = vmatprep.subr.bf16.mxu0 %v5181_v18 }
0x1209   :  { %v1330_v37 = vpop.f32.mrf.mxu0 }
0x120a   :  { %v1331_v38 = vadd.f32 %v5479_v51, %v1330_v37 }
0x120b   :  { %v4140_v39 = vpop.f32.mrf.mxu0 }
0x120c   :  { %1344 = vrot.lane.b32.xlu1 %v1331_v38, %s5162_s29  ;;  %v1336_v49 = vadd.f32 %v1331_v38, %v1288_v48 }
0x120d   :  { %v1333_v40 = vpop.f32.mrf.mxu0 }
0x120e   :  { %v3859_v50 = vmul.f32 -1.442695, %v1336_v49 }
0x120f   :  { %v4141_v41 = vpop.f32.mrf.mxu0 }
0x1210   :  { %4464 = vpow2.f32 %v3859_v50  ;;  %v1580_v50 = vld [vmem:[#allocation3 + $0x8] sm:$0xff] }
0x1211   :  { %v1530_v43 = vpop.f32.mrf.mxu0 }
0x1212   :  { %v1531_v44 = vadd.f32 %v5638_v42, %v1530_v43 }
0x1213   :  { %v4156_v45 = vpop.f32.mrf.mxu0 }
0x1214   :  { %1544 = vrot.lane.b32.xlu0 %v1531_v44, %s5162_s29  ;;  %v1536_v51 = vadd.f32 %v1531_v44, %v1483_v52 }
0x1215   :  { %v1533_v46 = vpop.f32.mrf.mxu0 }
0x1216   :  { %v3867_v53 = vmul.f32 -1.442695, %v1536_v51 }
0x1217   :  { %v4157_v47 = vpop.f32.mrf.mxu0 }
0x1218   :  { %4466 = vpow2.f32 %v3867_v53 }
0x121d   :  { %v4465_v54 = vpop.eup %4464 }
0x121e   :  { %v1340_v55 = vadd.f32 1.0, %v4465_v54 }
0x1220   :  { %4468 = vrcp.f32 %v1340_v55 }
0x1225   :  { %v4467_v7 = vpop.eup %4466 }
0x1226   :  { %v1540_v56 = vadd.f32 1.0, %v4467_v7 }
0x1228   :  { %4470 = vrcp.f32 %v1540_v56 }
0x122d   :  { %v4469_v10 = vpop.eup %4468 }
0x122e   :  { %v1354_v11 = vsub.f32 1.0, %v4469_v10  ;;  %v1360_v13 = vmul.f32 %v4469_v10, %v5610_v32 }
0x1235   :  { %v4471_v21 = vpop.eup %4470 }
0x1236   :  { %v1554_v22 = vsub.f32 1.0, %v4471_v21  ;;  %v1560_v31 = vmul.f32 0.0, %v4471_v21 }
0x127e   :  { %v1345_v57 = vpop.permute.xlu1 %1344 }
0x127f   :  { %v1347_v58 = vmul.f32 %v4469_v10, %v1345_v57 }
0x1281   :  { %1349 = vrot.lane.b32.xlu1 %v1347_v58, %s5162_s29 }
0x1285   :  { %1367 = vperm.xlu1 %4395, %v3860_v59  }
0x1286   :  { %v1545_v60 = vpop.permute.xlu0 %1544 }
0x1287   :  { %v1547_v61 = vmul.f32 %v4471_v21, %v1545_v60 }
0x1289   :  { %1549 = vrot.lane.b32.xlu0 %v1547_v61, %s5162_s29 }
0x128d   :  { %1374 = vperm.xlu0 %4396, %v1371_v1  }
0x1291   :  { %1567 = vperm.xlu0 %4396, %v3868_v25  }
0x12f3   :  { %v1350_v63 = vpop.permute.xlu1 %1349 }
0x12f4   :  { %v1352_v2 = vadd.f32 %v1350_v63, %v1288_v48  ;;  %v3871_v48 = vsel %vm1654_vm11, 1.0, %v5181_v18 }
0x12f5   :  { %v1663_v10 = vsub.f32 1.0, %v3871_v48 }
0x12f6   :  { %4472 = vtanh.f32 %v1352_v2 }
0x12fb   :  { %v1550_v3 = vpop.permute.xlu0 %1549 }
0x12fc   :  { %v1552_v9 = vadd.f32 %v1550_v3, %v1483_v52 }
0x12fe   :  { %4474 = vtanh.f32 %v1552_v9 }
0x1300   :  { %v1368_v8 = vpop.permute.xlu1 %1367 }
0x1303   :  { %v4473_v4 = vpop.eup %4472 }
0x1304   :  { %1356 = vrot.lane.b32.xlu1 %v4473_v4, %s5183_s8 }
0x1308   :  { %1574 = vperm.xlu1 %4395, %v1571_v5   ;;  %v1375_v24 = vpop.permute.xlu0 %1374 }
0x1309   :  { %v1377_v17 = vmul.f32 %v1375_v24, %v5610_v32 }
0x130b   :  { %v4475_v6 = vpop.eup %4474 }
0x130c   :  { %1556 = vrot.lane.b32.xlu0 %v4475_v6, %s5183_s8  ;;  %v1568_v16 = vpop.permute.xlu0 %1567 }
0x1376   :  { %v1357_v12 = vpop.permute.xlu1 %1356 }
0x1377   :  { %v1359_v14 = vmul.f32 %v1357_v12, %v1354_v11 }
0x1379   :  { %v1361_v15 = vadd.f32 %v1360_v13, %v1359_v14  ;;  %v3874_v13 = vsel %vm1746_vm12, 1.0, %v5181_v18 }
0x137b   :  { %v1370_v19 = vmul.f32 %v1368_v8, %v1361_v15  ;;  %v1672_v15 = vld [vmem:[#allocation3 + $0x10] sm:$0xff] }
0x137d   :  { %v5655_v20 = vadd.f32 %v1377_v17, %v1370_v19 }
0x137e   :  { %v1557_v23 = vpop.permute.xlu0 %1556 }
0x137f   :  { %v1559_v26 = vmul.f32 %v1557_v23, %v1554_v22  ;;  %v1381_v27 = vpack.c.bf16 %v5655_v20, %v5655_v20 }
0x1381   :  { %v1561_v28 = vadd.f32 %v1560_v31, %v1559_v26  ;;  %1383 = vrot.lane.b32.xlu1 %v1381_v27, %s5183_s8  ;;  %v1755_v27 = vsub.f32 1.0, %v3874_v13 }
0x1383   :  { %v1575_v29 = vpop.permute.xlu1 %1574  ;;  %v1570_v30 = vmul.f32 %v1568_v16, %v1561_v28 }
0x1384   :  { %v1577_v33 = vmul.f32 0.0, %v1575_v29 }
0x1386   :  { %v1578_v35 = vadd.f32 %v1577_v33, %v1570_v30 }
0x1388   :  { %v1581_v37 = vpack.c.bf16 %v1578_v35, %v1578_v35 }
0x138a   :  { %1583 = vrot.lane.b32.xlu0 %v1581_v37, %s5183_s8 }
0x13f3   :  { %v1384_v32 = vpop.permute.xlu1 %1383 }
0x13f4   :  { %4147 = vmatmul.mubr.msk.bf16.vlgmr.msra.gmra.mxu1 %vm413_vm0, %v1384_v32 }
0x13f5   :  { %4159 = vmatpush3.bf16.msra.mxu1 %v5616_v34  ;;  %4162 = vmatprep.mubr.msk.bf16.mxu1 %vm5182_vm1, %v5181_v18 }
0x13f6   :  { %4160 = vmatprep.subr.bf16.mxu1 %v5181_v18 }
0x13f9   :  { %4161 = vmatpush3.bf16.msra.mxu1 %v5621_v36 }
0x13fa   :  { %4174 = vmatprep.subr.bf16.mxu1 %v5181_v18 }
0x13fc   :  { %v1584_v38 = vpop.permute.xlu0 %1583 }
0x13fd   :  { %4163 = vmatmul.mubr.msk.bf16.vlgmr.msra.gmra.mxu1 %vm413_vm0, %v1584_v38 }
0x13fe   :  { %4175 = vmatpush3.bf16.msra.mxu1 %v5616_v34  ;;  %4178 = vmatprep.mubr.msk.bf16.mxu1 %vm5182_vm1, %v5181_v18 }
0x13ff   :  { %4176 = vmatprep.subr.bf16.mxu1 %v5181_v18 }
0x1402   :  { %4177 = vmatpush3.bf16.msra.mxu1 %v5621_v36 }
0x1403   :  { %4190 = vmatprep.subr.bf16.mxu1 %v5181_v18 }
0x14b4   :  { %v5675_v39 = vpop.f32.mrf.mxu1 }
0x14b6   :  { %v4148_v40 = vpop.f32.mrf.mxu1 }
0x14b8   :  { %v1425_v41 = vpop.f32.mrf.mxu1 }
0x14ba   :  { %v4149_v43 = vpop.f32.mrf.mxu1 }
0x14bd   :  { %v1622_v44 = vpop.f32.mrf.mxu1 }
0x14be   :  { %v1623_v45 = vadd.f32 %v5638_v42, %v1622_v44 }
0x14bf   :  { %v4164_v46 = vpop.f32.mrf.mxu1 }
0x14c0   :  { %1636 = vrot.lane.b32.xlu1 %v1623_v45, %s5162_s29  ;;  %v1628_v52 = vadd.f32 %v1623_v45, %v1580_v50 }
0x14c1   :  { %v1625_v47 = vpop.f32.mrf.mxu1 }
0x14c2   :  { %v3870_v51 = vmul.f32 -1.442695, %v1628_v52 }
0x14c3   :  { %v4165_v49 = vpop.f32.mrf.mxu1 }
0x14c4   :  { %1659 = vperm.xlu1 %4395, %v3871_v48   ;;  %4476 = vpow2.f32 %v3870_v51  ;;  %v3877_v51 = vsel %vm1838_vm13, 1.0, %v5181_v18 }
0x14d1   :  { %v4477_v53 = vpop.eup %4476 }
0x14d2   :  { %v1632_v54 = vadd.f32 1.0, %v4477_v53 }
0x14d4   :  { %4478 = vrcp.f32 %v1632_v54  ;;  %v1764_v54 = vld [vmem:[#allocation3 + $0x18] sm:$0xff] }
0x14e1   :  { %v4479_v55 = vpop.eup %4478 }
0x14e2   :  { %v1646_v60 = vsub.f32 1.0, %v4479_v55  ;;  %v1652_v1 = vmul.f32 %v4479_v55, %v1578_v35 }
0x1532   :  { %v1637_v7 = vpop.permute.xlu1 %1636 }
0x1533   :  { %v1639_v56 = vmul.f32 %v4479_v55, %v1637_v7 }
0x1535   :  { %1641 = vrot.lane.b32.xlu0 %v1639_v56, %s5162_s29 }
0x1539   :  { %1666 = vperm.xlu0 %4396, %v1663_v10  }
0x153f   :  { %v1660_v21 = vpop.permute.xlu1 %1659 }
0x15a7   :  { %v1642_v57 = vpop.permute.xlu0 %1641 }
0x15a8   :  { %v1644_v58 = vadd.f32 %v1642_v57, %v1580_v50 }
0x15aa   :  { %4480 = vtanh.f32 %v1644_v58 }
0x15b4   :  { %v1667_v63 = vpop.permute.xlu0 %1666 }
0x15b5   :  { %v1669_v3 = vmul.f32 %v1667_v63, %v1578_v35 }
0x15b7   :  { %v4481_v59 = vpop.eup %4480 }
0x15b8   :  { %1648 = vrot.lane.b32.xlu1 %v4481_v59, %s5183_s8 }
0x162a   :  { %v1649_v61 = vpop.permute.xlu1 %1648 }
0x162b   :  { %v1651_v25 = vmul.f32 %v1649_v61, %v1646_v60 }
0x162d   :  { %v1653_v2 = vadd.f32 %v1652_v1, %v1651_v25 }
0x162f   :  { %v1662_v9 = vmul.f32 %v1660_v21, %v1653_v2  ;;  %v1847_v21 = vsub.f32 1.0, %v3877_v51 }
0x1631   :  { %v1670_v4 = vadd.f32 %v1669_v3, %v1662_v9 }
0x1633   :  { %v1673_v5 = vpack.c.bf16 %v1670_v4, %v1670_v4 }
0x1635   :  { %1675 = vrot.lane.b32.xlu0 %v1673_v5, %s5183_s8 }
0x16a7   :  { %v1676_v6 = vpop.permute.xlu0 %1675 }
0x16a8   :  { %4171 = vmatmul.mubr.msk.bf16.vlgmr.msra.gmra.mxu0 %vm413_vm0, %v1676_v6 }
0x16a9   :  { %4183 = vmatpush3.bf16.msra.mxu0 %v5616_v34  ;;  %4186 = vmatprep.mubr.msk.bf16.mxu0 %vm5182_vm1, %v5181_v18 }
0x16aa   :  { %4184 = vmatprep.subr.bf16.mxu0 %v5181_v18 }
0x16ad   :  { %4185 = vmatpush3.bf16.msra.mxu0 %v5621_v36 }
0x16ae   :  { %4198 = vmatprep.subr.bf16.mxu0 %v5181_v18 }
0x1768   :  { %v1714_v8 = vpop.f32.mrf.mxu0 }
0x1769   :  { %v1715_v24 = vadd.f32 %v5638_v42, %v1714_v8 }
0x176a   :  { %v4172_v11 = vpop.f32.mrf.mxu0 }
0x176b   :  { %1728 = vrot.lane.b32.xlu1 %v1715_v24, %s5162_s29  ;;  %v1720_v16 = vadd.f32 %v1715_v24, %v1672_v15 }
0x176c   :  { %v1717_v12 = vpop.f32.mrf.mxu0 }
0x176d   :  { %v3873_v17 = vmul.f32 -1.442695, %v1720_v16 }
0x176e   :  { %v4173_v14 = vpop.f32.mrf.mxu0 }
0x176f   :  { %1751 = vperm.xlu1 %4395, %v3874_v13   ;;  %4482 = vpow2.f32 %v3873_v17  ;;  %v3880_v17 = vsel %vm1930_vm14, 1.0, %v5181_v18 }
0x177c   :  { %v4483_v19 = vpop.eup %4482 }
0x177d   :  { %v1724_v22 = vadd.f32 1.0, %v4483_v19 }
0x177f   :  { %4484 = vrcp.f32 %v1724_v22  ;;  %v1856_v22 = vld [vmem:[#allocation3 + $0x20] sm:$0xff] }
0x178c   :  { %v4485_v23 = vpop.eup %4484 }
0x178d   :  { %v1738_v35 = vsub.f32 1.0, %v4485_v23  ;;  %v1744_v32 = vmul.f32 %v4485_v23, %v1670_v4 }
0x17dd   :  { %v1729_v31 = vpop.permute.xlu1 %1728 }
0x17de   :  { %v1731_v26 = vmul.f32 %v4485_v23, %v1729_v31 }
0x17e0   :  { %1733 = vrot.lane.b32.xlu0 %v1731_v26, %s5162_s29 }
0x17e4   :  { %1758 = vperm.xlu0 %4396, %v1755_v27  }
0x17ea   :  { %v1752_v33 = vpop.permute.xlu1 %1751 }
0x1852   :  { %v1734_v28 = vpop.permute.xlu0 %1733 }
0x1853   :  { %v1736_v29 = vadd.f32 %v1734_v28, %v1672_v15 }
0x1855   :  { %4486 = vtanh.f32 %v1736_v29 }
0x185f   :  { %v1759_v40 = vpop.permute.xlu0 %1758 }
0x1860   :  { %v1761_v43 = vmul.f32 %v1759_v40, %v1670_v4 }
0x1862   :  { %v4487_v30 = vpop.eup %4486 }
0x1863   :  { %1740 = vrot.lane.b32.xlu1 %v4487_v30, %s5183_s8 }
0x18d5   :  { %v1741_v37 = vpop.permute.xlu1 %1740 }
0x18d6   :  { %v1743_v38 = vmul.f32 %v1741_v37, %v1738_v35 }
0x18d8   :  { %v1745_v41 = vadd.f32 %v1744_v32, %v1743_v38 }
0x18da   :  { %v1754_v44 = vmul.f32 %v1752_v33, %v1745_v41  ;;  %v1939_v33 = vsub.f32 1.0, %v3880_v17 }
0x18dc   :  { %v1762_v45 = vadd.f32 %v1761_v43, %v1754_v44 }
0x18de   :  { %v1765_v46 = vpack.c.bf16 %v1762_v45, %v1762_v45 }
0x18e0   :  { %1767 = vrot.lane.b32.xlu0 %v1765_v46, %s5183_s8 }
0x1952   :  { %v1768_v47 = vpop.permute.xlu0 %1767 }
0x1953   :  { %4179 = vmatmul.mubr.msk.bf16.vlgmr.msra.gmra.mxu1 %vm413_vm0, %v1768_v47 }
0x1954   :  { %4191 = vmatpush3.bf16.msra.mxu1 %v5616_v34  ;;  %4194 = vmatprep.mubr.msk.bf16.mxu1 %vm5182_vm1, %v5181_v18 }
0x1955   :  { %4192 = vmatprep.subr.bf16.mxu1 %v5181_v18 }
0x1958   :  { %4193 = vmatpush3.bf16.msra.mxu1 %v5621_v36 }
0x1959   :  { %4206 = vmatprep.subr.bf16.mxu1 %v5181_v18 }
0x1a13   :  { %v1806_v48 = vpop.f32.mrf.mxu1 }
0x1a14   :  { %v1807_v49 = vadd.f32 %v5638_v42, %v1806_v48 }
0x1a15   :  { %v4180_v50 = vpop.f32.mrf.mxu1 }
0x1a16   :  { %1820 = vrot.lane.b32.xlu1 %v1807_v49, %s5162_s29  ;;  %v1812_v55 = vadd.f32 %v1807_v49, %v1764_v54 }
0x1a17   :  { %v1809_v52 = vpop.f32.mrf.mxu1 }
0x1a18   :  { %v3876_v7 = vmul.f32 -1.442695, %v1812_v55 }
0x1a19   :  { %v4181_v53 = vpop.f32.mrf.mxu1 }
0x1a1a   :  { %1843 = vperm.xlu1 %4395, %v3877_v51   ;;  %4488 = vpow2.f32 %v3876_v7 }
0x1a27   :  { %v4489_v56 = vpop.eup %4488 }
0x1a28   :  { %v1816_v10 = vadd.f32 1.0, %v4489_v56  ;;  %v1948_v56 = vld [vmem:[#allocation3 + $0x28] sm:$0xff] }
0x1a2a   :  { %4490 = vrcp.f32 %v1816_v10 }
0x1a37   :  { %v4491_v57 = vpop.eup %4490 }
0x1a38   :  { %v1830_v63 = vsub.f32 1.0, %v4491_v57  ;;  %v1836_v3 = vmul.f32 %v4491_v57, %v1762_v45 }
0x1a88   :  { %v1821_v58 = vpop.permute.xlu1 %1820 }
0x1a89   :  { %v1823_v59 = vmul.f32 %v4491_v57, %v1821_v58 }
0x1a8b   :  { %1825 = vrot.lane.b32.xlu0 %v1823_v59, %s5162_s29 }
0x1a8f   :  { %1850 = vperm.xlu0 %4396, %v1847_v21  }
0x1a95   :  { %v1844_v25 = vpop.permute.xlu1 %1843 }
0x1afd   :  { %v1826_v60 = vpop.permute.xlu0 %1825 }
0x1afe   :  { %v1828_v61 = vadd.f32 %v1826_v60, %v1764_v54 }
0x1b00   :  { %4492 = vtanh.f32 %v1828_v61 }
0x1b0a   :  { %v1851_v4 = vpop.permute.xlu0 %1850 }
0x1b0b   :  { %v1853_v6 = vmul.f32 %v1851_v4, %v1762_v45 }
0x1b0d   :  { %v4493_v1 = vpop.eup %4492 }
0x1b0e   :  { %1832 = vrot.lane.b32.xlu1 %v4493_v1, %s5183_s8 }
0x1b80   :  { %v1833_v2 = vpop.permute.xlu1 %1832 }
0x1b81   :  { %v1835_v9 = vmul.f32 %v1833_v2, %v1830_v63 }
0x1b83   :  { %v1837_v5 = vadd.f32 %v1836_v3, %v1835_v9 }
0x1b85   :  { %v1846_v8 = vmul.f32 %v1844_v25, %v1837_v5 }
0x1b87   :  { %v1854_v24 = vadd.f32 %v1853_v6, %v1846_v8 }
0x1b89   :  { %v1857_v11 = vpack.c.bf16 %v1854_v24, %v1854_v24 }
0x1b8b   :  { %1859 = vrot.lane.b32.xlu0 %v1857_v11, %s5183_s8 }
0x1bfd   :  { %v1860_v12 = vpop.permute.xlu0 %1859 }
0x1bfe   :  { %4187 = vmatmul.mubr.msk.bf16.vlgmr.msra.gmra.mxu0 %vm413_vm0, %v1860_v12 }
0x1bff   :  { %4199 = vmatpush3.bf16.msra.mxu0 %v5616_v34  ;;  %4202 = vmatprep.mubr.msk.bf16.mxu0 %vm5182_vm1, %v5181_v18 }
0x1c00   :  { %4200 = vmatprep.subr.bf16.mxu0 %v5181_v18 }
0x1c03   :  { %4201 = vmatpush3.bf16.msra.mxu0 %v5621_v36 }
0x1c04   :  { %4214 = vmatprep.subr.bf16.mxu0 %v5181_v18 }
0x1cbe   :  { %v1898_v13 = vpop.f32.mrf.mxu0 }
0x1cbf   :  { %v1899_v14 = vadd.f32 %v5638_v42, %v1898_v13 }
0x1cc0   :  { %v4188_v15 = vpop.f32.mrf.mxu0 }
0x1cc1   :  { %1912 = vrot.lane.b32.xlu1 %v1899_v14, %s5162_s29  ;;  %v1904_v23 = vadd.f32 %v1899_v14, %v1856_v22 }
0x1cc2   :  { %v1901_v16 = vpop.f32.mrf.mxu0 }
0x1cc3   :  { %v3879_v31 = vmul.f32 -1.442695, %v1904_v23 }
0x1cc4   :  { %v4189_v19 = vpop.f32.mrf.mxu0 }
0x1cc5   :  { %1935 = vperm.xlu1 %4395, %v3880_v17   ;;  %4494 = vpow2.f32 %v3879_v31  ;;  %v2040_v31 = vld [vmem:[#allocation3 + $0x30] sm:$0xff] }
0x1cd2   :  { %v4495_v26 = vpop.eup %4494 }
0x1cd3   :  { %v1908_v27 = vadd.f32 1.0, %v4495_v26 }
0x1cd5   :  { %4496 = vrcp.f32 %v1908_v27 }
0x1ce2   :  { %v4497_v28 = vpop.eup %4496 }
0x1ce3   :  { %v1922_v40 = vsub.f32 1.0, %v4497_v28  ;;  %v1928_v43 = vmul.f32 %v4497_v28, %v1854_v24 }
0x1d33   :  { %v1913_v29 = vpop.permute.xlu1 %1912 }
0x1d34   :  { %v1915_v30 = vmul.f32 %v4497_v28, %v1913_v29 }
0x1d36   :  { %1917 = vrot.lane.b32.xlu0 %v1915_v30, %s5162_s29 }
0x1d3a   :  { %1942 = vperm.xlu0 %4396, %v1939_v33  }
0x1d40   :  { %v1936_v38 = vpop.permute.xlu1 %1935 }
0x1da8   :  { %v1918_v35 = vpop.permute.xlu0 %1917 }
0x1da9   :  { %v1920_v37 = vadd.f32 %v1918_v35, %v1856_v22  ;;  %v3886_v22 = vsel %vm2114_vm2, 1.0, %v5181_v18 }
0x1dab   :  { %4498 = vtanh.f32 %v1920_v37  ;;  %v2123_v37 = vsub.f32 1.0, %v3886_v22 }
0x1db5   :  { %v1943_v45 = vpop.permute.xlu0 %1942 }
0x1db6   :  { %v1945_v47 = vmul.f32 %v1943_v45, %v1854_v24 }
0x1db8   :  { %v4499_v32 = vpop.eup %4498 }
0x1db9   :  { %1924 = vrot.lane.b32.xlu1 %v4499_v32, %s5183_s8 }
0x1e2b   :  { %v1925_v41 = vpop.permute.xlu1 %1924 }
0x1e2c   :  { %v1927_v44 = vmul.f32 %v1925_v41, %v1922_v40  ;;  %v4614_v41 = vld [vmem:[#allocation14] ss:$0 sm:$0xff] }
0x1e2e   :  { %v1929_v46 = vadd.f32 %v1928_v43, %v1927_v44  ;;  %v1423_v43 = vadd.f32 %v4614_v41, %v5675_v39  ;;  %v4615_v44 = vld [vmem:[%s6097_s16] sm:$0xff] }
0x1e2f   :  { %vm1454_vm3 = vcmp.gt.s32.totalorder %v4615_v44, 7 }
0x1e30   :  { %v1938_v48 = vmul.f32 %v1936_v38, %v1929_v46  ;;  %v3863_v45 = vsel %vm1454_vm3, 1.0, %v5181_v18  ;;  %v1380_v46 = vld [vmem:[#allocation2 + $0x38] sm:$0xff] }
0x1e32   :  { %v1946_v49 = vadd.f32 %v1945_v47, %v1938_v48  ;;  %v1428_v47 = vadd.f32 %v1423_v43, %v1380_v46 }
0x1e34   :  { %v1949_v50 = vpack.c.bf16 %v1946_v49, %v1946_v49  ;;  %v3862_v48 = vmul.f32 -1.442695, %v1428_v47 }
0x1e36   :  { %1951 = vrot.lane.b32.xlu0 %v1949_v50, %s5183_s8 }
0x1ea8   :  { %v1952_v52 = vpop.permute.xlu0 %1951 }
0x1ea9   :  { %4195 = vmatmul.mubr.msk.bf16.vlgmr.msra.gmra.mxu1 %vm413_vm0, %v1952_v52 }
0x1eaa   :  { %4207 = vmatpush3.bf16.msra.mxu1 %v5616_v34  ;;  %4210 = vmatprep.mubr.msk.bf16.mxu1 %vm5182_vm1, %v5181_v18  ;;  %v3883_v34 = vsel %vm2022_vm15, 1.0, %v5181_v18 }
0x1eab   :  { %4208 = vmatprep.subr.bf16.mxu1 %v5181_v18  ;;  %v2031_v61 = vsub.f32 1.0, %v3883_v34 }
0x1eae   :  { %4209 = vmatpush3.bf16.msra.mxu1 %v5621_v36 }
0x1eaf   :  { %4222 = vmatprep.subr.bf16.mxu1 %v5181_v18 }
0x1f69   :  { %v1990_v51 = vpop.f32.mrf.mxu1 }
0x1f6a   :  { %v1991_v53 = vadd.f32 %v5638_v42, %v1990_v51 }
0x1f6b   :  { %v4196_v54 = vpop.f32.mrf.mxu1 }
0x1f6c   :  { %2004 = vrot.lane.b32.xlu1 %v1991_v53, %s5162_s29  ;;  %v1996_v10 = vadd.f32 %v1991_v53, %v1948_v56 }
0x1f6d   :  { %v1993_v55 = vpop.f32.mrf.mxu1 }
0x1f6e   :  { %v3882_v57 = vmul.f32 -1.442695, %v1996_v10 }
0x1f6f   :  { %v4197_v7 = vpop.f32.mrf.mxu1 }
0x1f70   :  { %2027 = vperm.xlu1 %4395, %v3883_v34   ;;  %4500 = vpow2.f32 %v3882_v57 }
0x1f7d   :  { %v4501_v36 = vpop.eup %4500 }
0x1f7e   :  { %v2000_v58 = vadd.f32 1.0, %v4501_v36 }
0x1f80   :  { %4502 = vrcp.f32 %v2000_v58 }
0x1f8d   :  { %v4503_v59 = vpop.eup %4502 }
0x1f8e   :  { %v2014_v3 = vsub.f32 1.0, %v4503_v59  ;;  %v2020_v4 = vmul.f32 %v4503_v59, %v1946_v49 }
0x1fde   :  { %v2005_v21 = vpop.permute.xlu1 %2004 }
0x1fdf   :  { %v2007_v60 = vmul.f32 %v4503_v59, %v2005_v21  ;;  %v1463_v21 = vsub.f32 1.0, %v3863_v45 }
0x1fe1   :  { %2009 = vrot.lane.b32.xlu0 %v2007_v60, %s5162_s29 }
0x1fe5   :  { %2034 = vperm.xlu0 %4396, %v2031_v61  }
0x1feb   :  { %v2028_v2 = vpop.permute.xlu1 %2027 }
0x2053   :  { %v2010_v1 = vpop.permute.xlu0 %2009 }
0x2054   :  { %v2012_v25 = vadd.f32 %v2010_v1, %v1948_v56 }
0x2056   :  { %4504 = vtanh.f32 %v2012_v25 }
0x2060   :  { %v2035_v6 = vpop.permute.xlu0 %2034 }
0x2061   :  { %v2037_v24 = vmul.f32 %v2035_v6, %v1946_v49 }
0x2063   :  { %v4505_v63 = vpop.eup %4504 }
0x2064   :  { %2016 = vrot.lane.b32.xlu1 %v4505_v63, %s5183_s8  ;;  %v4407_v63 = vld [vmem:[%s6101_s4 + $0x8] sm:$0xff]  }
0x20d6   :  { %v2017_v9 = vpop.permute.xlu1 %2016 }
0x20d7   :  { %v2019_v5 = vmul.f32 %v2017_v9, %v2014_v3 }
0x20d9   :  { %v2021_v8 = vadd.f32 %v2020_v4, %v2019_v5 }
0x20db   :  { %v2030_v11 = vmul.f32 %v2028_v2, %v2021_v8  ;;  %v4408_v2 = vld [vmem:[%s6101_s4] sm:$0xff]  }
0x20dd   :  { %v2038_v12 = vadd.f32 %v2037_v24, %v2030_v11 }
0x20df   :  { %v2041_v13 = vpack.c.bf16 %v2038_v12, %v2038_v12 }
0x20e1   :  { %2043 = vrot.lane.b32.xlu0 %v2041_v13, %s5183_s8 }
0x2153   :  { %v2044_v14 = vpop.permute.xlu0 %2043 }
0x2154   :  { %4203 = vmatmul.mubr.msk.bf16.vlgmr.msra.gmra.mxu0 %vm413_vm0, %v2044_v14 }
0x2155   :  { %4218 = vmatprep.mubr.msk.bf16.mxu0 %vm5182_vm1, %v5181_v18  ;;  %4215 = vmatpush3.bf16.msra.mxu0 %v4407_v63 }
0x2156   :  { %4216 = vmatprep.subr.bf16.mxu0 %v5181_v18 }
0x2159   :  { %4217 = vmatpush3.bf16.msra.mxu0 %v4408_v2 }
0x215a   :  { %4230 = vmatprep.subr.bf16.mxu0 %v5181_v18 }
0x2214   :  { %v2082_v15 = vpop.f32.mrf.mxu0 }
0x2215   :  { %v2083_v16 = vadd.f32 %v5638_v42, %v2082_v15 }
0x2216   :  { %v4204_v17 = vpop.f32.mrf.mxu0 }
0x2217   :  { %2096 = vrot.lane.b32.xlu1 %v2083_v16, %s5162_s29  ;;  %v2088_v26 = vadd.f32 %v2083_v16, %v2040_v31 }
0x2218   :  { %v2085_v19 = vpop.f32.mrf.mxu0 }
0x2219   :  { %v3885_v27 = vmul.f32 -1.442695, %v2088_v26 }
0x221a   :  { %v4205_v23 = vpop.f32.mrf.mxu0 }
0x221b   :  { %2119 = vperm.xlu1 %4395, %v3886_v22   ;;  %4506 = vpow2.f32 %v3885_v27  ;;  %v3889_v22 = vsel %vm2206_vm4, 1.0, %v5181_v18 }
0x2228   :  { %v4507_v28 = vpop.eup %4506 }
0x2229   :  { %v2092_v29 = vadd.f32 1.0, %v4507_v28 }
0x222b   :  { %4508 = vrcp.f32 %v2092_v29 }
0x2238   :  { %v4509_v30 = vpop.eup %4508 }
0x2239   :  { %v2106_v51 = vsub.f32 1.0, %v4509_v30  ;;  %v2112_v54 = vmul.f32 %v4509_v30, %v2038_v12 }
0x2289   :  { %v2097_v33 = vpop.permute.xlu1 %2096 }
0x228a   :  { %v2099_v35 = vmul.f32 %v4509_v30, %v2097_v33  ;;  %v2215_v33 = vsub.f32 1.0, %v3889_v22 }
0x228c   :  { %2101 = vrot.lane.b32.xlu0 %v2099_v35, %s5162_s29  ;;  %v4409_v35 = vld [vmem:[#allocation28 + $0x8] ss:$0 sps:$4 sm:$0xff]  }
0x2290   :  { %2126 = vperm.xlu0 %4396, %v2123_v37   ;;  %v2320_v37 = vsel %vm2318_vm5, %v4409_v35, 0 }
0x2296   :  { %v2120_v52 = vpop.permute.xlu1 %2119 }
0x22fe   :  { %v2102_v32 = vpop.permute.xlu0 %2101 }
0x22ff   :  { %v2104_v38 = vadd.f32 %v2102_v32, %v2040_v31  ;;  %v4410_v32 = vld [vmem:[#allocation28] sm:$0xff]  }
0x2301   :  { %4510 = vtanh.f32 %v2104_v38 }
0x2302   :  { %4512 = vpow2.f32 %v3862_v48 }
0x230b   :  { %v2127_v39 = vpop.permute.xlu0 %2126 }
0x230c   :  { %v2129_v7 = vmul.f32 %v2127_v39, %v2038_v12  ;;  %v4416_v39 = vld [vmem:[%s6103_s23] sm:$0xff]  }
0x230e   :  { %v4511_v40 = vpop.eup %4510 }
0x230f   :  { %2108 = vrot.lane.b32.xlu1 %v4511_v40, %s5183_s8  ;;  %v4513_v49 = vpop.eup %4512 }
0x2310   :  { %v1432_v50 = vadd.f32 1.0, %v4513_v49 }
0x2312   :  { %4514 = vrcp.f32 %v1432_v50  ;;  %v4411_v50 = vld [vmem:[%s6102_s19 + $0x8] sm:$0xff]  }
0x2313   :  { %1436 = vrot.lane.b32.xlu1 %v1423_v43, %s5162_s29  ;;  %v3890_v43 = vld [vmem:[#allocation25] ss:$0 sm:$0xff] }
0x2317   :  { %1459 = vperm.xlu1 %4395, %v3863_v45  }
0x231f   :  { %v4515_v58 = vpop.eup %4514 }
0x2320   :  { %v1446_v9 = vsub.f32 1.0, %v4515_v58  ;;  %v1452_v5 = vmul.f32 %v4515_v58, %v5655_v20 }
0x2381   :  { %v2109_v53 = vpop.permute.xlu1 %2108 }
0x2382   :  { %v2111_v55 = vmul.f32 %v2109_v53, %v2106_v51  ;;  %v4412_v51 = vld [vmem:[%s6102_s19] sm:$0xff]   ;;  %v4413_v53 = vld [vmem:[#allocation22 + $0x8] sm:$0xff]  }
0x2384   :  { %v2113_v34 = vadd.f32 %v2112_v54, %v2111_v55  ;;  %v4414_v54 = vld [vmem:[#allocation22] sm:$0xff]  }
0x2385   :  { %v1437_v36 = vpop.permute.xlu1 %1436  ;;  %v4415_v55 = vld [vmem:[%s6103_s23 + $0x8] sm:$0xff]  }
0x2386   :  { %v2122_v56 = vmul.f32 %v2120_v52, %v2113_v34  ;;  %v1439_v59 = vmul.f32 %v4515_v58, %v1437_v36 }
0x2388   :  { %v5753_v10 = vadd.f32 %v2129_v7, %v2122_v56 }
0x238a   :  { %v2133_v57 = vpack.c.bf16 %v5753_v10, %v5753_v10 }
0x238c   :  { %2135 = vrot.lane.b32.xlu0 %v2133_v57, %s5183_s8 }
0x2390   :  { %1441 = vrot.lane.b32.xlu0 %v1439_v59, %s5162_s29 }
0x2392   :  { %v1460_v3 = vpop.permute.xlu1 %1459 }
0x2394   :  { %1466 = vperm.xlu0 %4396, %v1463_v21  }
0x23fe   :  { %v2136_v60 = vpop.permute.xlu0 %2135 }
0x23ff   :  { %4211 = vmatmul.mubr.msk.bf16.vlgmr.msra.gmra.mxu1 %vm413_vm0, %v2136_v60 }
0x2400   :  { %4226 = vmatprep.mubr.msk.bf16.mxu1 %vm5182_vm1, %v5181_v18  ;;  %4223 = vmatpush3.bf16.msra.mxu1 %v2320_v37 }
0x2401   :  { %4224 = vmatprep.subr.bf16.mxu1 %v5181_v18 }
0x2402   :  { %v1442_v61 = vpop.permute.xlu0 %1441 }
0x2403   :  { %v1444_v1 = vadd.f32 %v1442_v61, %v1380_v46 }
0x2404   :  { %4225 = vmatpush3.bf16.msra.mxu1 %v4410_v32 }
0x2405   :  { %4516 = vtanh.f32 %v1444_v1  ;;  %4238 = vmatprep.subr.bf16.mxu1 %v5181_v18 }
0x240f   :  { %v1467_v8 = vpop.permute.xlu0 %1466 }
0x2410   :  { %v1469_v11 = vmul.f32 %v1467_v8, %v5655_v20  ;;  %v2132_v20 = vld [vmem:[#allocation3 + $0x38] sm:$0xff] }
0x2412   :  { %v4517_v25 = vpop.eup %4516 }
0x2413   :  { %1448 = vrot.lane.b32.xlu1 %v4517_v25, %s5183_s8  ;;  %v3894_v25 = vld [vmem:[#allocation26] ss:$0 sm:$0xff] }
0x2485   :  { %v1449_v4 = vpop.permute.xlu1 %1448 }
0x2486   :  { %v1451_v6 = vmul.f32 %v1449_v4, %v1446_v9 }
0x2488   :  { %v1453_v24 = vadd.f32 %v1452_v5, %v1451_v6 }
0x248a   :  { %v1462_v12 = vmul.f32 %v1460_v3, %v1453_v24 }
0x248c   :  { %v1470_v13 = vadd.f32 %v1469_v11, %v1462_v12 }
0x248e   :  { %v2223_v14 = vpack.c.bf16 %v1470_v13, %v1470_v13 }
0x2490   :  { %2236 = vrot.lane.b32.xlu0 %v2223_v14, %s5183_s8 }
0x24bf   :  { %v2174_v15 = vpop.f32.mrf.mxu1 }
0x24c0   :  { %v2175_v16 = vadd.f32 %v5638_v42, %v2174_v15  ;;  %v4417_v15 = vld [vmem:[#allocation34 + $0x8] ss:$0 sps:$4 sm:$0xff]  }
0x24c1   :  { %v4212_v17 = vpop.f32.mrf.mxu1 }
0x24c2   :  { %2188 = vrot.lane.b32.xlu1 %v2175_v16, %s5162_s29  ;;  %v2180_v26 = vadd.f32 %v2175_v16, %v2132_v20  ;;  %v2521_v16 = vsel %vm2318_vm5, %v4417_v15, 0  ;;  %v4418_v17 = vld [vmem:[#allocation34] sm:$0xff]  }
0x24c3   :  { %v2177_v19 = vpop.f32.mrf.mxu1 }
0x24c4   :  { %v3888_v27 = vmul.f32 -1.442695, %v2180_v26  ;;  %v2572_v19 = vld [vmem:[#allocation8] sm:$0xff] }
0x24c5   :  { %v4213_v23 = vpop.f32.mrf.mxu1 }
0x24c6   :  { %2211 = vperm.xlu1 %4395, %v3889_v22   ;;  %4518 = vpow2.f32 %v3888_v27  ;;  %v3904_v23 = vld [vmem:[#allocation31] ss:$0 sm:$0xff] }
0x24d3   :  { %v4519_v42 = vpop.eup %4518 }
0x24d4   :  { %v2184_v62 = vadd.f32 1.0, %v4519_v42 }
0x24d6   :  { %4520 = vrcp.f32 %v2184_v62 }
0x24e3   :  { %v4521_v28 = vpop.eup %4520 }
0x24e4   :  { %v2198_v7 = vsub.f32 1.0, %v4521_v28  ;;  %v2204_v57 = vmul.f32 %v4521_v28, %v5753_v10 }
0x2502   :  { %v2237_v31 = vpop.permute.xlu0 %2236 }
0x2503   :  { %4219 = vmatmul.mubr.msk.bf16.vlgmr.msra.gmra.mxu0 %vm413_vm0, %v2237_v31 }
0x2504   :  { %4234 = vmatprep.mubr.msk.bf16.mxu0 %vm5182_vm1, %v5181_v18  ;;  %4231 = vmatpush3.bf16.msra.mxu0 %v4415_v55 }
0x2505   :  { %4232 = vmatprep.subr.bf16.mxu0 %v5181_v18 }
0x2508   :  { %4233 = vmatpush3.bf16.msra.mxu0 %v4416_v39 }
0x2509   :  { %4246 = vmatprep.subr.bf16.mxu0 %v5181_v18 }
0x2534   :  { %v2189_v29 = vpop.permute.xlu1 %2188 }
0x2535   :  { %v2191_v30 = vmul.f32 %v4521_v28, %v2189_v29  ;;  %v4419_v29 = vld [vmem:[#allocation23] sm:$0xff]  }
0x2537   :  { %2193 = vrot.lane.b32.xlu0 %v2191_v30, %s5162_s29  ;;  %v3905_v30 = vld [vmem:[#allocation32] ss:$0 sm:$0xff] }
0x253b   :  { %2218 = vperm.xlu0 %4396, %v2215_v33  }
0x2541   :  { %v2212_v34 = vpop.permute.xlu1 %2211 }
0x25a9   :  { %v2194_v38 = vpop.permute.xlu0 %2193 }
0x25aa   :  { %v2196_v40 = vadd.f32 %v2194_v38, %v2132_v20 }
0x25ac   :  { %4522 = vtanh.f32 %v2196_v40 }
0x25b6   :  { %v2219_v58 = vpop.permute.xlu0 %2218 }
0x25b7   :  { %v2221_v21 = vmul.f32 %v2219_v58, %v5753_v10 }
0x25b9   :  { %v4523_v41 = vpop.eup %4522 }
0x25ba   :  { %2200 = vrot.lane.b32.xlu1 %v4523_v41, %s5183_s8 }
0x25be   :  { %2574 = vrot.lane.b32.xlu1 %v2572_v19, %s5184_s30 }
0x25c3   :  { %v2287_v44 = vpop.f32.mrf.mxu0 }
0x25c4   :  { %v2288_v45 = vadd.f32 %v3890_v43, %v2287_v44 }
0x25c5   :  { %v4220_v46 = vpop.f32.mrf.mxu0 }
0x25c6   :  { %4524 = vtanh.f32 %v2288_v45 }
0x25c7   :  { %v2290_v47 = vpop.f32.mrf.mxu0 }
0x25c9   :  { %v4221_v48 = vpop.f32.mrf.mxu0 }
0x25d3   :  { %v4525_v49 = vpop.eup %4524 }
0x25d4   :  { %v2294_v52 = vpack.c.bf16 %v4525_v49, %v4525_v49  ;;  %v5828_v49 = vld [vmem:[%s6104_s14 + $0x8] sm:$0xff]  }
0x25d6   :  { %4227 = vmatmul.mubr.msk.bf16.vlgmr.msra.gmra.mxu1 %vm2314_vm6, %v2294_v52 }
0x25d7   :  { %4239 = vmatpush3.bf16.msra.mxu1 %v4411_v50  ;;  %4242 = vmatprep.mubr.msk.bf16.mxu1 %vm5182_vm1, %v5181_v18  ;;  %v5833_v50 = vld [vmem:[%s6104_s14] sm:$0xff]  }
0x25d8   :  { %4240 = vmatprep.subr.bf16.mxu1 %v5181_v18 }
0x25db   :  { %4241 = vmatpush3.bf16.msra.mxu1 %v4412_v51  ;;  %v3914_v51 = vld [vmem:[#allocation20] ss:$0 sm:$0xff] }
0x25dc   :  { %4254 = vmatprep.subr.bf16.mxu1 %v5181_v18 }
0x25de   :  { %4243 = vmatmul.mubr.msk.bf16.vlgmr.msra.gmra.mxu1 %vm413_vm0, %v2237_v31 }
0x25df   :  { %4255 = vmatpush3.bf16.msra.mxu1 %v4413_v53  ;;  %4258 = vmatprep.mubr.msk.bf16.mxu1 %vm5182_vm1, %v5181_v18 }
0x25e0   :  { %4256 = vmatprep.subr.bf16.mxu1 %v5181_v18 }
0x25e3   :  { %4257 = vmatpush3.bf16.msra.mxu1 %v4414_v54 }
0x25e4   :  { %4268 = vmatprep.subr.bf16.mxu1 %v5181_v18 }
0x25e6   :  { %4259 = vmatmul.mubr.msk.bf16.vlgmr.msra.gmra.mxu1 %vm413_vm0, %v2237_v31 }
0x25e7   :  { %4272 = vmatprep.mubr.msk.bf16.mxu1 %vm5182_vm1, %v5181_v18  ;;  %4269 = vmatpush3.bf16.msra.mxu1 %v5828_v49 }
0x25e8   :  { %4270 = vmatprep.subr.bf16.mxu1 %v5181_v18 }
0x25eb   :  { %4271 = vmatpush3.bf16.msra.mxu1 %v5833_v50 }
0x25ec   :  { %4276 = vmatprep.subr.bf16.mxu1 %v5181_v18 }
0x262c   :  { %v2201_v56 = vpop.permute.xlu1 %2200 }
0x262d   :  { %v2203_v36 = vmul.f32 %v2201_v56, %v2198_v7  ;;  %v5844_v56 = vld [vmem:[#allocation10] ss:$0 sm:$0xff] }
0x262f   :  { %v2205_v59 = vadd.f32 %v2204_v57, %v2203_v36 }
0x2630   :  { %v2575_v43 = vpop.permute.xlu1 %2574 }
0x2631   :  { %v2214_v60 = vmul.f32 %v2212_v34, %v2205_v59 }
0x2633   :  { %v2222_v61 = vadd.f32 %v2221_v21, %v2214_v60  ;;  %v2726_v60 = vld [vmem:[#allocation4] sm:$0xff] }
0x2635   :  { %v2373_v1 = vpack.c.bf16 %v2222_v61, %v2222_v61 }
0x2637   :  { %2379 = vrot.lane.b32.xlu0 %v2373_v1, %s5183_s8 }
0x2696   :  { %v2356_v63 = vpop.f32.mrf.mxu1 }
0x2697   :  { %v5804_v2 = vadd.f32 %v3894_v25, %v2356_v63 }
0x2698   :  { %v4228_v3 = vpop.f32.mrf.mxu1 }
0x2699   :  { %2363 = vst.msk [vmem:[#allocation36] sm:$0xff] %vm2362_vm7, %v5804_v2 }
0x269a   :  { %v2359_v9 = vpop.f32.mrf.mxu1 }
0x269c   :  { %v4229_v4 = vpop.f32.mrf.mxu1 }
0x269e   :  { %v2482_v5 = vpop.f32.mrf.mxu1 }
0x26a0   :  { %v4244_v6 = vpop.f32.mrf.mxu1 }
0x26a2   :  { %v2485_v8 = vpop.f32.mrf.mxu1 }
0x26a3   :  { %v5850_v8 = vld [vmem:[%s6105_s28 + $0x14] ss:$8 sps:$4 sm:$0xff]  }
0x26a4   :  { %v4245_v10 = vpop.f32.mrf.mxu1 }
0x26a5   :  { %v5853_v10 = vld [vmem:[%s6105_s28 + $0x10] ss:$8 sps:$4 sm:$0xff]  }
0x26a6   :  { %v2636_v24 = vpop.f32.mrf.mxu1 }
0x26a8   :  { %v4260_v11 = vpop.f32.mrf.mxu1 }
0x26a9   :  { %v2380_v12 = vpop.permute.xlu0 %2379  ;;  %v5861_v11 = vld [vmem:[%s6105_s28] ss:$8 sps:$4 sm:$0xff]  }
0x26aa   :  { %4235 = vmatmul.mubr.msk.bf16.vlgmr.msra.gmra.mxu0 %vm413_vm0, %v2380_v12  ;;  %v2639_v13 = vpop.f32.mrf.mxu1 }
0x26ab   :  { %4250 = vmatprep.mubr.msk.bf16.mxu0 %vm5182_vm1, %v5181_v18  ;;  %4247 = vmatpush3.bf16.msra.mxu0 %v2521_v16 }
0x26ac   :  { %v4261_v14 = vpop.f32.mrf.mxu1  ;;  %4248 = vmatprep.subr.bf16.mxu0 %v5181_v18 }
0x26af   :  { %4249 = vmatpush3.bf16.msra.mxu0 %v4418_v17 }
0x26b0   :  { %4262 = vmatprep.subr.bf16.mxu0 %v5181_v18 }
0x276a   :  { %v2430_v22 = vpop.f32.mrf.mxu0 }
0x276b   :  { %v2483_v31 = vadd.f32 %v2482_v5, %v2430_v22 }
0x276c   :  { %v4236_v20 = vpop.f32.mrf.mxu0 }
0x276d   :  { %v2495_v26 = vadd.f32 %v3904_v23, %v2483_v31 }
0x276e   :  { %v2433_v27 = vpop.f32.mrf.mxu0 }
0x276f   :  { %4526 = vtanh.f32 %v2495_v26 }
0x2770   :  { %v4237_v42 = vpop.f32.mrf.mxu0 }
0x277c   :  { %v4527_v62 = vpop.eup %4526 }
0x277d   :  { %v2497_v28 = vpack.c.bf16 %v4527_v62, %v4527_v62 }
0x277f   :  { %4251 = vmatmul.mubr.msk.bf16.vlgmr.msra.gmra.mxu0 %vm2314_vm6, %v2497_v28 }
0x2780   :  { %4264 = vmatprep.mubr.msk.bf16.mxu0 %vm5182_vm1, %v5181_v18  ;;  %4263 = vmatpush3.bf16.msra.mxu0 %v4419_v29 }
0x2781   :  { %2852 = vmatprep.subr.bf16.mxu0 %v5850_v8 }
0x283f   :  { %v2557_v33 = vpop.f32.mrf.mxu0 }
0x2840   :  { %v5818_v35 = vadd.f32 %v3905_v30, %v2557_v33  ;;  %v2899_v33 = vld [vmem:[#allocation4 + $0x8] sm:$0xff] }
0x2841   :  { %v4252_v37 = vpop.f32.mrf.mxu0 }
0x2842   :  { %v2569_v32 = vmul.f32 0.5, %v5818_v35  ;;  %2563 = vst.msk [vmem:[#allocation39] sm:$0xff] %vm2362_vm7, %v5818_v35 }
0x2843   :  { %v2560_v38 = vpop.f32.mrf.mxu0 }
0x2844   :  { %v2570_v40 = vmul.f32 1.442695, %v2569_v32 }
0x2845   :  { %v4253_v41 = vpop.f32.mrf.mxu0 }
0x2846   :  { %4528 = vpow2.f32 %v2570_v40 }
0x2853   :  { %v4529_v44 = vpop.eup %4528 }
0x2854   :  { %v2577_v45 = vmul.f32 %v4529_v44, %v2575_v43 }
0x2856   :  { %2579 = vrot.lane.b32.xlu0 %v2577_v45, %s5185_s13 }
0x28c8   :  { %v2580_v46 = vpop.permute.xlu0 %2579 }
0x28c9   :  { %v2582_v47 = vadd.f32 %v2580_v46, %v5818_v35 }
0x28cb   :  { %v2583_v48 = vpack.c.bf16 %v2582_v47, %v2582_v47 }
0x28cd   :  { %4265 = vmatmul.mubr.msk.bf16.vlgmr.msra.gmra.mxu0 %vm2362_vm7, %v2583_v48 }
0x28ce   :  { %2872 = vmatprep.mubr.bf16.mxu0 %v5180_v0  ;;  %2853 = vmatpush1.bf16.msra.mxu0 %v5853_v10 }
0x298d   :  { %v2685_v52 = vpop.f32.mrf.mxu0 }
0x298e   :  { %v2686_v53 = vadd.f32 %v2685_v52, %v2636_v24  ;;  %v5856_v24 = vld [vmem:[%s6105_s28 + $0x4] ss:$8 sps:$4 sm:$0xff]  }
0x298f   :  { %v4266_v54 = vpop.f32.mrf.mxu0  ;;  %2854 = vmatprep.subr.bf16.mxu0 %v5856_v24 }
0x2990   :  { %v2698_v55 = vadd.f32 %v3914_v51, %v2686_v53  ;;  %2855 = vmatpush1.bf16.msra.mxu0 %v5861_v11 }
0x2991   :  { %v2688_v39 = vpop.f32.mrf.mxu0  ;;  %2985 = vmatprep.subr.bf16.mxu0 %v5850_v8 }
0x2992   :  { %v2727_v34 = vpack.c.bf16 %v2698_v55, %v2698_v55 }
0x2993   :  { %v4267_v7 = vpop.f32.mrf.mxu0 }
0x2994   :  { %4273 = vmatmul.mubr.msk.bf16.vlgmr.msra.gmra.mxu1 %vm413_vm0, %v2727_v34 }
0x2995   :  { %4277 = vmatpush3.bf16.msra.mxu1 %v5828_v49  ;;  %4280 = vmatprep.mubr.msk.bf16.mxu1 %vm5182_vm1, %v5181_v18 }
0x2996   :  { %4278 = vmatprep.subr.bf16.mxu1 %v5181_v18 }
0x2999   :  { %4279 = vmatpush3.bf16.msra.mxu1 %v5833_v50 }
0x299a   :  { %4284 = vmatprep.subr.bf16.mxu1 %v5181_v18 }
0x2a54   :  { %v2777_v57 = vpop.f32.mrf.mxu1 }
0x2a55   :  { %v2778_v36 = vadd.f32 %v5844_v56, %v2777_v57 }
0x2a56   :  { %v4274_v58 = vpop.f32.mrf.mxu1 }
0x2a57   :  { %2791 = vrot.lane.b32.xlu1 %v2778_v36, %s5162_s29  ;;  %v2783_v61 = vadd.f32 %v2778_v36, %v2726_v60 }
0x2a58   :  { %v2780_v59 = vpop.f32.mrf.mxu1 }
0x2a59   :  { %v3919_v1 = vmul.f32 -1.442695, %v2783_v61 }
0x2a5a   :  { %v4275_v21 = vpop.f32.mrf.mxu1 }
0x2a5b   :  { %4530 = vpow2.f32 %v3919_v1  ;;  %v3033_v1 = vld [vmem:[#allocation4 + $0x10] sm:$0xff] }
0x2a68   :  { %v4531_v25 = vpop.eup %4530 }
0x2a69   :  { %v2787_v63 = vadd.f32 1.0, %v4531_v25 }
0x2a6b   :  { %4532 = vrcp.f32 %v2787_v63 }
0x2a78   :  { %v4533_v3 = vpop.eup %4532 }
0x2a79   :  { %v2801_v14 = vsub.f32 1.0, %v4533_v3 }
0x2ac9   :  { %v2792_v9 = vpop.permute.xlu1 %2791 }
0x2aca   :  { %v2794_v4 = vmul.f32 %v4533_v3, %v2792_v9 }
0x2acc   :  { %2796 = vrot.lane.b32.xlu0 %v2794_v4, %s5162_s29 }
0x2ad0   :  { %2808 = vrot.lane.b32.xlu0 %v2698_v55, %s5186_s0 }
0x2b3e   :  { %v2797_v5 = vpop.permute.xlu0 %2796 }
0x2b3f   :  { %v2799_v6 = vadd.f32 %v2797_v5, %v2726_v60 }
0x2b41   :  { %4534 = vtanh.f32 %v2799_v6 }
0x2b42   :  { %v2809_v13 = vpop.permute.xlu0 %2808 }
0x2b43   :  { %v2811_v16 = vmul.f32 %v4533_v3, %v2809_v13 }
0x2b4e   :  { %v4535_v12 = vpop.eup %4534 }
0x2b4f   :  { %2803 = vrot.lane.b32.xlu1 %v4535_v12, %s5183_s8 }
0x2bc1   :  { %v2804_v15 = vpop.permute.xlu1 %2803 }
0x2bc2   :  { %v2806_v17 = vmul.f32 %v2804_v15, %v2801_v14 }
0x2bc4   :  { %v2812_v19 = vadd.f32 %v2811_v16, %v2806_v17 }
0x2bc6   :  { %v2813_v22 = vpack.c.bf16 %v2812_v19, %v2812_v19 }
0x2bc8   :  { %2815 = vrot.lane.b32.xlu1 %v2813_v22, %s5183_s8 }
0x2c3a   :  { %v2816_v23 = vpop.permute.xlu1 %2815 }
0x2c3b   :  { %3924 = vmatmul.mubr.msk.bf16.vlgmr.msra.gmra.mxu0 %vm413_vm0, %v2816_v23  ;;  %4281 = vmatmul.mubr.msk.bf16.vlgmr.msra.gmra.mxu1 %vm413_vm0, %v2816_v23 }
0x2c3c   :  { %2986 = vmatpush1.bf16.msra.mxu0 %v5853_v10  ;;  %4285 = vmatpush3.bf16.msra.mxu1 %v5828_v49 }
0x2c3d   :  { %2987 = vmatprep.subr.bf16.mxu0 %v5856_v24  ;;  %4286 = vmatprep.subr.bf16.mxu1 %v5181_v18 }
0x2c3e   :  { %3005 = vmatprep.mubr.bf16.mxu0 %v5180_v0  ;;  %4288 = vmatprep.mubr.msk.bf16.mxu1 %vm5182_vm1, %v5181_v18 }
0x2c40   :  { %2988 = vmatpush1.bf16.msra.mxu0 %v5861_v11  ;;  %4287 = vmatpush3.bf16.msra.mxu1 %v5833_v50 }
0x2c41   :  { %3119 = vmatprep.subr.bf16.mxu0 %v5850_v8  ;;  %4292 = vmatprep.subr.bf16.mxu1 %v5181_v18 }
0x2cfb   :  { %v5881_v31 = vpop.f32.mrf.mxu0  ;;  %v2934_v20 = vpop.f32.mrf.mxu1 }
0x2cfc   :  { %v2935_v26 = vadd.f32 %v5844_v56, %v2934_v20 }
0x2cfd   :  { %v5884_v27 = vpop.f32.mrf.mxu0  ;;  %v4282_v42 = vpop.f32.mrf.mxu1 }
0x2cfe   :  { %2948 = vrot.lane.b32.xlu0 %v2935_v26, %s5162_s29  ;;  %v2940_v37 = vadd.f32 %v2935_v26, %v2899_v33 }
0x2cff   :  { %v2878_v62 = vpop.f32.mrf.mxu0  ;;  %v2937_v28 = vpop.f32.mrf.mxu1 }
0x2d00   :  { %v3926_v32 = vmul.f32 -1.442695, %v2940_v37 }
0x2d01   :  { %v2879_v29 = vpop.f32.mrf.mxu0  ;;  %v4283_v30 = vpop.f32.mrf.mxu1 }
0x2d02   :  { %4536 = vpow2.f32 %v3926_v32 }
0x2d0f   :  { %v4537_v38 = vpop.eup %4536 }
0x2d10   :  { %v2944_v40 = vadd.f32 1.0, %v4537_v38  ;;  %v3167_v38 = vld [vmem:[#allocation4 + $0x18] sm:$0xff] }
0x2d12   :  { %4538 = vrcp.f32 %v2944_v40 }
0x2d1f   :  { %v4539_v41 = vpop.eup %4538 }
0x2d20   :  { %v2958_v48 = vsub.f32 1.0, %v4539_v41  ;;  %v2964_v51 = vmul.f32 %v4539_v41, %v2812_v19 }
0x2d70   :  { %v2949_v43 = vpop.permute.xlu0 %2948 }
0x2d71   :  { %v2951_v44 = vmul.f32 %v4539_v41, %v2949_v43 }
0x2d73   :  { %2953 = vrot.lane.b32.xlu1 %v2951_v44, %s5162_s29 }
0x2de5   :  { %v2954_v45 = vpop.permute.xlu1 %2953 }
0x2de6   :  { %v2956_v46 = vadd.f32 %v2954_v45, %v2899_v33 }
0x2de8   :  { %4540 = vtanh.f32 %v2956_v46 }
0x2df5   :  { %v4541_v47 = vpop.eup %4540 }
0x2df6   :  { %2960 = vrot.lane.b32.xlu0 %v4541_v47, %s5183_s8 }
0x2e68   :  { %v2961_v52 = vpop.permute.xlu0 %2960 }
0x2e69   :  { %v2963_v53 = vmul.f32 %v2961_v52, %v2958_v48 }
0x2e6b   :  { %v2965_v54 = vadd.f32 %v2964_v51, %v2963_v53 }
0x2e6d   :  { %v2966_v55 = vpack.c.bf16 %v2965_v54, %v2965_v54 }
0x2e6f   :  { %2968 = vrot.lane.b32.xlu1 %v2966_v55, %s5183_s8 }
0x2ee1   :  { %v2969_v39 = vpop.permute.xlu1 %2968 }
0x2ee2   :  { %3927 = vmatmul.mubr.msk.bf16.vlgmr.msra.gmra.mxu0 %vm413_vm0, %v2969_v39  ;;  %4289 = vmatmul.mubr.msk.bf16.vlgmr.msra.gmra.mxu1 %vm413_vm0, %v2969_v39 }
0x2ee3   :  { %3120 = vmatpush1.bf16.msra.mxu0 %v5853_v10  ;;  %4293 = vmatpush3.bf16.msra.mxu1 %v5828_v49 }
0x2ee4   :  { %3121 = vmatprep.subr.bf16.mxu0 %v5856_v24  ;;  %4294 = vmatprep.subr.bf16.mxu1 %v5181_v18 }
0x2ee5   :  { %3139 = vmatprep.mubr.bf16.mxu0 %v5180_v0  ;;  %4296 = vmatprep.mubr.msk.bf16.mxu1 %vm5182_vm1, %v5181_v18 }
0x2ee7   :  { %3122 = vmatpush1.bf16.msra.mxu0 %v5861_v11  ;;  %4295 = vmatpush3.bf16.msra.mxu1 %v5833_v50 }
0x2ee8   :  { %3253 = vmatprep.subr.bf16.mxu0 %v5850_v8  ;;  %4300 = vmatprep.subr.bf16.mxu1 %v5181_v18 }
0x2fa2   :  { %v5903_v34 = vpop.f32.mrf.mxu0  ;;  %v3068_v7 = vpop.f32.mrf.mxu1 }
0x2fa3   :  { %v3069_v57 = vadd.f32 %v5844_v56, %v3068_v7 }
0x2fa4   :  { %v5906_v36 = vpop.f32.mrf.mxu0  ;;  %v4290_v58 = vpop.f32.mrf.mxu1 }
0x2fa5   :  { %3082 = vrot.lane.b32.xlu0 %v3069_v57, %s5162_s29  ;;  %v3074_v25 = vadd.f32 %v3069_v57, %v3033_v1 }
0x2fa6   :  { %v3011_v59 = vpop.f32.mrf.mxu0  ;;  %v3071_v21 = vpop.f32.mrf.mxu1 }
0x2fa7   :  { %v3929_v63 = vmul.f32 -1.442695, %v3074_v25 }
0x2fa8   :  { %v3012_v60 = vpop.f32.mrf.mxu0  ;;  %v4291_v61 = vpop.f32.mrf.mxu1 }
0x2fa9   :  { %4542 = vpow2.f32 %v3929_v63 }
0x2fb6   :  { %v4543_v3 = vpop.eup %4542 }
0x2fb7   :  { %v3078_v9 = vadd.f32 1.0, %v4543_v3 }
0x2fb9   :  { %4544 = vrcp.f32 %v3078_v9 }
0x2fc6   :  { %v4545_v4 = vpop.eup %4544 }
0x2fc7   :  { %v3092_v15 = vsub.f32 1.0, %v4545_v4  ;;  %v3098_v17 = vmul.f32 %v4545_v4, %v2965_v54 }
0x3017   :  { %v3083_v5 = vpop.permute.xlu0 %3082 }
0x3018   :  { %v3085_v6 = vmul.f32 %v4545_v4, %v3083_v5  ;;  %v3301_v4 = vld [vmem:[#allocation4 + $0x20] sm:$0xff] }
0x301a   :  { %3087 = vrot.lane.b32.xlu1 %v3085_v6, %s5162_s29 }
0x308c   :  { %v3088_v12 = vpop.permute.xlu1 %3087 }
0x308d   :  { %v3090_v13 = vadd.f32 %v3088_v12, %v3033_v1 }
0x308f   :  { %4546 = vtanh.f32 %v3090_v13 }
0x309c   :  { %v4547_v14 = vpop.eup %4546 }
0x309d   :  { %3094 = vrot.lane.b32.xlu0 %v4547_v14, %s5183_s8 }
0x310f   :  { %v3095_v16 = vpop.permute.xlu0 %3094 }
0x3110   :  { %v3097_v19 = vmul.f32 %v3095_v16, %v3092_v15 }
0x3112   :  { %v3099_v22 = vadd.f32 %v3098_v17, %v3097_v19 }
0x3114   :  { %v3100_v23 = vpack.c.bf16 %v3099_v22, %v3099_v22 }
0x3116   :  { %3102 = vrot.lane.b32.xlu1 %v3100_v23, %s5183_s8 }
0x3188   :  { %v3103_v20 = vpop.permute.xlu1 %3102 }
0x3189   :  { %3930 = vmatmul.mubr.msk.bf16.vlgmr.msra.gmra.mxu0 %vm413_vm0, %v3103_v20  ;;  %4297 = vmatmul.mubr.msk.bf16.vlgmr.msra.gmra.mxu1 %vm413_vm0, %v3103_v20 }
0x318a   :  { %3254 = vmatpush1.bf16.msra.mxu0 %v5853_v10  ;;  %4301 = vmatpush3.bf16.msra.mxu1 %v5828_v49 }
0x318b   :  { %3255 = vmatprep.subr.bf16.mxu0 %v5856_v24  ;;  %4302 = vmatprep.subr.bf16.mxu1 %v5181_v18 }
0x318c   :  { %3273 = vmatprep.mubr.bf16.mxu0 %v5180_v0  ;;  %4304 = vmatprep.mubr.msk.bf16.mxu1 %vm5182_vm1, %v5181_v18 }
0x318e   :  { %3256 = vmatpush1.bf16.msra.mxu0 %v5861_v11  ;;  %4303 = vmatpush3.bf16.msra.mxu1 %v5833_v50 }
0x318f   :  { %3387 = vmatprep.subr.bf16.mxu0 %v5850_v8  ;;  %4308 = vmatprep.subr.bf16.mxu1 %v5181_v18 }
0x3249   :  { %v5925_v26 = vpop.f32.mrf.mxu0  ;;  %v3202_v42 = vpop.f32.mrf.mxu1 }
0x324a   :  { %v3203_v62 = vadd.f32 %v5844_v56, %v3202_v42 }
0x324b   :  { %v5928_v28 = vpop.f32.mrf.mxu0  ;;  %v4298_v29 = vpop.f32.mrf.mxu1 }
0x324c   :  { %3216 = vrot.lane.b32.xlu0 %v3203_v62, %s5162_s29  ;;  %v3208_v40 = vadd.f32 %v3203_v62, %v3167_v38 }
0x324d   :  { %v3145_v30 = vpop.f32.mrf.mxu0  ;;  %v3205_v33 = vpop.f32.mrf.mxu1 }
0x324e   :  { %v3932_v41 = vmul.f32 -1.442695, %v3208_v40 }
0x324f   :  { %v3146_v37 = vpop.f32.mrf.mxu0  ;;  %v4299_v32 = vpop.f32.mrf.mxu1 }
0x3250   :  { %4548 = vpow2.f32 %v3932_v41 }
0x325d   :  { %v4549_v43 = vpop.eup %4548 }
0x325e   :  { %v3212_v44 = vadd.f32 1.0, %v4549_v43 }
0x3260   :  { %4550 = vrcp.f32 %v3212_v44 }
0x326d   :  { %v4551_v45 = vpop.eup %4550 }
0x326e   :  { %v3226_v53 = vsub.f32 1.0, %v4551_v45  ;;  %v3232_v55 = vmul.f32 %v4551_v45, %v3099_v22 }
0x32be   :  { %v3217_v46 = vpop.permute.xlu0 %3216 }
0x32bf   :  { %v3219_v47 = vmul.f32 %v4551_v45, %v3217_v46  ;;  %v3435_v45 = vld [vmem:[#allocation4 + $0x28] sm:$0xff] }
0x32c1   :  { %3221 = vrot.lane.b32.xlu1 %v3219_v47, %s5162_s29 }
0x3333   :  { %v3222_v48 = vpop.permute.xlu1 %3221 }
0x3334   :  { %v3224_v52 = vadd.f32 %v3222_v48, %v3167_v38 }
0x3336   :  { %4552 = vtanh.f32 %v3224_v52 }
0x3343   :  { %v4553_v51 = vpop.eup %4552 }
0x3344   :  { %3228 = vrot.lane.b32.xlu0 %v4553_v51, %s5183_s8 }
0x33b6   :  { %v3229_v54 = vpop.permute.xlu0 %3228 }
0x33b7   :  { %v3231_v39 = vmul.f32 %v3229_v54, %v3226_v53 }
0x33b9   :  { %v3233_v7 = vadd.f32 %v3232_v55, %v3231_v39 }
0x33bb   :  { %v3234_v57 = vpack.c.bf16 %v3233_v7, %v3233_v7 }
0x33bd   :  { %3236 = vrot.lane.b32.xlu1 %v3234_v57, %s5183_s8 }
0x342f   :  { %v3237_v58 = vpop.permute.xlu1 %3236 }
0x3430   :  { %3933 = vmatmul.mubr.msk.bf16.vlgmr.msra.gmra.mxu0 %vm413_vm0, %v3237_v58  ;;  %4305 = vmatmul.mubr.msk.bf16.vlgmr.msra.gmra.mxu1 %vm413_vm0, %v3237_v58 }
0x3431   :  { %3388 = vmatpush1.bf16.msra.mxu0 %v5853_v10  ;;  %4309 = vmatpush3.bf16.msra.mxu1 %v5828_v49 }
0x3432   :  { %3389 = vmatprep.subr.bf16.mxu0 %v5856_v24  ;;  %4310 = vmatprep.subr.bf16.mxu1 %v5181_v18 }
0x3433   :  { %3407 = vmatprep.mubr.bf16.mxu0 %v5180_v0  ;;  %4312 = vmatprep.mubr.msk.bf16.mxu1 %vm5182_vm1, %v5181_v18 }
0x3435   :  { %3390 = vmatpush1.bf16.msra.mxu0 %v5861_v11  ;;  %4311 = vmatpush3.bf16.msra.mxu1 %v5833_v50 }
0x3436   :  { %3521 = vmatprep.subr.bf16.mxu0 %v5850_v8  ;;  %4316 = vmatprep.subr.bf16.mxu1 %v5181_v18 }
0x34f0   :  { %v5947_v59 = vpop.f32.mrf.mxu0  ;;  %v3336_v21 = vpop.f32.mrf.mxu1 }
0x34f1   :  { %v3337_v60 = vadd.f32 %v5844_v56, %v3336_v21 }
0x34f2   :  { %v5950_v61 = vpop.f32.mrf.mxu0  ;;  %v4306_v1 = vpop.f32.mrf.mxu1 }
0x34f3   :  { %3350 = vrot.lane.b32.xlu0 %v3337_v60, %s5162_s29  ;;  %v3342_v5 = vadd.f32 %v3337_v60, %v3301_v4 }
0x34f4   :  { %v3279_v25 = vpop.f32.mrf.mxu0  ;;  %v3339_v63 = vpop.f32.mrf.mxu1 }
0x34f5   :  { %v3935_v6 = vmul.f32 -1.442695, %v3342_v5 }
0x34f6   :  { %v3280_v3 = vpop.f32.mrf.mxu0  ;;  %v4307_v9 = vpop.f32.mrf.mxu1 }
0x34f7   :  { %4554 = vpow2.f32 %v3935_v6 }
0x3504   :  { %v4555_v12 = vpop.eup %4554 }
0x3505   :  { %v3346_v13 = vadd.f32 1.0, %v4555_v12 }
0x3507   :  { %4556 = vrcp.f32 %v3346_v13 }
0x3514   :  { %v4557_v14 = vpop.eup %4556 }
0x3515   :  { %v3360_v23 = vsub.f32 1.0, %v4557_v14  ;;  %v3366_v42 = vmul.f32 %v4557_v14, %v3233_v7 }
0x3565   :  { %v3351_v15 = vpop.permute.xlu0 %3350 }
0x3566   :  { %v3353_v16 = vmul.f32 %v4557_v14, %v3351_v15  ;;  %v3569_v14 = vld [vmem:[#allocation4 + $0x30] sm:$0xff] }
0x3568   :  { %3355 = vrot.lane.b32.xlu1 %v3353_v16, %s5162_s29 }
0x35da   :  { %v3356_v17 = vpop.permute.xlu1 %3355 }
0x35db   :  { %v3358_v19 = vadd.f32 %v3356_v17, %v3301_v4 }
0x35dd   :  { %4558 = vtanh.f32 %v3358_v19 }
0x35ea   :  { %v4559_v22 = vpop.eup %4558 }
0x35eb   :  { %3362 = vrot.lane.b32.xlu0 %v4559_v22, %s5183_s8 }
0x365d   :  { %v3363_v20 = vpop.permute.xlu0 %3362 }
0x365e   :  { %v3365_v62 = vmul.f32 %v3363_v20, %v3360_v23  ;;  %v2716_v23 = vlaneseq }
0x3660   :  { %v3367_v29 = vadd.f32 %v3366_v42, %v3365_v62  ;;  %v2717_v20 = vshrl.u32 %v2716_v23, 7 }
0x3662   :  { %v3368_v30 = vpack.c.bf16 %v3367_v29, %v3367_v29  ;;  %v2722_v42 = vsub.s32 1, %v2717_v20  ;;  %v2718_v62 = vsub.s32 0, %v2717_v20 }
0x3664   :  { %3370 = vrot.lane.b32.xlu1 %v3368_v30, %s5183_s8 }
0x36d6   :  { %v3371_v33 = vpop.permute.xlu1 %3370 }
0x36d7   :  { %3936 = vmatmul.mubr.msk.bf16.vlgmr.msra.gmra.mxu0 %vm413_vm0, %v3371_v33  ;;  %4313 = vmatmul.mubr.msk.bf16.vlgmr.msra.gmra.mxu1 %vm413_vm0, %v3371_v33 }
0x36d8   :  { %3522 = vmatpush1.bf16.msra.mxu0 %v5853_v10  ;;  %4317 = vmatpush3.bf16.msra.mxu1 %v5828_v49 }
0x36d9   :  { %3523 = vmatprep.subr.bf16.mxu0 %v5856_v24  ;;  %4318 = vmatprep.subr.bf16.mxu1 %v5181_v18 }
0x36da   :  { %3541 = vmatprep.mubr.bf16.mxu0 %v5180_v0  ;;  %4320 = vmatprep.mubr.msk.bf16.mxu1 %vm5182_vm1, %v5181_v18 }
0x36dc   :  { %3524 = vmatpush1.bf16.msra.mxu0 %v5861_v11  ;;  %4319 = vmatpush3.bf16.msra.mxu1 %v5833_v50 }
0x36dd   :  { %3655 = vmatprep.subr.bf16.mxu0 %v5850_v8 }
0x3797   :  { %v5968_v37 = vpop.f32.mrf.mxu0  ;;  %v3470_v32 = vpop.f32.mrf.mxu1 }
0x3798   :  { %v3471_v49 = vadd.f32 %v5844_v56, %v3470_v32 }
0x3799   :  { %v5971_v38 = vpop.f32.mrf.mxu0  ;;  %v4314_v40 = vpop.f32.mrf.mxu1 }
0x379a   :  { %3484 = vrot.lane.b32.xlu0 %v3471_v49, %s5162_s29  ;;  %v3476_v46 = vadd.f32 %v3471_v49, %v3435_v45 }
0x379b   :  { %v3413_v41 = vpop.f32.mrf.mxu0  ;;  %v3473_v43 = vpop.f32.mrf.mxu1 }
0x379c   :  { %v3938_v47 = vmul.f32 -1.442695, %v3476_v46 }
0x379d   :  { %v3414_v44 = vpop.f32.mrf.mxu0  ;;  %v4315_v18 = vpop.f32.mrf.mxu1 }
0x379e   :  { %4560 = vpow2.f32 %v3938_v47 }
0x37ab   :  { %v4561_v50 = vpop.eup %4560 }
0x37ac   :  { %v3480_v8 = vadd.f32 1.0, %v4561_v50 }
0x37ae   :  { %4562 = vrcp.f32 %v3480_v8 }
0x37bb   :  { %v4563_v48 = vpop.eup %4562 }
0x37bc   :  { %v3494_v39 = vsub.f32 1.0, %v4563_v48  ;;  %v3500_v57 = vmul.f32 %v4563_v48, %v3367_v29  ;;  %v2714_v29 = vld [vmem:[#allocation29] sm:$0x3] }
0x37bd   :  { %v5989_v30 = vrot.slane %v2714_v29, %v2722_v42  ;;  %v5991_v33 = vrot.slane %v2714_v29, %v2718_v62 }
0x37bf   :  { %v2877_v32 = vadd.f32 %v5884_v27, %v5989_v30  ;;  %v2875_v49 = vadd.f32 %v5881_v31, %v5991_v33  ;;  %v3144_v41 = vadd.f32 %v5928_v28, %v5989_v30  ;;  %v6003_v44 = vadd.f32 %v5950_v61, %v5989_v30 }
0x37c0   :  { %v6007_v18 = vadd.f32 %v5947_v59, %v5991_v33 }
0x37c1   :  { %v2881_v40 = vmax.f32 %v2875_v49, %v2877_v32 }
0x37c2   :  { %v3282_v31 = vmax.f32 %v6007_v18, %v6003_v44 }
0x380c   :  { %v3485_v52 = vpop.permute.xlu0 %3484 }
0x380d   :  { %v3487_v51 = vmul.f32 %v4563_v48, %v3485_v52  ;;  %v6025_v48 = vadd.f32 %v5906_v36, %v5989_v30  ;;  %v6029_v52 = vadd.f32 %v5903_v34, %v5991_v33 }
0x380f   :  { %3489 = vrot.lane.b32.xlu1 %v3487_v51, %s5162_s29  ;;  %v3014_v51 = vmax.f32 %v6029_v52, %v6025_v48 }
0x3881   :  { %v3490_v53 = vpop.permute.xlu1 %3489 }
0x3882   :  { %v3492_v54 = vadd.f32 %v3490_v53, %v3435_v45  ;;  %v3412_v53 = vadd.f32 %v5971_v38, %v5989_v30 }
0x3884   :  { %4564 = vtanh.f32 %v3492_v54  ;;  %v3410_v54 = vadd.f32 %v5968_v37, %v5991_v33 }
0x3891   :  { %v4565_v55 = vpop.eup %4564 }
0x3892   :  { %3496 = vrot.lane.b32.xlu0 %v4565_v55, %s5183_s8  ;;  %v3416_v55 = vmax.f32 %v3410_v54, %v3412_v53 }
0x3904   :  { %v3497_v7 = vpop.permute.xlu0 %3496 }
0x3905   :  { %v3499_v58 = vmul.f32 %v3497_v7, %v3494_v39 }
0x3907   :  { %v3501_v21 = vadd.f32 %v3500_v57, %v3499_v58 }
0x3909   :  { %v3502_v60 = vpack.c.bf16 %v3501_v21, %v3501_v21 }
0x390b   :  { %3504 = vrot.lane.b32.xlu1 %v3502_v60, %s5183_s8 }
0x397d   :  { %v3505_v1 = vpop.permute.xlu1 %3504 }
0x397e   :  { %3939 = vmatmul.mubr.msk.bf16.vlgmr.msra.gmra.mxu0 %vm413_vm0, %v3505_v1  ;;  %4321 = vmatmul.mubr.msk.bf16.vlgmr.msra.gmra.mxu1 %vm413_vm0, %v3505_v1 }
0x397f   :  { %3656 = vmatpush1.bf16.msra.mxu0 %v5853_v10  ;;  %3675 = vmatprep.mubr.bf16.mxu0 %v5180_v0 }
0x3980   :  { %3657 = vmatprep.subr.bf16.mxu0 %v5856_v24 }
0x3983   :  { %3658 = vmatpush1.bf16.msra.mxu0 %v5861_v11 }
0x3a3e   :  { %v3543_v25 = vpop.f32.mrf.mxu0  ;;  %v3604_v63 = vpop.f32.mrf.mxu1 }
0x3a3f   :  { %v3605_v3 = vadd.f32 %v5844_v56, %v3604_v63  ;;  %v6015_v28 = vadd.f32 %v3543_v25, %v5991_v33 }
0x3a40   :  { %v3545_v9 = vpop.f32.mrf.mxu0  ;;  %v4322_v4 = vpop.f32.mrf.mxu1 }
0x3a41   :  { %3618 = vrot.lane.b32.xlu0 %v3605_v3, %s5162_s29  ;;  %v3610_v10 = vadd.f32 %v3605_v3, %v3569_v14  ;;  %v6012_v27 = vadd.f32 %v3545_v9, %v5989_v30 }
0x3a42   :  { %v3547_v5 = vpop.f32.mrf.mxu0  ;;  %v3607_v6 = vpop.f32.mrf.mxu1 }
0x3a43   :  { %v3941_v15 = vmul.f32 -1.442695, %v3610_v10 }
0x3a44   :  { %v3548_v12 = vpop.f32.mrf.mxu0  ;;  %v4323_v13 = vpop.f32.mrf.mxu1 }
0x3a45   :  { %4566 = vpow2.f32 %v3941_v15 }
0x3a52   :  { %v4567_v0 = vpop.eup %4566 }
0x3a53   :  { %v3614_v24 = vadd.f32 1.0, %v4567_v0 }
0x3a55   :  { %4568 = vrcp.f32 %v3614_v24 }
0x3a62   :  { %v4569_v11 = vpop.eup %4568 }
0x3a63   :  { %v3628_v61 = vsub.f32 1.0, %v4569_v11  ;;  %v3634_v46 = vmul.f32 %v4569_v11, %v3501_v21 }
0x3ab3   :  { %v3619_v16 = vpop.permute.xlu0 %3618 }
0x3ab4   :  { %v3621_v17 = vmul.f32 %v4569_v11, %v3619_v16 }
0x3ab6   :  { %3623 = vrot.lane.b32.xlu1 %v3621_v17, %s5162_s29  ;;  %s5187_s29 = smov [#allocation36]  }
0x3ab7   :  { %s3720_s1 = sshll.u32 %s5187_s29, 4  ;;  %s3721_s1 = int_to_ptr.vmem [resolvable:$true] %s3720_s1 }
0x3ab8   :  { %s4996_s17 = scalar_lea.vmem %s3721_s1, 128  ;;  %p5001_p12 = scmp.lt.s32.totalorder %s3721_s1, %s3721_s1 }
0x3ab9   :  { %p4997_p11 = scmp.ne.s32.totalorder %s3721_s1, %s4996_s17  ;;  %p5002_p13 = scmp.lt.s32.totalorder %s4996_s17, %s4996_s17 }
0x3abb   :  { %p5003_p0 = por %p5002_p13, %p5001_p12 }
0x3abd   :  { %p5004_p1 = pnand %p5003_p0, %p4997_p11 }
0x3b28   :  { %v3624_v56 = vpop.permute.xlu1 %3623 }
0x3b29   :  { %v3626_v19 = vadd.f32 %v3624_v56, %v3569_v14 }
0x3b2b   :  { %4570 = vtanh.f32 %v3626_v19 }
0x3b38   :  { %v4571_v22 = vpop.eup %4570 }
0x3b39   :  { %3630 = vrot.lane.b32.xlu0 %v4571_v22, %s5183_s8 }
0x3b3d   :  { %2365 = vrot.lane.b32.xlu0 %v5804_v2, %s5185_s13  ;;  %v3142_v2 = vadd.f32 %v5925_v26, %v5991_v33  ;;  %v3550_v26 = vmax.f32 %v6015_v28, %v6012_v27 }
0x3b3f   :  { %v3148_v43 = vmax.f32 %v3142_v2, %v3144_v41 }
0x3b5c   :  { %2882 = vmax.xlane.f32.xlu0 %v2881_v40 }
0x3b60   :  { %3149 = vmax.xlane.f32.xlu0 %v3148_v43 }
0x3b64   :  { %3283 = vmax.xlane.f32.xlu0 %v3282_v31 }
0x3b68   :  { %3551 = vmax.xlane.f32.xlu0 %v3550_v26 }
0x3bab   :  { %v3631_v45 = vpop.permute.xlu0 %3630 }
0x3bac   :  { %v3633_v59 = vmul.f32 %v3631_v45, %v3628_v61 }
0x3bae   :  { %v3635_v47 = vadd.f32 %v3634_v46, %v3633_v59 }
0x3baf   :  { %v2366_v50 = vpop.permute.xlu0 %2365 }
0x3bb0   :  { %v3636_v8 = vpack.c.bf16 %v3635_v47, %v3635_v47  ;;  %2368 = vst.msk [vmem:[#allocation38] sm:$0xff] %vm2362_vm7, %v2366_v50 }
0x3bb2   :  { %3638 = vrot.lane.b32.xlu1 %v3636_v8, %s5183_s8 }
0x3bb6   :  { %2565 = vrot.lane.b32.xlu1 %v5818_v35, %s5185_s13 }
0x3bda   :  { %3015 = vmax.xlane.f32.xlu1 %v3014_v51 }
0x3bde   :  { %3417 = vmax.xlane.f32.xlu1 %v3416_v55 }
0x3be5   :  { %v2883_v35 = vpop.xlane.xlu0 %2882 }
0x3be6   :  { %v2884_v39 = vsub.f32 %v2875_v49, %v2883_v35  ;;  %v2885_v36 = vsub.f32 %v2877_v32, %v2883_v35 }
0x3be8   :  { %v2886_v7 = vmul.f32 1.442695, %v2884_v39  ;;  %v2888_v57 = vmul.f32 1.442695, %v2885_v36 }
0x3be9   :  { %v3150_v58 = vpop.xlane.xlu0 %3149 }
0x3bea   :  { %4572 = vpow2.f32 %v2886_v7  ;;  %v3151_v34 = vsub.f32 %v3142_v2, %v3150_v58  ;;  %v3152_v21 = vsub.f32 %v3144_v41, %v3150_v58 }
0x3beb   :  { %4574 = vpow2.f32 %v2888_v57 }
0x3bec   :  { %v3153_v60 = vmul.f32 1.442695, %v3151_v34  ;;  %v3155_v1 = vmul.f32 1.442695, %v3152_v21 }
0x3bed   :  { %v3284_v11 = vpop.xlane.xlu0 %3283 }
0x3bee   :  { %4576 = vpow2.f32 %v3153_v60  ;;  %v3285_v40 = vsub.f32 %v6007_v18, %v3284_v11  ;;  %v3286_v2 = vsub.f32 %v6003_v44, %v3284_v11 }
0x3bef   :  { %4578 = vpow2.f32 %v3155_v1 }
0x3bf0   :  { %v3287_v31 = vmul.f32 1.442695, %v3285_v40  ;;  %v3289_v61 = vmul.f32 1.442695, %v3286_v2 }
0x3bf1   :  { %v3552_v17 = vpop.xlane.xlu0 %3551 }
0x3bf2   :  { %v3553_v26 = vsub.f32 %v6015_v28, %v3552_v17  ;;  %v3554_v45 = vsub.f32 %v6012_v27, %v3552_v17 }
0x3bf4   :  { %v3555_v46 = vmul.f32 1.442695, %v3553_v26  ;;  %v3557_v59 = vmul.f32 1.442695, %v3554_v45 }
0x3bf7   :  { %v4573_v38 = vpop.eup %4572 }
0x3bf8   :  { %v4575_v25 = vpop.eup %4574 }
0x3bf9   :  { %v2890_v37 = vadd.f32 %v4575_v25, %v4573_v38 }
0x3bfb   :  { %v4577_v63 = vpop.eup %4576  ;;  %2891 = vadd.xlane.f32.xlu0 %v2890_v37 }
0x3bfc   :  { %v4579_v3 = vpop.eup %4578 }
0x3bfd   :  { %v3157_v9 = vadd.f32 %v4579_v3, %v4577_v63 }
0x3bff   :  { %3158 = vadd.xlane.f32.xlu0 %v3157_v9 }
0x3c24   :  { %v3639_v4 = vpop.permute.xlu1 %3638 }
0x3c25   :  { %3942 = vmatmul.mubr.msk.bf16.vlgmr.msra.gmra.mxu0 %vm413_vm0, %v3639_v4 }
0x3c28   :  { %v2566_v5 = vpop.permute.xlu1 %2565 }
0x3c29   :  { %2568 = vst.msk [vmem:[#allocation41] sm:$0xff] %vm2362_vm7, %v2566_v5 }
0x3c63   :  { %v3016_v6 = vpop.xlane.xlu1 %3015 }
0x3c64   :  { %v3017_v32 = vsub.f32 %v6029_v52, %v3016_v6  ;;  %v3018_v49 = vsub.f32 %v6025_v48, %v3016_v6 }
0x3c66   :  { %v3019_v41 = vmul.f32 1.442695, %v3017_v32  ;;  %v3021_v43 = vmul.f32 1.442695, %v3018_v49 }
0x3c67   :  { %v3418_v12 = vpop.xlane.xlu1 %3417 }
0x3c68   :  { %v3419_v13 = vsub.f32 %v3410_v54, %v3418_v12  ;;  %v3420_v14 = vsub.f32 %v3412_v53, %v3418_v12 }
0x3c6a   :  { %v3421_v10 = vmul.f32 1.442695, %v3419_v13  ;;  %v3423_v15 = vmul.f32 1.442695, %v3420_v14 }
0x3c6c   :  { %4580 = vpow2.f32 %v3421_v10 }
0x3c6d   :  { %4582 = vpow2.f32 %v3423_v15 }
0x3c79   :  { %v4581_v0 = vpop.eup %4580 }
0x3c7a   :  { %v4583_v24 = vpop.eup %4582 }
0x3c7b   :  { %v3425_v16 = vadd.f32 %v4583_v24, %v4581_v0 }
0x3c7d   :  { %3426 = vadd.xlane.f32.xlu0 %v3425_v16 }
0x3c84   :  { %v2892_v56 = vpop.xlane.xlu0 %2891 }
0x3c85   :  { %4584 = vrcp.f32 %v2892_v56 }
0x3c88   :  { %v3159_v19 = vpop.xlane.xlu0 %3158 }
0x3c89   :  { %4586 = vrcp.f32 %v3159_v19 }
0x3c8a   :  { %4588 = vpow2.f32 %v3019_v41 }
0x3c8b   :  { %4590 = vpow2.f32 %v3021_v43 }
0x3c8c   :  { %4592 = vpow2.f32 %v3287_v31 }
0x3c8d   :  { %4594 = vpow2.f32 %v3289_v61 }
0x3c8e   :  { %4596 = vpow2.f32 %v3555_v46 }
0x3c8f   :  { %4598 = vpow2.f32 %v3557_v59 }
0x3c92   :  { %v4585_v22 = vpop.eup %4584 }
0x3c93   :  { %v2894_v23 = vmul.f32 %v4585_v22, %v4573_v38  ;;  %v2895_v20 = vmul.f32 %v4585_v22, %v4575_v25 }
0x3c95   :  { %2896 = vst [vmem:[#allocation35] sm:$0xff] %v2894_v23  ;;  %2897 = vst [vmem:[#allocation35 + $0x8] sm:$0xff] %v2895_v20 }
0x3c96   :  { %v4587_v42 = vpop.eup %4586 }
0x3c97   :  { %v3161_v62 = vmul.f32 %v4587_v42, %v4577_v63  ;;  %v3162_v29 = vmul.f32 %v4587_v42, %v4579_v3  ;;  %v4589_v48 = vpop.eup %4588 }
0x3c98   :  { %v4591_v52 = vpop.eup %4590 }
0x3c99   :  { %3164 = vst [vmem:[#allocation35 + $0x20] sm:$0xff] %v3161_v62  ;;  %3165 = vst [vmem:[#allocation35 + $0x28] sm:$0xff] %v3162_v29  ;;  %v4593_v27 = vpop.eup %4592  ;;  %v3023_v53 = vadd.f32 %v4591_v52, %v4589_v48 }
0x3c9a   :  { %v4595_v54 = vpop.eup %4594 }
0x3c9b   :  { %v4597_v55 = vpop.eup %4596  ;;  %v3291_v35 = vadd.f32 %v4595_v54, %v4593_v27 }
0x3c9c   :  { %v4599_v39 = vpop.eup %4598 }
0x3c9d   :  { %v3559_v36 = vadd.f32 %v4599_v39, %v4597_v55 }
0x3ce5   :  { %v3677_v47 = vpop.f32.mrf.mxu0 }
0x3ce6   :  { %v3678_v50 = vadd.f32 %v3677_v47, %v5991_v33 }
0x3ce7   :  { %v3679_v18 = vpop.f32.mrf.mxu0 }
0x3ce8   :  { %v3680_v44 = vadd.f32 %v3679_v18, %v5989_v30 }
0x3ce9   :  { %v3681_v8 = vpop.f32.mrf.mxu0 }
0x3cea   :  { %v3684_v28 = vmax.f32 %v3678_v50, %v3680_v44 }
0x3ceb   :  { %v3682_v51 = vpop.f32.mrf.mxu0 }
0x3cec   :  { %3685 = vmax.xlane.f32.xlu1 %v3684_v28 }
0x3cf0   :  { %3024 = vadd.xlane.f32.xlu1 %v3023_v53 }
0x3cf4   :  { %3292 = vadd.xlane.f32.xlu1 %v3291_v35 }
0x3cf8   :  { %3560 = vadd.xlane.f32.xlu1 %v3559_v36 }
0x3d06   :  { %v3427_v7 = vpop.xlane.xlu0 %3426 }
0x3d07   :  { %4600 = vrcp.f32 %v3427_v7 }
0x3d14   :  { %v4601_v33 = vpop.eup %4600 }
0x3d15   :  { %v3429_v30 = vmul.f32 %v4601_v33, %v4581_v0  ;;  %v3430_v57 = vmul.f32 %v4601_v33, %v4583_v24 }
0x3d17   :  { %3432 = vst [vmem:[#allocation35 + $0x40] sm:$0xff] %v3429_v30  ;;  %3433 = vst [vmem:[#allocation35 + $0x48] sm:$0xff] %v3430_v57 }
0x3d75   :  { %v3686_v58 = vpop.xlane.xlu1 %3685 }
0x3d76   :  { %v3687_v34 = vsub.f32 %v3678_v50, %v3686_v58  ;;  %v3688_v21 = vsub.f32 %v3680_v44, %v3686_v58 }
0x3d78   :  { %v3689_v60 = vmul.f32 1.442695, %v3687_v34  ;;  %v3691_v1 = vmul.f32 1.442695, %v3688_v21 }
0x3d79   :  { %v3025_v38 = vpop.xlane.xlu1 %3024 }
0x3d7a   :  { %4602 = vpow2.f32 %v3689_v60 }
0x3d7b   :  { %4604 = vpow2.f32 %v3691_v1 }
0x3d7c   :  { %4606 = vrcp.f32 %v3025_v38 }
0x3d7d   :  { %v3293_v25 = vpop.xlane.xlu1 %3292 }
0x3d7e   :  { %4608 = vrcp.f32 %v3293_v25 }
0x3d81   :  { %v3561_v37 = vpop.xlane.xlu1 %3560 }
0x3d82   :  { %4610 = vrcp.f32 %v3561_v37 }
0x3d87   :  { %v6047_v63 = vpop.eup %4602 }
0x3d88   :  { %v6049_v3 = vpop.eup %4604 }
0x3d89   :  { %v4607_v9 = vpop.eup %4606  ;;  %v3693_v4 = vadd.f32 %v6049_v3, %v6047_v63 }
0x3d8a   :  { %v3027_v5 = vmul.f32 %v4607_v9, %v4589_v48  ;;  %v3028_v6 = vmul.f32 %v4607_v9, %v4591_v52 }
0x3d8b   :  { %v4609_v12 = vpop.eup %4608  ;;  %3694 = vadd.xlane.f32.xlu0 %v3693_v4 }
0x3d8c   :  { %3030 = vst [vmem:[#allocation35 + $0x10] sm:$0xff] %v3027_v5  ;;  %3031 = vst [vmem:[#allocation35 + $0x18] sm:$0xff] %v3028_v6  ;;  %v3295_v13 = vmul.f32 %v4609_v12, %v4593_v27  ;;  %v3296_v14 = vmul.f32 %v4609_v12, %v4595_v54 }
0x3d8e   :  { %3298 = vst [vmem:[#allocation35 + $0x30] sm:$0xff] %v3295_v13  ;;  %3299 = vst [vmem:[#allocation35 + $0x38] sm:$0xff] %v3296_v14 }
0x3d8f   :  { %v4611_v10 = vpop.eup %4610 }
0x3d90   :  { %v3563_v15 = vmul.f32 %v4611_v10, %v4597_v55  ;;  %v3564_v0 = vmul.f32 %v4611_v10, %v4599_v39 }
0x3d92   :  { %3566 = vst [vmem:[#allocation35 + $0x50] sm:$0xff] %v3563_v15  ;;  %3567 = vst [vmem:[#allocation35 + $0x58] sm:$0xff] %v3564_v0 }
0x3d93   :  { %5007 = shalt.err (!%p5004_p1)
}
0x3d94   :  { %3723 = dma.vmem_to_hbm [thread:$0]  %s3721_s1, 128, %s5361_s27, [#allocation37]  }
0x3d95   :  { %s5016_s10 = scalar_lea.vmem %s3741_s7, 128  ;;  %p5021_p3 = scmp.lt.s32.totalorder %s3741_s7, %s3741_s7 }
0x3d96   :  { %p5017_p2 = scmp.ne.s32.totalorder %s3741_s7, %s5016_s10  ;;  %p5022_p4 = scmp.lt.s32.totalorder %s5016_s10, %s5016_s10 }
0x3d98   :  { %p5023_p5 = por %p5022_p4, %p5021_p3 }
0x3d9a   :  { %p5024_p6 = pnand %p5023_p5, %p5017_p2 }
0x3d9c   :  { %5027 = shalt.err (!%p5024_p6)
}
0x3d9d   :  { %3743 = dma.vmem_to_hbm [thread:$0]  %s3741_s7, 128, %s5371_s3, [#allocation40]  }
0x3d9e   :  { %s5189_s24 = smov [#allocation38]  }
0x3d9f   :  { %s3730_s9 = sshll.u32 %s5189_s24, 4  ;;  %s3731_s9 = int_to_ptr.vmem [resolvable:$true] %s3730_s9 }
0x3da0   :  { %s5036_s6 = scalar_lea.vmem %s3731_s9, 128  ;;  %p5041_p8 = scmp.lt.s32.totalorder %s3731_s9, %s3731_s9 }
0x3da1   :  { %p5037_p7 = scmp.ne.s32.totalorder %s3731_s9, %s5036_s6  ;;  %p5042_p9 = scmp.lt.s32.totalorder %s5036_s6, %s5036_s6 }
0x3da3   :  { %p5043_p10 = por %p5042_p9, %p5041_p8 }
0x3da5   :  { %p5044_p11 = pnand %p5043_p10, %p5037_p7 }
0x3da7   :  { %5047 = shalt.err (!%p5044_p11)
}
0x3da8   :  { %3733 = dma.vmem_to_hbm [thread:$0]  %s3731_s9, 128, %s5366_s5, [#allocation37]  }
0x3da9   :  { %s5190_s27 = smov [#allocation41]  }
0x3daa   :  { %s3750_s11 = sshll.u32 %s5190_s27, 4  ;;  %s3751_s11 = int_to_ptr.vmem [resolvable:$true] %s3750_s11 }
0x3dab   :  { %s5056_s15 = scalar_lea.vmem %s3751_s11, 128  ;;  %p5061_p13 = scmp.lt.s32.totalorder %s3751_s11, %s3751_s11 }
0x3dac   :  { %p5057_p12 = scmp.ne.s32.totalorder %s3751_s11, %s5056_s15  ;;  %p5062_p0 = scmp.lt.s32.totalorder %s5056_s15, %s5056_s15 }
0x3dae   :  { %p5063_p1 = por %p5062_p0, %p5061_p13 }
0x3db0   :  { %p5064_p2 = pnand %p5063_p1, %p5057_p12 }
0x3db2   :  { %5067 = shalt.err (!%p5064_p2)
}
0x3db3   :  { %3753 = dma.vmem_to_hbm [thread:$0]  %s3751_s11, 128, %s5376_s12, [#allocation40]  }
0x3db4   :  { %s5191_s3 = smov [#allocation35]  }
0x3db5   :  { %s3707_s26 = sshll.u32 %s5191_s3, 4  ;;  %s3708_s26 = int_to_ptr.vmem [resolvable:$true] %s3707_s26 }
0x3db6   :  { %s5076_s5 = scalar_lea.vmem %s3708_s26, 1792  ;;  %p5081_p4 = scmp.lt.s32.totalorder %s3708_s26, %s3708_s26 }
0x3db7   :  { %p5077_p3 = scmp.ne.s32.totalorder %s3708_s26, %s5076_s5  ;;  %p5082_p5 = scmp.lt.s32.totalorder %s5076_s5, %s5076_s5 }
0x3db9   :  { %p5083_p6 = por %p5082_p5, %p5081_p4 }
0x3dbb   :  { %p5084_p7 = pnand %p5083_p6, %p5077_p3 }
0x3e14   :  { %v3695_v24 = vpop.xlane.xlu0 %3694 }
0x3e15   :  { %4612 = vrcp.f32 %v3695_v24 }
0x3e22   :  { %v4613_v11 = vpop.eup %4612 }
0x3e23   :  { %v3697_v16 = vmul.f32 %v4613_v11, %v6047_v63  ;;  %v3698_v17 = vmul.f32 %v4613_v11, %v6049_v3 }
0x3e25   :  { %3700 = vst [vmem:[#allocation35 + $0x60] sm:$0xff] %v3697_v16  ;;  %3701 = vst [vmem:[#allocation35 + $0x68] sm:$0xff] %v3698_v17 }
0x3e26   :  { %5087 = shalt.err (!%p5084_p7)
}
0x3e27   :  { %s5192_s12 = smov 256   ;;  %s6106_s21 = sld [smem:[#allocation72_spill]] }
0x3e2d   :  { %3713 = dma.vmem_to_hbm [thread:$0]  %s3708_s26, 1792, %s6106_s21, [#allocation7], %s5192_s12, %s5192_s12, %s5184_s30  }
0x3e2e   :  { %5116 = dma.done.wait [#allocation7], 1792  }
0x3e2f   :  { %5117 = vsyncadd [#allocation7], 4294965504 }
0x3e30   :  { %5118 = dma.done.wait [#allocation37], 256  }
0x3e31   :  { %5119 = vsyncadd [#allocation37], 4294967040 }
0x3e32   :  { %5120 = dma.done.wait [#allocation40], 256  }
0x3e33   :  { %5121 = vsyncadd [#allocation40], 4294967040 }
0x3e34   :  { %3769 = vsyncpa [#allocation6], 1 }
0x3e35   :  { %3770 = vsyncpa [#allocation9], 1 }
0x3e36   :  { %3771 = vsyncpa [#allocation12], 1 }
0x3e37   :  { %3772 = vsyncpa [#allocation15], 1 }
0x3e38   :  { %3773 = vsyncpa [#allocation18], 1 }
0x3e39   :  { %3774 = vsyncpa [#allocation21], 1 }
0x3e3a   :  { %3775 = vsyncpa [#allocation24], 1 }
0x3e3b   :  { %3776 = vsyncpa [#allocation27], 1 }
0x3e3c   :  { %3777 = vsyncpa [#allocation30], 1 }
0x3e3d   :  { %3778 = vsyncpa [#allocation33], 1 }
0x3e3e   :  { %3779 = vsyncpa [#allocation7], 1 }
0x3e3f   :  { %3780 = vsyncpa [#allocation37], 1 }
0x3e40   :  { %3781 = vsyncpa [#allocation40], 1 }

</bundles_post_ra>
